<compile_context>
chip_gen: v5e
topology: v5e:2x2
jax: 0.10.0
libtpu: 0.0.40
codegen_flags: <defaults>
</compile_context>

<pallas_src>
import numpy as np
import jax
import jax.numpy as jnp
from jax.experimental import pallas as pl
from jax.experimental.pallas import tpu as pltpu

INPUT_SIZE = 1
HIDDEN = 64
NUM_LAYERS = 2
OUTPUT_SIZE = 1
OUTPUT_SEQ_LEN = 6      # predict_step
SEQ_LEN = 16


def lstm_kernel(xg0_ref, whh0_ref, wih1_ref, whh1_ref, b1_ref, wlin_ref, blin_ref,
                out_ref):
    # xg0_ref : (T, 4H) f32  precomputed layer-0 input-gate contributions (+ bias)
    # whh0_ref: (H, 4H) f32  layer-0 recurrent weights (transposed)
    # wih1_ref: (H, 4H) f32  layer-1 input weights (transposed)
    # whh1_ref: (H, 4H) f32  layer-1 recurrent weights (transposed)
    # b1_ref  : (1, 4H) f32  layer-1 bias (b_ih + b_hh)
    # wlin_ref: (1, H)  f32  linear head weight
    # blin_ref: (1, 1)  f32  linear head bias (SMEM scalar)
    # out_ref : (1, 1)  f32  max of the last OUTPUT_SEQ_LEN predictions
    T = xg0_ref.shape[0]
    H = HIDDEN

    whh0 = whh0_ref[...]
    wih1 = wih1_ref[...]
    whh1 = whh1_ref[...]
    b1 = b1_ref[...]
    wlin = wlin_ref[...]

    def cell(gates, c):
        # gates: (1, 4H) pre-activation [i | f | g | o]
        i_f = jax.nn.sigmoid(gates[:, 0:2 * H])        # lane-aligned 128-wide slice
        i = i_f[:, 0:H]
        f = i_f[:, H:2 * H]
        g = jnp.tanh(gates[:, 2 * H:3 * H])
        o = jax.nn.sigmoid(gates[:, 3 * H:4 * H])
        c_new = f * c + i * g
        h_new = o * jnp.tanh(c_new)
        return h_new, c_new

    zero = jnp.zeros((1, H), jnp.float32)
    h0, c0 = zero, zero
    h1, c1 = zero, zero
    best = jnp.full((1, 1), -jnp.inf, jnp.float32)

    # Wavefront schedule, fully unrolled (T = 16 is static):
    #   iteration t emits layer-1 step (t-1) (consumes h0 after step t-1, already
    #   available) and layer-0 step t.  The two are data-independent, so the LLO
    #   scheduler overlaps the two recurrent chains inside this single basic block.
    for t in range(T + 1):
        if t >= 1:
            # ---- layer-1 step (t-1) --------------------------------------------
            g1 = (jnp.dot(h0, wih1, preferred_element_type=jnp.float32)
                  + jnp.dot(h1, whh1, preferred_element_type=jnp.float32)
                  + b1)
            h1, c1 = cell(g1, c1)
            if (t - 1) >= T - OUTPUT_SEQ_LEN:          # fused linear head + running max
                pred = jnp.sum(h1 * wlin, axis=1, keepdims=True)          # (1, 1)
                best = jnp.maximum(best, pred)
        if t < T:
            # ---- layer-0 step t -------------------------------------------------
            g0 = xg0_ref[t:t + 1, :] + jnp.dot(h0, whh0,
                                               preferred_element_type=jnp.float32)
            h0, c0 = cell(g0, c0)

    out_ref[...] = best + blin_ref[0, 0]


def prepare_params(params):
    """One-time reshaping of PyTorch-layout LSTM weights into kernel layout."""
    prepped = {
        # layer-0 input weights: input_size == 1, keep only the single column.
        "wih0_row": params["weight_ih_l0"][:, 0],                          # (4H,)
        "b0": params["bias_ih_l0"] + params["bias_hh_l0"],                 # (4H,)
        "whh0": jnp.transpose(params["weight_hh_l0"]),                     # (H, 4H)
        "wih1": jnp.transpose(params["weight_ih_l1"]),                     # (H, 4H)
        "whh1": jnp.transpose(params["weight_hh_l1"]),                     # (H, 4H)
        "b1": (params["bias_ih_l1"] + params["bias_hh_l1"]).reshape(1, 4 * HIDDEN),
        "wlin": params["linear_weight"],                                   # (1, H)
        "blin": params["linear_bias"].reshape(1, 1),                       # (1, 1)
    }
    return jax.tree_util.tree_map(lambda a: a.astype(jnp.float32), prepped)


@jax.jit
def lstm_forward(input_seq, prepped):
    """input_seq: (T,) f32.  Returns shape (1,) f32 == max(predictions[-6:])."""
    # Layer-0 input-gate contributions for all T steps: outer product + bias.
    xg0 = (input_seq.astype(jnp.float32)[:, None] * prepped["wih0_row"][None, :]
           + prepped["b0"][None, :])                                       # (T, 4H)

    vmem = pl.BlockSpec(memory_space=pltpu.MemorySpace.VMEM)
    smem = pl.BlockSpec(memory_space=pltpu.MemorySpace.SMEM)
    out = pl.pallas_call(
        lstm_kernel,
        out_shape=jax.ShapeDtypeStruct((1, OUTPUT_SIZE), jnp.float32),
        in_specs=[vmem, vmem, vmem, vmem, vmem, vmem, smem],
        out_specs=vmem,
    )(xg0, prepped["whh0"], prepped["wih1"], prepped["whh1"],
      prepped["b1"], prepped["wlin"], prepped["blin"])
    return out.reshape(OUTPUT_SIZE)


def lstm_reference(input_seq, params):
    """Pure-JAX reference matching torch.nn.LSTM semantics (batch=1)."""
    T = input_seq.shape[0]
    x = input_seq.reshape(T, INPUT_SIZE).astype(jnp.float32)
    h = [jnp.zeros((HIDDEN,), jnp.float32) for _ in range(NUM_LAYERS)]
    c = [jnp.zeros((HIDDEN,), jnp.float32) for _ in range(NUM_LAYERS)]
    outs = []
    for t in range(T):
        inp = x[t]
        for l in range(NUM_LAYERS):
            gates = (params[f"weight_ih_l{l}"] @ inp
                     + params[f"weight_hh_l{l}"] @ h[l]
                     + params[f"bias_ih_l{l}"] + params[f"bias_hh_l{l}"])
            i = jax.nn.sigmoid(gates[0 * HIDDEN:1 * HIDDEN])
            f = jax.nn.sigmoid(gates[1 * HIDDEN:2 * HIDDEN])
            g = jnp.tanh(gates[2 * HIDDEN:3 * HIDDEN])
            o = jax.nn.sigmoid(gates[3 * HIDDEN:4 * HIDDEN])
            c[l] = f * c[l] + i * g
            h[l] = o * jnp.tanh(c[l])
            inp = h[l]
        outs.append(h[-1])
    outs = jnp.stack(outs)                                                # (T, H)
    preds = outs @ params["linear_weight"].T + params["linear_bias"]      # (T, 1)
    return jnp.max(preds[-OUTPUT_SEQ_LEN:]).reshape(OUTPUT_SIZE)


def init_params(key):
    bound = 1.0 / np.sqrt(HIDDEN)
    params = {}
    in_sizes = [INPUT_SIZE] + [HIDDEN] * (NUM_LAYERS - 1)
    for l in range(NUM_LAYERS):
        key, k1, k2, k3, k4 = jax.random.split(key, 5)
        params[f"weight_ih_l{l}"] = jax.random.uniform(k1, (4 * HIDDEN, in_sizes[l]), jnp.float32, -bound, bound)
        params[f"weight_hh_l{l}"] = jax.random.uniform(k2, (4 * HIDDEN, HIDDEN), jnp.float32, -bound, bound)
        params[f"bias_ih_l{l}"] = jax.random.uniform(k3, (4 * HIDDEN,), jnp.float32, -bound, bound)
        params[f"bias_hh_l{l}"] = jax.random.uniform(k4, (4 * HIDDEN,), jnp.float32, -bound, bound)
    key, k1, k2 = jax.random.split(key, 3)
    params["linear_weight"] = jax.random.uniform(k1, (OUTPUT_SIZE, HIDDEN), jnp.float32, -bound, bound)
    params["linear_bias"] = jax.random.uniform(k2, (OUTPUT_SIZE,), jnp.float32, -bound, bound)
    return params


if __name__ == "__main__":
    key = jax.random.PRNGKey(0)
    key, k_x = jax.random.split(key)
    params = init_params(key)
    input_seq = jax.random.normal(k_x, (SEQ_LEN,), jnp.float32)

    prepped = prepare_params(params)                 # one-time weight repacking
    result = jax.block_until_ready(lstm_forward(input_seq, prepped))
    expected = jax.block_until_ready(lstm_reference(input_seq, params))
    np.testing.assert_allclose(np.asarray(result), np.asarray(expected), rtol=1e-5, atol=1e-5)
    print("KERNEL_OK")
</pallas_src>

<mosaic_0001>
module attributes {stable_mosaic.version = 11 : i64} {
  func.func @lstm_kernel(%arg0: memref<16x256xf32, #tpu.memory_space<vmem>>, %arg1: memref<64x256xf32, #tpu.memory_space<vmem>>, %arg2: memref<64x256xf32, #tpu.memory_space<vmem>>, %arg3: memref<64x256xf32, #tpu.memory_space<vmem>>, %arg4: memref<1x256xf32, #tpu.memory_space<vmem>>, %arg5: memref<1x64xf32, #tpu.memory_space<vmem>>, %arg6: memref<1x1xf32, #tpu.memory_space<smem>>, %arg7: memref<1x1xf32, #tpu.memory_space<vmem>>) attributes {dimension_semantics = [], scalar_prefetch = 0 : i64, scratch_operands = 0 : i64, tpu.core_type = #tpu.core_type<tc>} {
    %c0 = arith.constant 0 : index
    %c0_0 = arith.constant 0 : index
    %0 = vector.load %arg1[%c0, %c0_0] : memref<64x256xf32, #tpu.memory_space<vmem>>, vector<64x256xf32>
    %c0_1 = arith.constant 0 : index
    %c0_2 = arith.constant 0 : index
    %1 = vector.load %arg2[%c0_1, %c0_2] : memref<64x256xf32, #tpu.memory_space<vmem>>, vector<64x256xf32>
    %c0_3 = arith.constant 0 : index
    %c0_4 = arith.constant 0 : index
    %2 = vector.load %arg3[%c0_3, %c0_4] : memref<64x256xf32, #tpu.memory_space<vmem>>, vector<64x256xf32>
    %c0_5 = arith.constant 0 : index
    %c0_6 = arith.constant 0 : index
    %3 = vector.load %arg4[%c0_5, %c0_6] : memref<1x256xf32, #tpu.memory_space<vmem>>, vector<1x256xf32>
    %c0_7 = arith.constant 0 : index
    %c0_8 = arith.constant 0 : index
    %4 = vector.load %arg5[%c0_7, %c0_8] : memref<1x64xf32, #tpu.memory_space<vmem>>, vector<1x64xf32>
    %cst = arith.constant 0.000000e+00 : f32
    %5 = vector.broadcast %cst : f32 to vector<1x64xf32>
    %cst_9 = arith.constant 0xFF800000 : f32
    %6 = vector.broadcast %cst_9 : f32 to vector<1x1xf32>
    %c0_10 = arith.constant 0 : index
    %c0_11 = arith.constant 0 : index
    %7 = vector.load %arg0[%c0_10, %c0_11] : memref<16x256xf32, #tpu.memory_space<vmem>>, vector<1x256xf32>
    %cst_12 = arith.constant dense<0.000000e+00> : vector<1x256xf32>
    %8 = tpu.matmul %5, %0, %cst_12 {dimension_numbers = #tpu.dot_dimension_numbers<[1], [0], [0], [1], [0, 0, 1, 1], [], []>} : vector<1x64xf32>, vector<64x256xf32>, vector<1x256xf32> -> vector<1x256xf32>
    %9 = arith.addf %7, %8 : vector<1x256xf32>
    %10 = vector.extract_strided_slice %9 {offsets = [0, 0], sizes = [1, 128], strides = [1, 1]} : vector<1x256xf32> to vector<1x128xf32>
    %11 = arith.negf %10 : vector<1x128xf32>
    %12 = math.exp %11 : vector<1x128xf32>
    %cst_13 = arith.constant 1.000000e+00 : f32
    %13 = vector.broadcast %cst_13 : f32 to vector<1x128xf32>
    %14 = arith.addf %13, %12 : vector<1x128xf32>
    %15 = arith.divf %13, %14 : vector<1x128xf32>
    %16 = vector.extract_strided_slice %15 {offsets = [0, 0], sizes = [1, 64], strides = [1, 1]} : vector<1x128xf32> to vector<1x64xf32>
    %17 = vector.extract_strided_slice %15 {offsets = [0, 64], sizes = [1, 64], strides = [1, 1]} : vector<1x128xf32> to vector<1x64xf32>
    %18 = vector.extract_strided_slice %9 {offsets = [0, 128], sizes = [1, 64], strides = [1, 1]} : vector<1x256xf32> to vector<1x64xf32>
    %19 = math.tanh %18 : vector<1x64xf32>
    %20 = vector.extract_strided_slice %9 {offsets = [0, 192], sizes = [1, 64], strides = [1, 1]} : vector<1x256xf32> to vector<1x64xf32>
    %21 = arith.negf %20 : vector<1x64xf32>
    %22 = math.exp %21 : vector<1x64xf32>
    %cst_14 = arith.constant 1.000000e+00 : f32
    %23 = vector.broadcast %cst_14 : f32 to vector<1x64xf32>
    %24 = arith.addf %23, %22 : vector<1x64xf32>
    %25 = arith.divf %23, %24 : vector<1x64xf32>
    %26 = arith.mulf %17, %5 : vector<1x64xf32>
    %27 = arith.mulf %16, %19 : vector<1x64xf32>
    %28 = arith.addf %26, %27 : vector<1x64xf32>
    %29 = math.tanh %28 : vector<1x64xf32>
    %30 = arith.mulf %25, %29 : vector<1x64xf32>
    %cst_15 = arith.constant dense<0.000000e+00> : vector<1x256xf32>
    %31 = tpu.matmul %30, %1, %cst_15 {dimension_numbers = #tpu.dot_dimension_numbers<[1], [0], [0], [1], [0, 0, 1, 1], [], []>} : vector<1x64xf32>, vector<64x256xf32>, vector<1x256xf32> -> vector<1x256xf32>
    %cst_16 = arith.constant dense<0.000000e+00> : vector<1x256xf32>
    %32 = tpu.matmul %5, %2, %cst_16 {dimension_numbers = #tpu.dot_dimension_numbers<[1], [0], [0], [1], [0, 0, 1, 1], [], []>} : vector<1x64xf32>, vector<64x256xf32>, vector<1x256xf32> -> vector<1x256xf32>
    %33 = arith.addf %31, %32 : vector<1x256xf32>
    %34 = arith.addf %33, %3 : vector<1x256xf32>
    %35 = vector.extract_strided_slice %34 {offsets = [0, 0], sizes = [1, 128], strides = [1, 1]} : vector<1x256xf32> to vector<1x128xf32>
    %36 = arith.negf %35 : vector<1x128xf32>
    %37 = math.exp %36 : vector<1x128xf32>
    %cst_17 = arith.constant 1.000000e+00 : f32
    %38 = vector.broadcast %cst_17 : f32 to vector<1x128xf32>
    %39 = arith.addf %38, %37 : vector<1x128xf32>
    %40 = arith.divf %38, %39 : vector<1x128xf32>
    %41 = vector.extract_strided_slice %40 {offsets = [0, 0], sizes = [1, 64], strides = [1, 1]} : vector<1x128xf32> to vector<1x64xf32>
    %42 = vector.extract_strided_slice %40 {offsets = [0, 64], sizes = [1, 64], strides = [1, 1]} : vector<1x128xf32> to vector<1x64xf32>
    %43 = vector.extract_strided_slice %34 {offsets = [0, 128], sizes = [1, 64], strides = [1, 1]} : vector<1x256xf32> to vector<1x64xf32>
    %44 = math.tanh %43 : vector<1x64xf32>
    %45 = vector.extract_strided_slice %34 {offsets = [0, 192], sizes = [1, 64], strides = [1, 1]} : vector<1x256xf32> to vector<1x64xf32>
    %46 = arith.negf %45 : vector<1x64xf32>
    %47 = math.exp %46 : vector<1x64xf32>
    %cst_18 = arith.constant 1.000000e+00 : f32
    %48 = vector.broadcast %cst_18 : f32 to vector<1x64xf32>
    %49 = arith.addf %48, %47 : vector<1x64xf32>
    %50 = arith.divf %48, %49 : vector<1x64xf32>
    %51 = arith.mulf %42, %5 : vector<1x64xf32>
    %52 = arith.mulf %41, %44 : vector<1x64xf32>
    %53 = arith.addf %51, %52 : vector<1x64xf32>
    %54 = math.tanh %53 : vector<1x64xf32>
    %55 = arith.mulf %50, %54 : vector<1x64xf32>
    %c1 = arith.constant 1 : index
    %c0_19 = arith.constant 0 : index
    %56 = vector.load %arg0[%c1, %c0_19] : memref<16x256xf32, #tpu.memory_space<vmem>>, vector<1x256xf32>
    %cst_20 = arith.constant dense<0.000000e+00> : vector<1x256xf32>
    %57 = tpu.matmul %30, %0, %cst_20 {dimension_numbers = #tpu.dot_dimension_numbers<[1], [0], [0], [1], [0, 0, 1, 1], [], []>} : vector<1x64xf32>, vector<64x256xf32>, vector<1x256xf32> -> vector<1x256xf32>
    %58 = arith.addf %56, %57 : vector<1x256xf32>
    %59 = vector.extract_strided_slice %58 {offsets = [0, 0], sizes = [1, 128], strides = [1, 1]} : vector<1x256xf32> to vector<1x128xf32>
    %60 = arith.negf %59 : vector<1x128xf32>
    %61 = math.exp %60 : vector<1x128xf32>
    %cst_21 = arith.constant 1.000000e+00 : f32
    %62 = vector.broadcast %cst_21 : f32 to vector<1x128xf32>
    %63 = arith.addf %62, %61 : vector<1x128xf32>
    %64 = arith.divf %62, %63 : vector<1x128xf32>
    %65 = vector.extract_strided_slice %64 {offsets = [0, 0], sizes = [1, 64], strides = [1, 1]} : vector<1x128xf32> to vector<1x64xf32>
    %66 = vector.extract_strided_slice %64 {offsets = [0, 64], sizes = [1, 64], strides = [1, 1]} : vector<1x128xf32> to vector<1x64xf32>
    %67 = vector.extract_strided_slice %58 {offsets = [0, 128], sizes = [1, 64], strides = [1, 1]} : vector<1x256xf32> to vector<1x64xf32>
    %68 = math.tanh %67 : vector<1x64xf32>
    %69 = vector.extract_strided_slice %58 {offsets = [0, 192], sizes = [1, 64], strides = [1, 1]} : vector<1x256xf32> to vector<1x64xf32>
    %70 = arith.negf %69 : vector<1x64xf32>
    %71 = math.exp %70 : vector<1x64xf32>
    %cst_22 = arith.constant 1.000000e+00 : f32
    %72 = vector.broadcast %cst_22 : f32 to vector<1x64xf32>
    %73 = arith.addf %72, %71 : vector<1x64xf32>
    %74 = arith.divf %72, %73 : vector<1x64xf32>
    %75 = arith.mulf %66, %28 : vector<1x64xf32>
    %76 = arith.mulf %65, %68 : vector<1x64xf32>
    %77 = arith.addf %75, %76 : vector<1x64xf32>
    %78 = math.tanh %77 : vector<1x64xf32>
    %79 = arith.mulf %74, %78 : vector<1x64xf32>
    %cst_23 = arith.constant dense<0.000000e+00> : vector<1x256xf32>
    %80 = tpu.matmul %79, %1, %cst_23 {dimension_numbers = #tpu.dot_dimension_numbers<[1], [0], [0], [1], [0, 0, 1, 1], [], []>} : vector<1x64xf32>, vector<64x256xf32>, vector<1x256xf32> -> vector<1x256xf32>
    %cst_24 = arith.constant dense<0.000000e+00> : vector<1x256xf32>
    %81 = tpu.matmul %55, %2, %cst_24 {dimension_numbers = #tpu.dot_dimension_numbers<[1], [0], [0], [1], [0, 0, 1, 1], [], []>} : vector<1x64xf32>, vector<64x256xf32>, vector<1x256xf32> -> vector<1x256xf32>
    %82 = arith.addf %80, %81 : vector<1x256xf32>
    %83 = arith.addf %82, %3 : vector<1x256xf32>
    %84 = vector.extract_strided_slice %83 {offsets = [0, 0], sizes = [1, 128], strides = [1, 1]} : vector<1x256xf32> to vector<1x128xf32>
    %85 = arith.negf %84 : vector<1x128xf32>
    %86 = math.exp %85 : vector<1x128xf32>
    %cst_25 = arith.constant 1.000000e+00 : f32
    %87 = vector.broadcast %cst_25 : f32 to vector<1x128xf32>
    %88 = arith.addf %87, %86 : vector<1x128xf32>
    %89 = arith.divf %87, %88 : vector<1x128xf32>
    %90 = vector.extract_strided_slice %89 {offsets = [0, 0], sizes = [1, 64], strides = [1, 1]} : vector<1x128xf32> to vector<1x64xf32>
    %91 = vector.extract_strided_slice %89 {offsets = [0, 64], sizes = [1, 64], strides = [1, 1]} : vector<1x128xf32> to vector<1x64xf32>
    %92 = vector.extract_strided_slice %83 {offsets = [0, 128], sizes = [1, 64], strides = [1, 1]} : vector<1x256xf32> to vector<1x64xf32>
    %93 = math.tanh %92 : vector<1x64xf32>
    %94 = vector.extract_strided_slice %83 {offsets = [0, 192], sizes = [1, 64], strides = [1, 1]} : vector<1x256xf32> to vector<1x64xf32>
    %95 = arith.negf %94 : vector<1x64xf32>
    %96 = math.exp %95 : vector<1x64xf32>
    %cst_26 = arith.constant 1.000000e+00 : f32
    %97 = vector.broadcast %cst_26 : f32 to vector<1x64xf32>
    %98 = arith.addf %97, %96 : vector<1x64xf32>
    %99 = arith.divf %97, %98 : vector<1x64xf32>
    %100 = arith.mulf %91, %53 : vector<1x64xf32>
    %101 = arith.mulf %90, %93 : vector<1x64xf32>
    %102 = arith.addf %100, %101 : vector<1x64xf32>
    %103 = math.tanh %102 : vector<1x64xf32>
    %104 = arith.mulf %99, %103 : vector<1x64xf32>
    %c2 = arith.constant 2 : index
    %c0_27 = arith.constant 0 : index
    %105 = vector.load %arg0[%c2, %c0_27] : memref<16x256xf32, #tpu.memory_space<vmem>>, vector<1x256xf32>
    %cst_28 = arith.constant dense<0.000000e+00> : vector<1x256xf32>
    %106 = tpu.matmul %79, %0, %cst_28 {dimension_numbers = #tpu.dot_dimension_numbers<[1], [0], [0], [1], [0, 0, 1, 1], [], []>} : vector<1x64xf32>, vector<64x256xf32>, vector<1x256xf32> -> vector<1x256xf32>
    %107 = arith.addf %105, %106 : vector<1x256xf32>
    %108 = vector.extract_strided_slice %107 {offsets = [0, 0], sizes = [1, 128], strides = [1, 1]} : vector<1x256xf32> to vector<1x128xf32>
    %109 = arith.negf %108 : vector<1x128xf32>
    %110 = math.exp %109 : vector<1x128xf32>
    %cst_29 = arith.constant 1.000000e+00 : f32
    %111 = vector.broadcast %cst_29 : f32 to vector<1x128xf32>
    %112 = arith.addf %111, %110 : vector<1x128xf32>
    %113 = arith.divf %111, %112 : vector<1x128xf32>
    %114 = vector.extract_strided_slice %113 {offsets = [0, 0], sizes = [1, 64], strides = [1, 1]} : vector<1x128xf32> to vector<1x64xf32>
    %115 = vector.extract_strided_slice %113 {offsets = [0, 64], sizes = [1, 64], strides = [1, 1]} : vector<1x128xf32> to vector<1x64xf32>
    %116 = vector.extract_strided_slice %107 {offsets = [0, 128], sizes = [1, 64], strides = [1, 1]} : vector<1x256xf32> to vector<1x64xf32>
    %117 = math.tanh %116 : vector<1x64xf32>
    %118 = vector.extract_strided_slice %107 {offsets = [0, 192], sizes = [1, 64], strides = [1, 1]} : vector<1x256xf32> to vector<1x64xf32>
    %119 = arith.negf %118 : vector<1x64xf32>
    %120 = math.exp %119 : vector<1x64xf32>
    %cst_30 = arith.constant 1.000000e+00 : f32
    %121 = vector.broadcast %cst_30 : f32 to vector<1x64xf32>
    %122 = arith.addf %121, %120 : vector<1x64xf32>
    %123 = arith.divf %121, %122 : vector<1x64xf32>
    %124 = arith.mulf %115, %77 : vector<1x64xf32>
    %125 = arith.mulf %114, %117 : vector<1x64xf32>
    %126 = arith.addf %124, %125 : vector<1x64xf32>
    %127 = math.tanh %126 : vector<1x64xf32>
    %128 = arith.mulf %123, %127 : vector<1x64xf32>
    %cst_31 = arith.constant dense<0.000000e+00> : vector<1x256xf32>
    %129 = tpu.matmul %128, %1, %cst_31 {dimension_numbers = #tpu.dot_dimension_numbers<[1], [0], [0], [1], [0, 0, 1, 1], [], []>} : vector<1x64xf32>, vector<64x256xf32>, vector<1x256xf32> -> vector<1x256xf32>
    %cst_32 = arith.constant dense<0.000000e+00> : vector<1x256xf32>
    %130 = tpu.matmul %104, %2, %cst_32 {dimension_numbers = #tpu.dot_dimension_numbers<[1], [0], [0], [1], [0, 0, 1, 1], [], []>} : vector<1x64xf32>, vector<64x256xf32>, vector<1x256xf32> -> vector<1x256xf32>
    %131 = arith.addf %129, %130 : vector<1x256xf32>
    %132 = arith.addf %131, %3 : vector<1x256xf32>
    %133 = vector.extract_strided_slice %132 {offsets = [0, 0], sizes = [1, 128], strides = [1, 1]} : vector<1x256xf32> to vector<1x128xf32>
    %134 = arith.negf %133 : vector<1x128xf32>
    %135 = math.exp %134 : vector<1x128xf32>
    %cst_33 = arith.constant 1.000000e+00 : f32
    %136 = vector.broadcast %cst_33 : f32 to vector<1x128xf32>
    %137 = arith.addf %136, %135 : vector<1x128xf32>
    %138 = arith.divf %136, %137 : vector<1x128xf32>
    %139 = vector.extract_strided_slice %138 {offsets = [0, 0], sizes = [1, 64], strides = [1, 1]} : vector<1x128xf32> to vector<1x64xf32>
    %140 = vector.extract_strided_slice %138 {offsets = [0, 64], sizes = [1, 64], strides = [1, 1]} : vector<1x128xf32> to vector<1x64xf32>
    %141 = vector.extract_strided_slice %132 {offsets = [0, 128], sizes = [1, 64], strides = [1, 1]} : vector<1x256xf32> to vector<1x64xf32>
    %142 = math.tanh %141 : vector<1x64xf32>
    %143 = vector.extract_strided_slice %132 {offsets = [0, 192], sizes = [1, 64], strides = [1, 1]} : vector<1x256xf32> to vector<1x64xf32>
    %144 = arith.negf %143 : vector<1x64xf32>
    %145 = math.exp %144 : vector<1x64xf32>
    %cst_34 = arith.constant 1.000000e+00 : f32
    %146 = vector.broadcast %cst_34 : f32 to vector<1x64xf32>
    %147 = arith.addf %146, %145 : vector<1x64xf32>
    %148 = arith.divf %146, %147 : vector<1x64xf32>
    %149 = arith.mulf %140, %102 : vector<1x64xf32>
    %150 = arith.mulf %139, %142 : vector<1x64xf32>
    %151 = arith.addf %149, %150 : vector<1x64xf32>
    %152 = math.tanh %151 : vector<1x64xf32>
    %153 = arith.mulf %148, %152 : vector<1x64xf32>
    %c3 = arith.constant 3 : index
    %c0_35 = arith.constant 0 : index
    %154 = vector.load %arg0[%c3, %c0_35] : memref<16x256xf32, #tpu.memory_space<vmem>>, vector<1x256xf32>
    %cst_36 = arith.constant dense<0.000000e+00> : vector<1x256xf32>
    %155 = tpu.matmul %128, %0, %cst_36 {dimension_numbers = #tpu.dot_dimension_numbers<[1], [0], [0], [1], [0, 0, 1, 1], [], []>} : vector<1x64xf32>, vector<64x256xf32>, vector<1x256xf32> -> vector<1x256xf32>
    %156 = arith.addf %154, %155 : vector<1x256xf32>
    %157 = vector.extract_strided_slice %156 {offsets = [0, 0], sizes = [1, 128], strides = [1, 1]} : vector<1x256xf32> to vector<1x128xf32>
    %158 = arith.negf %157 : vector<1x128xf32>
    %159 = math.exp %158 : vector<1x128xf32>
    %cst_37 = arith.constant 1.000000e+00 : f32
    %160 = vector.broadcast %cst_37 : f32 to vector<1x128xf32>
    %161 = arith.addf %160, %159 : vector<1x128xf32>
    %162 = arith.divf %160, %161 : vector<1x128xf32>
    %163 = vector.extract_strided_slice %162 {offsets = [0, 0], sizes = [1, 64], strides = [1, 1]} : vector<1x128xf32> to vector<1x64xf32>
    %164 = vector.extract_strided_slice %162 {offsets = [0, 64], sizes = [1, 64], strides = [1, 1]} : vector<1x128xf32> to vector<1x64xf32>
    %165 = vector.extract_strided_slice %156 {offsets = [0, 128], sizes = [1, 64], strides = [1, 1]} : vector<1x256xf32> to vector<1x64xf32>
    %166 = math.tanh %165 : vector<1x64xf32>
    %167 = vector.extract_strided_slice %156 {offsets = [0, 192], sizes = [1, 64], strides = [1, 1]} : vector<1x256xf32> to vector<1x64xf32>
    %168 = arith.negf %167 : vector<1x64xf32>
    %169 = math.exp %168 : vector<1x64xf32>
    %cst_38 = arith.constant 1.000000e+00 : f32
    %170 = vector.broadcast %cst_38 : f32 to vector<1x64xf32>
    %171 = arith.addf %170, %169 : vector<1x64xf32>
    %172 = arith.divf %170, %171 : vector<1x64xf32>
    %173 = arith.mulf %164, %126 : vector<1x64xf32>
    %174 = arith.mulf %163, %166 : vector<1x64xf32>
    %175 = arith.addf %173, %174 : vector<1x64xf32>
    %176 = math.tanh %175 : vector<1x64xf32>
    %177 = arith.mulf %172, %176 : vector<1x64xf32>
    %cst_39 = arith.constant dense<0.000000e+00> : vector<1x256xf32>
    %178 = tpu.matmul %177, %1, %cst_39 {dimension_numbers = #tpu.dot_dimension_numbers<[1], [0], [0], [1], [0, 0, 1, 1], [], []>} : vector<1x64xf32>, vector<64x256xf32>, vector<1x256xf32> -> vector<1x256xf32>
    %cst_40 = arith.constant dense<0.000000e+00> : vector<1x256xf32>
    %179 = tpu.matmul %153, %2, %cst_40 {dimension_numbers = #tpu.dot_dimension_numbers<[1], [0], [0], [1], [0, 0, 1, 1], [], []>} : vector<1x64xf32>, vector<64x256xf32>, vector<1x256xf32> -> vector<1x256xf32>
    %180 = arith.addf %178, %179 : vector<1x256xf32>
    %181 = arith.addf %180, %3 : vector<1x256xf32>
    %182 = vector.extract_strided_slice %181 {offsets = [0, 0], sizes = [1, 128], strides = [1, 1]} : vector<1x256xf32> to vector<1x128xf32>
    %183 = arith.negf %182 : vector<1x128xf32>
    %184 = math.exp %183 : vector<1x128xf32>
    %cst_41 = arith.constant 1.000000e+00 : f32
    %185 = vector.broadcast %cst_41 : f32 to vector<1x128xf32>
    %186 = arith.addf %185, %184 : vector<1x128xf32>
    %187 = arith.divf %185, %186 : vector<1x128xf32>
    %188 = vector.extract_strided_slice %187 {offsets = [0, 0], sizes = [1, 64], strides = [1, 1]} : vector<1x128xf32> to vector<1x64xf32>
    %189 = vector.extract_strided_slice %187 {offsets = [0, 64], sizes = [1, 64], strides = [1, 1]} : vector<1x128xf32> to vector<1x64xf32>
    %190 = vector.extract_strided_slice %181 {offsets = [0, 128], sizes = [1, 64], strides = [1, 1]} : vector<1x256xf32> to vector<1x64xf32>
    %191 = math.tanh %190 : vector<1x64xf32>
    %192 = vector.extract_strided_slice %181 {offsets = [0, 192], sizes = [1, 64], strides = [1, 1]} : vector<1x256xf32> to vector<1x64xf32>
    %193 = arith.negf %192 : vector<1x64xf32>
    %194 = math.exp %193 : vector<1x64xf32>
    %cst_42 = arith.constant 1.000000e+00 : f32
    %195 = vector.broadcast %cst_42 : f32 to vector<1x64xf32>
    %196 = arith.addf %195, %194 : vector<1x64xf32>
    %197 = arith.divf %195, %196 : vector<1x64xf32>
    %198 = arith.mulf %189, %151 : vector<1x64xf32>
    %199 = arith.mulf %188, %191 : vector<1x64xf32>
    %200 = arith.addf %198, %199 : vector<1x64xf32>
    %201 = math.tanh %200 : vector<1x64xf32>
    %202 = arith.mulf %197, %201 : vector<1x64xf32>
    %c4 = arith.constant 4 : index
    %c0_43 = arith.constant 0 : index
    %203 = vector.load %arg0[%c4, %c0_43] : memref<16x256xf32, #tpu.memory_space<vmem>>, vector<1x256xf32>
    %cst_44 = arith.constant dense<0.000000e+00> : vector<1x256xf32>
    %204 = tpu.matmul %177, %0, %cst_44 {dimension_numbers = #tpu.dot_dimension_numbers<[1], [0], [0], [1], [0, 0, 1, 1], [], []>} : vector<1x64xf32>, vector<64x256xf32>, vector<1x256xf32> -> vector<1x256xf32>
    %205 = arith.addf %203, %204 : vector<1x256xf32>
    %206 = vector.extract_strided_slice %205 {offsets = [0, 0], sizes = [1, 128], strides = [1, 1]} : vector<1x256xf32> to vector<1x128xf32>
    %207 = arith.negf %206 : vector<1x128xf32>
    %208 = math.exp %207 : vector<1x128xf32>
    %cst_45 = arith.constant 1.000000e+00 : f32
    %209 = vector.broadcast %cst_45 : f32 to vector<1x128xf32>
    %210 = arith.addf %209, %208 : vector<1x128xf32>
    %211 = arith.divf %209, %210 : vector<1x128xf32>
    %212 = vector.extract_strided_slice %211 {offsets = [0, 0], sizes = [1, 64], strides = [1, 1]} : vector<1x128xf32> to vector<1x64xf32>
    %213 = vector.extract_strided_slice %211 {offsets = [0, 64], sizes = [1, 64], strides = [1, 1]} : vector<1x128xf32> to vector<1x64xf32>
    %214 = vector.extract_strided_slice %205 {offsets = [0, 128], sizes = [1, 64], strides = [1, 1]} : vector<1x256xf32> to vector<1x64xf32>
    %215 = math.tanh %214 : vector<1x64xf32>
    %216 = vector.extract_strided_slice %205 {offsets = [0, 192], sizes = [1, 64], strides = [1, 1]} : vector<1x256xf32> to vector<1x64xf32>
    %217 = arith.negf %216 : vector<1x64xf32>
    %218 = math.exp %217 : vector<1x64xf32>
    %cst_46 = arith.constant 1.000000e+00 : f32
    %219 = vector.broadcast %cst_46 : f32 to vector<1x64xf32>
    %220 = arith.addf %219, %218 : vector<1x64xf32>
    %221 = arith.divf %219, %220 : vector<1x64xf32>
    %222 = arith.mulf %213, %175 : vector<1x64xf32>
    %223 = arith.mulf %212, %215 : vector<1x64xf32>
    %224 = arith.addf %222, %223 : vector<1x64xf32>
    %225 = math.tanh %224 : vector<1x64xf32>
    %226 = arith.mulf %221, %225 : vector<1x64xf32>
    %cst_47 = arith.constant dense<0.000000e+00> : vector<1x256xf32>
    %227 = tpu.matmul %226, %1, %cst_47 {dimension_numbers = #tpu.dot_dimension_numbers<[1], [0], [0], [1], [0, 0, 1, 1], [], []>} : vector<1x64xf32>, vector<64x256xf32>, vector<1x256xf32> -> vector<1x256xf32>
    %cst_48 = arith.constant dense<0.000000e+00> : vector<1x256xf32>
    %228 = tpu.matmul %202, %2, %cst_48 {dimension_numbers = #tpu.dot_dimension_numbers<[1], [0], [0], [1], [0, 0, 1, 1], [], []>} : vector<1x64xf32>, vector<64x256xf32>, vector<1x256xf32> -> vector<1x256xf32>
    %229 = arith.addf %227, %228 : vector<1x256xf32>
    %230 = arith.addf %229, %3 : vector<1x256xf32>
    %231 = vector.extract_strided_slice %230 {offsets = [0, 0], sizes = [1, 128], strides = [1, 1]} : vector<1x256xf32> to vector<1x128xf32>
    %232 = arith.negf %231 : vector<1x128xf32>
    %233 = math.exp %232 : vector<1x128xf32>
    %cst_49 = arith.constant 1.000000e+00 : f32
    %234 = vector.broadcast %cst_49 : f32 to vector<1x128xf32>
    %235 = arith.addf %234, %233 : vector<1x128xf32>
    %236 = arith.divf %234, %235 : vector<1x128xf32>
    %237 = vector.extract_strided_slice %236 {offsets = [0, 0], sizes = [1, 64], strides = [1, 1]} : vector<1x128xf32> to vector<1x64xf32>
    %238 = vector.extract_strided_slice %236 {offsets = [0, 64], sizes = [1, 64], strides = [1, 1]} : vector<1x128xf32> to vector<1x64xf32>
    %239 = vector.extract_strided_slice %230 {offsets = [0, 128], sizes = [1, 64], strides = [1, 1]} : vector<1x256xf32> to vector<1x64xf32>
    %240 = math.tanh %239 : vector<1x64xf32>
    %241 = vector.extract_strided_slice %230 {offsets = [0, 192], sizes = [1, 64], strides = [1, 1]} : vector<1x256xf32> to vector<1x64xf32>
    %242 = arith.negf %241 : vector<1x64xf32>
    %243 = math.exp %242 : vector<1x64xf32>
    %cst_50 = arith.constant 1.000000e+00 : f32
    %244 = vector.broadcast %cst_50 : f32 to vector<1x64xf32>
    %245 = arith.addf %244, %243 : vector<1x64xf32>
    %246 = arith.divf %244, %245 : vector<1x64xf32>
    %247 = arith.mulf %238, %200 : vector<1x64xf32>
    %248 = arith.mulf %237, %240 : vector<1x64xf32>
    %249 = arith.addf %247, %248 : vector<1x64xf32>
    %250 = math.tanh %249 : vector<1x64xf32>
    %251 = arith.mulf %246, %250 : vector<1x64xf32>
    %c5 = arith.constant 5 : index
    %c0_51 = arith.constant 0 : index
    %252 = vector.load %arg0[%c5, %c0_51] : memref<16x256xf32, #tpu.memory_space<vmem>>, vector<1x256xf32>
    %cst_52 = arith.constant dense<0.000000e+00> : vector<1x256xf32>
    %253 = tpu.matmul %226, %0, %cst_52 {dimension_numbers = #tpu.dot_dimension_numbers<[1], [0], [0], [1], [0, 0, 1, 1], [], []>} : vector<1x64xf32>, vector<64x256xf32>, vector<1x256xf32> -> vector<1x256xf32>
    %254 = arith.addf %252, %253 : vector<1x256xf32>
    %255 = vector.extract_strided_slice %254 {offsets = [0, 0], sizes = [1, 128], strides = [1, 1]} : vector<1x256xf32> to vector<1x128xf32>
    %256 = arith.negf %255 : vector<1x128xf32>
    %257 = math.exp %256 : vector<1x128xf32>
    %cst_53 = arith.constant 1.000000e+00 : f32
    %258 = vector.broadcast %cst_53 : f32 to vector<1x128xf32>
    %259 = arith.addf %258, %257 : vector<1x128xf32>
    %260 = arith.divf %258, %259 : vector<1x128xf32>
    %261 = vector.extract_strided_slice %260 {offsets = [0, 0], sizes = [1, 64], strides = [1, 1]} : vector<1x128xf32> to vector<1x64xf32>
    %262 = vector.extract_strided_slice %260 {offsets = [0, 64], sizes = [1, 64], strides = [1, 1]} : vector<1x128xf32> to vector<1x64xf32>
    %263 = vector.extract_strided_slice %254 {offsets = [0, 128], sizes = [1, 64], strides = [1, 1]} : vector<1x256xf32> to vector<1x64xf32>
    %264 = math.tanh %263 : vector<1x64xf32>
    %265 = vector.extract_strided_slice %254 {offsets = [0, 192], sizes = [1, 64], strides = [1, 1]} : vector<1x256xf32> to vector<1x64xf32>
    %266 = arith.negf %265 : vector<1x64xf32>
    %267 = math.exp %266 : vector<1x64xf32>
    %cst_54 = arith.constant 1.000000e+00 : f32
    %268 = vector.broadcast %cst_54 : f32 to vector<1x64xf32>
    %269 = arith.addf %268, %267 : vector<1x64xf32>
    %270 = arith.divf %268, %269 : vector<1x64xf32>
    %271 = arith.mulf %262, %224 : vector<1x64xf32>
    %272 = arith.mulf %261, %264 : vector<1x64xf32>
    %273 = arith.addf %271, %272 : vector<1x64xf32>
    %274 = math.tanh %273 : vector<1x64xf32>
    %275 = arith.mulf %270, %274 : vector<1x64xf32>
    %cst_55 = arith.constant dense<0.000000e+00> : vector<1x256xf32>
    %276 = tpu.matmul %275, %1, %cst_55 {dimension_numbers = #tpu.dot_dimension_numbers<[1], [0], [0], [1], [0, 0, 1, 1], [], []>} : vector<1x64xf32>, vector<64x256xf32>, vector<1x256xf32> -> vector<1x256xf32>
    %cst_56 = arith.constant dense<0.000000e+00> : vector<1x256xf32>
    %277 = tpu.matmul %251, %2, %cst_56 {dimension_numbers = #tpu.dot_dimension_numbers<[1], [0], [0], [1], [0, 0, 1, 1], [], []>} : vector<1x64xf32>, vector<64x256xf32>, vector<1x256xf32> -> vector<1x256xf32>
    %278 = arith.addf %276, %277 : vector<1x256xf32>
    %279 = arith.addf %278, %3 : vector<1x256xf32>
    %280 = vector.extract_strided_slice %279 {offsets = [0, 0], sizes = [1, 128], strides = [1, 1]} : vector<1x256xf32> to vector<1x128xf32>
    %281 = arith.negf %280 : vector<1x128xf32>
    %282 = math.exp %281 : vector<1x128xf32>
    %cst_57 = arith.constant 1.000000e+00 : f32
    %283 = vector.broadcast %cst_57 : f32 to vector<1x128xf32>
    %284 = arith.addf %283, %282 : vector<1x128xf32>
    %285 = arith.divf %283, %284 : vector<1x128xf32>
    %286 = vector.extract_strided_slice %285 {offsets = [0, 0], sizes = [1, 64], strides = [1, 1]} : vector<1x128xf32> to vector<1x64xf32>
    %287 = vector.extract_strided_slice %285 {offsets = [0, 64], sizes = [1, 64], strides = [1, 1]} : vector<1x128xf32> to vector<1x64xf32>
    %288 = vector.extract_strided_slice %279 {offsets = [0, 128], sizes = [1, 64], strides = [1, 1]} : vector<1x256xf32> to vector<1x64xf32>
    %289 = math.tanh %288 : vector<1x64xf32>
    %290 = vector.extract_strided_slice %279 {offsets = [0, 192], sizes = [1, 64], strides = [1, 1]} : vector<1x256xf32> to vector<1x64xf32>
    %291 = arith.negf %290 : vector<1x64xf32>
    %292 = math.exp %291 : vector<1x64xf32>
    %cst_58 = arith.constant 1.000000e+00 : f32
    %293 = vector.broadcast %cst_58 : f32 to vector<1x64xf32>
    %294 = arith.addf %293, %292 : vector<1x64xf32>
    %295 = arith.divf %293, %294 : vector<1x64xf32>
    %296 = arith.mulf %287, %249 : vector<1x64xf32>
    %297 = arith.mulf %286, %289 : vector<1x64xf32>
    %298 = arith.addf %296, %297 : vector<1x64xf32>
    %299 = math.tanh %298 : vector<1x64xf32>
    %300 = arith.mulf %295, %299 : vector<1x64xf32>
    %c6 = arith.constant 6 : index
    %c0_59 = arith.constant 0 : index
    %301 = vector.load %arg0[%c6, %c0_59] : memref<16x256xf32, #tpu.memory_space<vmem>>, vector<1x256xf32>
    %cst_60 = arith.constant dense<0.000000e+00> : vector<1x256xf32>
    %302 = tpu.matmul %275, %0, %cst_60 {dimension_numbers = #tpu.dot_dimension_numbers<[1], [0], [0], [1], [0, 0, 1, 1], [], []>} : vector<1x64xf32>, vector<64x256xf32>, vector<1x256xf32> -> vector<1x256xf32>
    %303 = arith.addf %301, %302 : vector<1x256xf32>
    %304 = vector.extract_strided_slice %303 {offsets = [0, 0], sizes = [1, 128], strides = [1, 1]} : vector<1x256xf32> to vector<1x128xf32>
    %305 = arith.negf %304 : vector<1x128xf32>
    %306 = math.exp %305 : vector<1x128xf32>
    %cst_61 = arith.constant 1.000000e+00 : f32
    %307 = vector.broadcast %cst_61 : f32 to vector<1x128xf32>
    %308 = arith.addf %307, %306 : vector<1x128xf32>
    %309 = arith.divf %307, %308 : vector<1x128xf32>
    %310 = vector.extract_strided_slice %309 {offsets = [0, 0], sizes = [1, 64], strides = [1, 1]} : vector<1x128xf32> to vector<1x64xf32>
    %311 = vector.extract_strided_slice %309 {offsets = [0, 64], sizes = [1, 64], strides = [1, 1]} : vector<1x128xf32> to vector<1x64xf32>
    %312 = vector.extract_strided_slice %303 {offsets = [0, 128], sizes = [1, 64], strides = [1, 1]} : vector<1x256xf32> to vector<1x64xf32>
    %313 = math.tanh %312 : vector<1x64xf32>
    %314 = vector.extract_strided_slice %303 {offsets = [0, 192], sizes = [1, 64], strides = [1, 1]} : vector<1x256xf32> to vector<1x64xf32>
    %315 = arith.negf %314 : vector<1x64xf32>
    %316 = math.exp %315 : vector<1x64xf32>
    %cst_62 = arith.constant 1.000000e+00 : f32
    %317 = vector.broadcast %cst_62 : f32 to vector<1x64xf32>
    %318 = arith.addf %317, %316 : vector<1x64xf32>
    %319 = arith.divf %317, %318 : vector<1x64xf32>
    %320 = arith.mulf %311, %273 : vector<1x64xf32>
    %321 = arith.mulf %310, %313 : vector<1x64xf32>
    %322 = arith.addf %320, %321 : vector<1x64xf32>
    %323 = math.tanh %322 : vector<1x64xf32>
    %324 = arith.mulf %319, %323 : vector<1x64xf32>
    %cst_63 = arith.constant dense<0.000000e+00> : vector<1x256xf32>
    %325 = tpu.matmul %324, %1, %cst_63 {dimension_numbers = #tpu.dot_dimension_numbers<[1], [0], [0], [1], [0, 0, 1, 1], [], []>} : vector<1x64xf32>, vector<64x256xf32>, vector<1x256xf32> -> vector<1x256xf32>
    %cst_64 = arith.constant dense<0.000000e+00> : vector<1x256xf32>
    %326 = tpu.matmul %300, %2, %cst_64 {dimension_numbers = #tpu.dot_dimension_numbers<[1], [0], [0], [1], [0, 0, 1, 1], [], []>} : vector<1x64xf32>, vector<64x256xf32>, vector<1x256xf32> -> vector<1x256xf32>
    %327 = arith.addf %325, %326 : vector<1x256xf32>
    %328 = arith.addf %327, %3 : vector<1x256xf32>
    %329 = vector.extract_strided_slice %328 {offsets = [0, 0], sizes = [1, 128], strides = [1, 1]} : vector<1x256xf32> to vector<1x128xf32>
    %330 = arith.negf %329 : vector<1x128xf32>
    %331 = math.exp %330 : vector<1x128xf32>
    %cst_65 = arith.constant 1.000000e+00 : f32
    %332 = vector.broadcast %cst_65 : f32 to vector<1x128xf32>
    %333 = arith.addf %332, %331 : vector<1x128xf32>
    %334 = arith.divf %332, %333 : vector<1x128xf32>
    %335 = vector.extract_strided_slice %334 {offsets = [0, 0], sizes = [1, 64], strides = [1, 1]} : vector<1x128xf32> to vector<1x64xf32>
    %336 = vector.extract_strided_slice %334 {offsets = [0, 64], sizes = [1, 64], strides = [1, 1]} : vector<1x128xf32> to vector<1x64xf32>
    %337 = vector.extract_strided_slice %328 {offsets = [0, 128], sizes = [1, 64], strides = [1, 1]} : vector<1x256xf32> to vector<1x64xf32>
    %338 = math.tanh %337 : vector<1x64xf32>
    %339 = vector.extract_strided_slice %328 {offsets = [0, 192], sizes = [1, 64], strides = [1, 1]} : vector<1x256xf32> to vector<1x64xf32>
    %340 = arith.negf %339 : vector<1x64xf32>
    %341 = math.exp %340 : vector<1x64xf32>
    %cst_66 = arith.constant 1.000000e+00 : f32
    %342 = vector.broadcast %cst_66 : f32 to vector<1x64xf32>
    %343 = arith.addf %342, %341 : vector<1x64xf32>
    %344 = arith.divf %342, %343 : vector<1x64xf32>
    %345 = arith.mulf %336, %298 : vector<1x64xf32>
    %346 = arith.mulf %335, %338 : vector<1x64xf32>
    %347 = arith.addf %345, %346 : vector<1x64xf32>
    %348 = math.tanh %347 : vector<1x64xf32>
    %349 = arith.mulf %344, %348 : vector<1x64xf32>
    %c7 = arith.constant 7 : index
    %c0_67 = arith.constant 0 : index
    %350 = vector.load %arg0[%c7, %c0_67] : memref<16x256xf32, #tpu.memory_space<vmem>>, vector<1x256xf32>
    %cst_68 = arith.constant dense<0.000000e+00> : vector<1x256xf32>
    %351 = tpu.matmul %324, %0, %cst_68 {dimension_numbers = #tpu.dot_dimension_numbers<[1], [0], [0], [1], [0, 0, 1, 1], [], []>} : vector<1x64xf32>, vector<64x256xf32>, vector<1x256xf32> -> vector<1x256xf32>
    %352 = arith.addf %350, %351 : vector<1x256xf32>
    %353 = vector.extract_strided_slice %352 {offsets = [0, 0], sizes = [1, 128], strides = [1, 1]} : vector<1x256xf32> to vector<1x128xf32>
    %354 = arith.negf %353 : vector<1x128xf32>
    %355 = math.exp %354 : vector<1x128xf32>
    %cst_69 = arith.constant 1.000000e+00 : f32
    %356 = vector.broadcast %cst_69 : f32 to vector<1x128xf32>
    %357 = arith.addf %356, %355 : vector<1x128xf32>
    %358 = arith.divf %356, %357 : vector<1x128xf32>
    %359 = vector.extract_strided_slice %358 {offsets = [0, 0], sizes = [1, 64], strides = [1, 1]} : vector<1x128xf32> to vector<1x64xf32>
    %360 = vector.extract_strided_slice %358 {offsets = [0, 64], sizes = [1, 64], strides = [1, 1]} : vector<1x128xf32> to vector<1x64xf32>
    %361 = vector.extract_strided_slice %352 {offsets = [0, 128], sizes = [1, 64], strides = [1, 1]} : vector<1x256xf32> to vector<1x64xf32>
    %362 = math.tanh %361 : vector<1x64xf32>
    %363 = vector.extract_strided_slice %352 {offsets = [0, 192], sizes = [1, 64], strides = [1, 1]} : vector<1x256xf32> to vector<1x64xf32>
    %364 = arith.negf %363 : vector<1x64xf32>
    %365 = math.exp %364 : vector<1x64xf32>
    %cst_70 = arith.constant 1.000000e+00 : f32
    %366 = vector.broadcast %cst_70 : f32 to vector<1x64xf32>
    %367 = arith.addf %366, %365 : vector<1x64xf32>
    %368 = arith.divf %366, %367 : vector<1x64xf32>
    %369 = arith.mulf %360, %322 : vector<1x64xf32>
    %370 = arith.mulf %359, %362 : vector<1x64xf32>
    %371 = arith.addf %369, %370 : vector<1x64xf32>
    %372 = math.tanh %371 : vector<1x64xf32>
    %373 = arith.mulf %368, %372 : vector<1x64xf32>
    %cst_71 = arith.constant dense<0.000000e+00> : vector<1x256xf32>
    %374 = tpu.matmul %373, %1, %cst_71 {dimension_numbers = #tpu.dot_dimension_numbers<[1], [0], [0], [1], [0, 0, 1, 1], [], []>} : vector<1x64xf32>, vector<64x256xf32>, vector<1x256xf32> -> vector<1x256xf32>
    %cst_72 = arith.constant dense<0.000000e+00> : vector<1x256xf32>
    %375 = tpu.matmul %349, %2, %cst_72 {dimension_numbers = #tpu.dot_dimension_numbers<[1], [0], [0], [1], [0, 0, 1, 1], [], []>} : vector<1x64xf32>, vector<64x256xf32>, vector<1x256xf32> -> vector<1x256xf32>
    %376 = arith.addf %374, %375 : vector<1x256xf32>
    %377 = arith.addf %376, %3 : vector<1x256xf32>
    %378 = vector.extract_strided_slice %377 {offsets = [0, 0], sizes = [1, 128], strides = [1, 1]} : vector<1x256xf32> to vector<1x128xf32>
    %379 = arith.negf %378 : vector<1x128xf32>
    %380 = math.exp %379 : vector<1x128xf32>
    %cst_73 = arith.constant 1.000000e+00 : f32
    %381 = vector.broadcast %cst_73 : f32 to vector<1x128xf32>
    %382 = arith.addf %381, %380 : vector<1x128xf32>
    %383 = arith.divf %381, %382 : vector<1x128xf32>
    %384 = vector.extract_strided_slice %383 {offsets = [0, 0], sizes = [1, 64], strides = [1, 1]} : vector<1x128xf32> to vector<1x64xf32>
    %385 = vector.extract_strided_slice %383 {offsets = [0, 64], sizes = [1, 64], strides = [1, 1]} : vector<1x128xf32> to vector<1x64xf32>
    %386 = vector.extract_strided_slice %377 {offsets = [0, 128], sizes = [1, 64], strides = [1, 1]} : vector<1x256xf32> to vector<1x64xf32>
    %387 = math.tanh %386 : vector<1x64xf32>
    %388 = vector.extract_strided_slice %377 {offsets = [0, 192], sizes = [1, 64], strides = [1, 1]} : vector<1x256xf32> to vector<1x64xf32>
    %389 = arith.negf %388 : vector<1x64xf32>
    %390 = math.exp %389 : vector<1x64xf32>
    %cst_74 = arith.constant 1.000000e+00 : f32
    %391 = vector.broadcast %cst_74 : f32 to vector<1x64xf32>
    %392 = arith.addf %391, %390 : vector<1x64xf32>
    %393 = arith.divf %391, %392 : vector<1x64xf32>
    %394 = arith.mulf %385, %347 : vector<1x64xf32>
    %395 = arith.mulf %384, %387 : vector<1x64xf32>
    %396 = arith.addf %394, %395 : vector<1x64xf32>
    %397 = math.tanh %396 : vector<1x64xf32>
    %398 = arith.mulf %393, %397 : vector<1x64xf32>
    %c8 = arith.constant 8 : index
    %c0_75 = arith.constant 0 : index
    %399 = vector.load %arg0[%c8, %c0_75] : memref<16x256xf32, #tpu.memory_space<vmem>>, vector<1x256xf32>
    %cst_76 = arith.constant dense<0.000000e+00> : vector<1x256xf32>
    %400 = tpu.matmul %373, %0, %cst_76 {dimension_numbers = #tpu.dot_dimension_numbers<[1], [0], [0], [1], [0, 0, 1, 1], [], []>} : vector<1x64xf32>, vector<64x256xf32>, vector<1x256xf32> -> vector<1x256xf32>
    %401 = arith.addf %399, %400 : vector<1x256xf32>
    %402 = vector.extract_strided_slice %401 {offsets = [0, 0], sizes = [1, 128], strides = [1, 1]} : vector<1x256xf32> to vector<1x128xf32>
    %403 = arith.negf %402 : vector<1x128xf32>
    %404 = math.exp %403 : vector<1x128xf32>
    %cst_77 = arith.constant 1.000000e+00 : f32
    %405 = vector.broadcast %cst_77 : f32 to vector<1x128xf32>
    %406 = arith.addf %405, %404 : vector<1x128xf32>
    %407 = arith.divf %405, %406 : vector<1x128xf32>
    %408 = vector.extract_strided_slice %407 {offsets = [0, 0], sizes = [1, 64], strides = [1, 1]} : vector<1x128xf32> to vector<1x64xf32>
    %409 = vector.extract_strided_slice %407 {offsets = [0, 64], sizes = [1, 64], strides = [1, 1]} : vector<1x128xf32> to vector<1x64xf32>
    %410 = vector.extract_strided_slice %401 {offsets = [0, 128], sizes = [1, 64], strides = [1, 1]} : vector<1x256xf32> to vector<1x64xf32>
    %411 = math.tanh %410 : vector<1x64xf32>
    %412 = vector.extract_strided_slice %401 {offsets = [0, 192], sizes = [1, 64], strides = [1, 1]} : vector<1x256xf32> to vector<1x64xf32>
    %413 = arith.negf %412 : vector<1x64xf32>
    %414 = math.exp %413 : vector<1x64xf32>
    %cst_78 = arith.constant 1.000000e+00 : f32
    %415 = vector.broadcast %cst_78 : f32 to vector<1x64xf32>
    %416 = arith.addf %415, %414 : vector<1x64xf32>
    %417 = arith.divf %415, %416 : vector<1x64xf32>
    %418 = arith.mulf %409, %371 : vector<1x64xf32>
    %419 = arith.mulf %408, %411 : vector<1x64xf32>
    %420 = arith.addf %418, %419 : vector<1x64xf32>
    %421 = math.tanh %420 : vector<1x64xf32>
    %422 = arith.mulf %417, %421 : vector<1x64xf32>
    %cst_79 = arith.constant dense<0.000000e+00> : vector<1x256xf32>
    %423 = tpu.matmul %422, %1, %cst_79 {dimension_numbers = #tpu.dot_dimension_numbers<[1], [0], [0], [1], [0, 0, 1, 1], [], []>} : vector<1x64xf32>, vector<64x256xf32>, vector<1x256xf32> -> vector<1x256xf32>
    %cst_80 = arith.constant dense<0.000000e+00> : vector<1x256xf32>
    %424 = tpu.matmul %398, %2, %cst_80 {dimension_numbers = #tpu.dot_dimension_numbers<[1], [0], [0], [1], [0, 0, 1, 1], [], []>} : vector<1x64xf32>, vector<64x256xf32>, vector<1x256xf32> -> vector<1x256xf32>
    %425 = arith.addf %423, %424 : vector<1x256xf32>
    %426 = arith.addf %425, %3 : vector<1x256xf32>
    %427 = vector.extract_strided_slice %426 {offsets = [0, 0], sizes = [1, 128], strides = [1, 1]} : vector<1x256xf32> to vector<1x128xf32>
    %428 = arith.negf %427 : vector<1x128xf32>
    %429 = math.exp %428 : vector<1x128xf32>
    %cst_81 = arith.constant 1.000000e+00 : f32
    %430 = vector.broadcast %cst_81 : f32 to vector<1x128xf32>
    %431 = arith.addf %430, %429 : vector<1x128xf32>
    %432 = arith.divf %430, %431 : vector<1x128xf32>
    %433 = vector.extract_strided_slice %432 {offsets = [0, 0], sizes = [1, 64], strides = [1, 1]} : vector<1x128xf32> to vector<1x64xf32>
    %434 = vector.extract_strided_slice %432 {offsets = [0, 64], sizes = [1, 64], strides = [1, 1]} : vector<1x128xf32> to vector<1x64xf32>
    %435 = vector.extract_strided_slice %426 {offsets = [0, 128], sizes = [1, 64], strides = [1, 1]} : vector<1x256xf32> to vector<1x64xf32>
    %436 = math.tanh %435 : vector<1x64xf32>
    %437 = vector.extract_strided_slice %426 {offsets = [0, 192], sizes = [1, 64], strides = [1, 1]} : vector<1x256xf32> to vector<1x64xf32>
    %438 = arith.negf %437 : vector<1x64xf32>
    %439 = math.exp %438 : vector<1x64xf32>
    %cst_82 = arith.constant 1.000000e+00 : f32
    %440 = vector.broadcast %cst_82 : f32 to vector<1x64xf32>
    %441 = arith.addf %440, %439 : vector<1x64xf32>
    %442 = arith.divf %440, %441 : vector<1x64xf32>
    %443 = arith.mulf %434, %396 : vector<1x64xf32>
    %444 = arith.mulf %433, %436 : vector<1x64xf32>
    %445 = arith.addf %443, %444 : vector<1x64xf32>
    %446 = math.tanh %445 : vector<1x64xf32>
    %447 = arith.mulf %442, %446 : vector<1x64xf32>
    %c9 = arith.constant 9 : index
    %c0_83 = arith.constant 0 : index
    %448 = vector.load %arg0[%c9, %c0_83] : memref<16x256xf32, #tpu.memory_space<vmem>>, vector<1x256xf32>
    %cst_84 = arith.constant dense<0.000000e+00> : vector<1x256xf32>
    %449 = tpu.matmul %422, %0, %cst_84 {dimension_numbers = #tpu.dot_dimension_numbers<[1], [0], [0], [1], [0, 0, 1, 1], [], []>} : vector<1x64xf32>, vector<64x256xf32>, vector<1x256xf32> -> vector<1x256xf32>
    %450 = arith.addf %448, %449 : vector<1x256xf32>
    %451 = vector.extract_strided_slice %450 {offsets = [0, 0], sizes = [1, 128], strides = [1, 1]} : vector<1x256xf32> to vector<1x128xf32>
    %452 = arith.negf %451 : vector<1x128xf32>
    %453 = math.exp %452 : vector<1x128xf32>
    %cst_85 = arith.constant 1.000000e+00 : f32
    %454 = vector.broadcast %cst_85 : f32 to vector<1x128xf32>
    %455 = arith.addf %454, %453 : vector<1x128xf32>
    %456 = arith.divf %454, %455 : vector<1x128xf32>
    %457 = vector.extract_strided_slice %456 {offsets = [0, 0], sizes = [1, 64], strides = [1, 1]} : vector<1x128xf32> to vector<1x64xf32>
    %458 = vector.extract_strided_slice %456 {offsets = [0, 64], sizes = [1, 64], strides = [1, 1]} : vector<1x128xf32> to vector<1x64xf32>
    %459 = vector.extract_strided_slice %450 {offsets = [0, 128], sizes = [1, 64], strides = [1, 1]} : vector<1x256xf32> to vector<1x64xf32>
    %460 = math.tanh %459 : vector<1x64xf32>
    %461 = vector.extract_strided_slice %450 {offsets = [0, 192], sizes = [1, 64], strides = [1, 1]} : vector<1x256xf32> to vector<1x64xf32>
    %462 = arith.negf %461 : vector<1x64xf32>
    %463 = math.exp %462 : vector<1x64xf32>
    %cst_86 = arith.constant 1.000000e+00 : f32
    %464 = vector.broadcast %cst_86 : f32 to vector<1x64xf32>
    %465 = arith.addf %464, %463 : vector<1x64xf32>
    %466 = arith.divf %464, %465 : vector<1x64xf32>
    %467 = arith.mulf %458, %420 : vector<1x64xf32>
    %468 = arith.mulf %457, %460 : vector<1x64xf32>
    %469 = arith.addf %467, %468 : vector<1x64xf32>
    %470 = math.tanh %469 : vector<1x64xf32>
    %471 = arith.mulf %466, %470 : vector<1x64xf32>
    %cst_87 = arith.constant dense<0.000000e+00> : vector<1x256xf32>
    %472 = tpu.matmul %471, %1, %cst_87 {dimension_numbers = #tpu.dot_dimension_numbers<[1], [0], [0], [1], [0, 0, 1, 1], [], []>} : vector<1x64xf32>, vector<64x256xf32>, vector<1x256xf32> -> vector<1x256xf32>
    %cst_88 = arith.constant dense<0.000000e+00> : vector<1x256xf32>
    %473 = tpu.matmul %447, %2, %cst_88 {dimension_numbers = #tpu.dot_dimension_numbers<[1], [0], [0], [1], [0, 0, 1, 1], [], []>} : vector<1x64xf32>, vector<64x256xf32>, vector<1x256xf32> -> vector<1x256xf32>
    %474 = arith.addf %472, %473 : vector<1x256xf32>
    %475 = arith.addf %474, %3 : vector<1x256xf32>
    %476 = vector.extract_strided_slice %475 {offsets = [0, 0], sizes = [1, 128], strides = [1, 1]} : vector<1x256xf32> to vector<1x128xf32>
    %477 = arith.negf %476 : vector<1x128xf32>
    %478 = math.exp %477 : vector<1x128xf32>
    %cst_89 = arith.constant 1.000000e+00 : f32
    %479 = vector.broadcast %cst_89 : f32 to vector<1x128xf32>
    %480 = arith.addf %479, %478 : vector<1x128xf32>
    %481 = arith.divf %479, %480 : vector<1x128xf32>
    %482 = vector.extract_strided_slice %481 {offsets = [0, 0], sizes = [1, 64], strides = [1, 1]} : vector<1x128xf32> to vector<1x64xf32>
    %483 = vector.extract_strided_slice %481 {offsets = [0, 64], sizes = [1, 64], strides = [1, 1]} : vector<1x128xf32> to vector<1x64xf32>
    %484 = vector.extract_strided_slice %475 {offsets = [0, 128], sizes = [1, 64], strides = [1, 1]} : vector<1x256xf32> to vector<1x64xf32>
    %485 = math.tanh %484 : vector<1x64xf32>
    %486 = vector.extract_strided_slice %475 {offsets = [0, 192], sizes = [1, 64], strides = [1, 1]} : vector<1x256xf32> to vector<1x64xf32>
    %487 = arith.negf %486 : vector<1x64xf32>
    %488 = math.exp %487 : vector<1x64xf32>
    %cst_90 = arith.constant 1.000000e+00 : f32
    %489 = vector.broadcast %cst_90 : f32 to vector<1x64xf32>
    %490 = arith.addf %489, %488 : vector<1x64xf32>
    %491 = arith.divf %489, %490 : vector<1x64xf32>
    %492 = arith.mulf %483, %445 : vector<1x64xf32>
    %493 = arith.mulf %482, %485 : vector<1x64xf32>
    %494 = arith.addf %492, %493 : vector<1x64xf32>
    %495 = math.tanh %494 : vector<1x64xf32>
    %496 = arith.mulf %491, %495 : vector<1x64xf32>
    %c10 = arith.constant 10 : index
    %c0_91 = arith.constant 0 : index
    %497 = vector.load %arg0[%c10, %c0_91] : memref<16x256xf32, #tpu.memory_space<vmem>>, vector<1x256xf32>
    %cst_92 = arith.constant dense<0.000000e+00> : vector<1x256xf32>
    %498 = tpu.matmul %471, %0, %cst_92 {dimension_numbers = #tpu.dot_dimension_numbers<[1], [0], [0], [1], [0, 0, 1, 1], [], []>} : vector<1x64xf32>, vector<64x256xf32>, vector<1x256xf32> -> vector<1x256xf32>
    %499 = arith.addf %497, %498 : vector<1x256xf32>
    %500 = vector.extract_strided_slice %499 {offsets = [0, 0], sizes = [1, 128], strides = [1, 1]} : vector<1x256xf32> to vector<1x128xf32>
    %501 = arith.negf %500 : vector<1x128xf32>
    %502 = math.exp %501 : vector<1x128xf32>
    %cst_93 = arith.constant 1.000000e+00 : f32
    %503 = vector.broadcast %cst_93 : f32 to vector<1x128xf32>
    %504 = arith.addf %503, %502 : vector<1x128xf32>
    %505 = arith.divf %503, %504 : vector<1x128xf32>
    %506 = vector.extract_strided_slice %505 {offsets = [0, 0], sizes = [1, 64], strides = [1, 1]} : vector<1x128xf32> to vector<1x64xf32>
    %507 = vector.extract_strided_slice %505 {offsets = [0, 64], sizes = [1, 64], strides = [1, 1]} : vector<1x128xf32> to vector<1x64xf32>
    %508 = vector.extract_strided_slice %499 {offsets = [0, 128], sizes = [1, 64], strides = [1, 1]} : vector<1x256xf32> to vector<1x64xf32>
    %509 = math.tanh %508 : vector<1x64xf32>
    %510 = vector.extract_strided_slice %499 {offsets = [0, 192], sizes = [1, 64], strides = [1, 1]} : vector<1x256xf32> to vector<1x64xf32>
    %511 = arith.negf %510 : vector<1x64xf32>
    %512 = math.exp %511 : vector<1x64xf32>
    %cst_94 = arith.constant 1.000000e+00 : f32
    %513 = vector.broadcast %cst_94 : f32 to vector<1x64xf32>
    %514 = arith.addf %513, %512 : vector<1x64xf32>
    %515 = arith.divf %513, %514 : vector<1x64xf32>
    %516 = arith.mulf %507, %469 : vector<1x64xf32>
    %517 = arith.mulf %506, %509 : vector<1x64xf32>
    %518 = arith.addf %516, %517 : vector<1x64xf32>
    %519 = math.tanh %518 : vector<1x64xf32>
    %520 = arith.mulf %515, %519 : vector<1x64xf32>
    %cst_95 = arith.constant dense<0.000000e+00> : vector<1x256xf32>
    %521 = tpu.matmul %520, %1, %cst_95 {dimension_numbers = #tpu.dot_dimension_numbers<[1], [0], [0], [1], [0, 0, 1, 1], [], []>} : vector<1x64xf32>, vector<64x256xf32>, vector<1x256xf32> -> vector<1x256xf32>
    %cst_96 = arith.constant dense<0.000000e+00> : vector<1x256xf32>
    %522 = tpu.matmul %496, %2, %cst_96 {dimension_numbers = #tpu.dot_dimension_numbers<[1], [0], [0], [1], [0, 0, 1, 1], [], []>} : vector<1x64xf32>, vector<64x256xf32>, vector<1x256xf32> -> vector<1x256xf32>
    %523 = arith.addf %521, %522 : vector<1x256xf32>
    %524 = arith.addf %523, %3 : vector<1x256xf32>
    %525 = vector.extract_strided_slice %524 {offsets = [0, 0], sizes = [1, 128], strides = [1, 1]} : vector<1x256xf32> to vector<1x128xf32>
    %526 = arith.negf %525 : vector<1x128xf32>
    %527 = math.exp %526 : vector<1x128xf32>
    %cst_97 = arith.constant 1.000000e+00 : f32
    %528 = vector.broadcast %cst_97 : f32 to vector<1x128xf32>
    %529 = arith.addf %528, %527 : vector<1x128xf32>
    %530 = arith.divf %528, %529 : vector<1x128xf32>
    %531 = vector.extract_strided_slice %530 {offsets = [0, 0], sizes = [1, 64], strides = [1, 1]} : vector<1x128xf32> to vector<1x64xf32>
    %532 = vector.extract_strided_slice %530 {offsets = [0, 64], sizes = [1, 64], strides = [1, 1]} : vector<1x128xf32> to vector<1x64xf32>
    %533 = vector.extract_strided_slice %524 {offsets = [0, 128], sizes = [1, 64], strides = [1, 1]} : vector<1x256xf32> to vector<1x64xf32>
    %534 = math.tanh %533 : vector<1x64xf32>
    %535 = vector.extract_strided_slice %524 {offsets = [0, 192], sizes = [1, 64], strides = [1, 1]} : vector<1x256xf32> to vector<1x64xf32>
    %536 = arith.negf %535 : vector<1x64xf32>
    %537 = math.exp %536 : vector<1x64xf32>
    %cst_98 = arith.constant 1.000000e+00 : f32
    %538 = vector.broadcast %cst_98 : f32 to vector<1x64xf32>
    %539 = arith.addf %538, %537 : vector<1x64xf32>
    %540 = arith.divf %538, %539 : vector<1x64xf32>
    %541 = arith.mulf %532, %494 : vector<1x64xf32>
    %542 = arith.mulf %531, %534 : vector<1x64xf32>
    %543 = arith.addf %541, %542 : vector<1x64xf32>
    %544 = math.tanh %543 : vector<1x64xf32>
    %545 = arith.mulf %540, %544 : vector<1x64xf32>
    %546 = arith.mulf %545, %4 : vector<1x64xf32>
    %cst_99 = arith.constant dense<0.000000e+00> : vector<1xf32>
    %547 = vector.multi_reduction <add>, %546, %cst_99 [1] : vector<1x64xf32> to vector<1xf32>
    %548 = vector.shape_cast %547 : vector<1xf32> to vector<1x1xf32>
    %549 = arith.maximumf %6, %548 : vector<1x1xf32>
    %c11 = arith.constant 11 : index
    %c0_100 = arith.constant 0 : index
    %550 = vector.load %arg0[%c11, %c0_100] : memref<16x256xf32, #tpu.memory_space<vmem>>, vector<1x256xf32>
    %cst_101 = arith.constant dense<0.000000e+00> : vector<1x256xf32>
    %551 = tpu.matmul %520, %0, %cst_101 {dimension_numbers = #tpu.dot_dimension_numbers<[1], [0], [0], [1], [0, 0, 1, 1], [], []>} : vector<1x64xf32>, vector<64x256xf32>, vector<1x256xf32> -> vector<1x256xf32>
    %552 = arith.addf %550, %551 : vector<1x256xf32>
    %553 = vector.extract_strided_slice %552 {offsets = [0, 0], sizes = [1, 128], strides = [1, 1]} : vector<1x256xf32> to vector<1x128xf32>
    %554 = arith.negf %553 : vector<1x128xf32>
    %555 = math.exp %554 : vector<1x128xf32>
    %cst_102 = arith.constant 1.000000e+00 : f32
    %556 = vector.broadcast %cst_102 : f32 to vector<1x128xf32>
    %557 = arith.addf %556, %555 : vector<1x128xf32>
    %558 = arith.divf %556, %557 : vector<1x128xf32>
    %559 = vector.extract_strided_slice %558 {offsets = [0, 0], sizes = [1, 64], strides = [1, 1]} : vector<1x128xf32> to vector<1x64xf32>
    %560 = vector.extract_strided_slice %558 {offsets = [0, 64], sizes = [1, 64], strides = [1, 1]} : vector<1x128xf32> to vector<1x64xf32>
    %561 = vector.extract_strided_slice %552 {offsets = [0, 128], sizes = [1, 64], strides = [1, 1]} : vector<1x256xf32> to vector<1x64xf32>
    %562 = math.tanh %561 : vector<1x64xf32>
    %563 = vector.extract_strided_slice %552 {offsets = [0, 192], sizes = [1, 64], strides = [1, 1]} : vector<1x256xf32> to vector<1x64xf32>
    %564 = arith.negf %563 : vector<1x64xf32>
    %565 = math.exp %564 : vector<1x64xf32>
    %cst_103 = arith.constant 1.000000e+00 : f32
    %566 = vector.broadcast %cst_103 : f32 to vector<1x64xf32>
    %567 = arith.addf %566, %565 : vector<1x64xf32>
    %568 = arith.divf %566, %567 : vector<1x64xf32>
    %569 = arith.mulf %560, %518 : vector<1x64xf32>
    %570 = arith.mulf %559, %562 : vector<1x64xf32>
    %571 = arith.addf %569, %570 : vector<1x64xf32>
    %572 = math.tanh %571 : vector<1x64xf32>
    %573 = arith.mulf %568, %572 : vector<1x64xf32>
    %cst_104 = arith.constant dense<0.000000e+00> : vector<1x256xf32>
    %574 = tpu.matmul %573, %1, %cst_104 {dimension_numbers = #tpu.dot_dimension_numbers<[1], [0], [0], [1], [0, 0, 1, 1], [], []>} : vector<1x64xf32>, vector<64x256xf32>, vector<1x256xf32> -> vector<1x256xf32>
    %cst_105 = arith.constant dense<0.000000e+00> : vector<1x256xf32>
    %575 = tpu.matmul %545, %2, %cst_105 {dimension_numbers = #tpu.dot_dimension_numbers<[1], [0], [0], [1], [0, 0, 1, 1], [], []>} : vector<1x64xf32>, vector<64x256xf32>, vector<1x256xf32> -> vector<1x256xf32>
    %576 = arith.addf %574, %575 : vector<1x256xf32>
    %577 = arith.addf %576, %3 : vector<1x256xf32>
    %578 = vector.extract_strided_slice %577 {offsets = [0, 0], sizes = [1, 128], strides = [1, 1]} : vector<1x256xf32> to vector<1x128xf32>
    %579 = arith.negf %578 : vector<1x128xf32>
    %580 = math.exp %579 : vector<1x128xf32>
    %cst_106 = arith.constant 1.000000e+00 : f32
    %581 = vector.broadcast %cst_106 : f32 to vector<1x128xf32>
    %582 = arith.addf %581, %580 : vector<1x128xf32>
    %583 = arith.divf %581, %582 : vector<1x128xf32>
    %584 = vector.extract_strided_slice %583 {offsets = [0, 0], sizes = [1, 64], strides = [1, 1]} : vector<1x128xf32> to vector<1x64xf32>
    %585 = vector.extract_strided_slice %583 {offsets = [0, 64], sizes = [1, 64], strides = [1, 1]} : vector<1x128xf32> to vector<1x64xf32>
    %586 = vector.extract_strided_slice %577 {offsets = [0, 128], sizes = [1, 64], strides = [1, 1]} : vector<1x256xf32> to vector<1x64xf32>
    %587 = math.tanh %586 : vector<1x64xf32>
    %588 = vector.extract_strided_slice %577 {offsets = [0, 192], sizes = [1, 64], strides = [1, 1]} : vector<1x256xf32> to vector<1x64xf32>
    %589 = arith.negf %588 : vector<1x64xf32>
    %590 = math.exp %589 : vector<1x64xf32>
    %cst_107 = arith.constant 1.000000e+00 : f32
    %591 = vector.broadcast %cst_107 : f32 to vector<1x64xf32>
    %592 = arith.addf %591, %590 : vector<1x64xf32>
    %593 = arith.divf %591, %592 : vector<1x64xf32>
    %594 = arith.mulf %585, %543 : vector<1x64xf32>
    %595 = arith.mulf %584, %587 : vector<1x64xf32>
    %596 = arith.addf %594, %595 : vector<1x64xf32>
    %597 = math.tanh %596 : vector<1x64xf32>
    %598 = arith.mulf %593, %597 : vector<1x64xf32>
    %599 = arith.mulf %598, %4 : vector<1x64xf32>
    %cst_108 = arith.constant dense<0.000000e+00> : vector<1xf32>
    %600 = vector.multi_reduction <add>, %599, %cst_108 [1] : vector<1x64xf32> to vector<1xf32>
    %601 = vector.shape_cast %600 : vector<1xf32> to vector<1x1xf32>
    %602 = arith.maximumf %549, %601 : vector<1x1xf32>
    %c12 = arith.constant 12 : index
    %c0_109 = arith.constant 0 : index
    %603 = vector.load %arg0[%c12, %c0_109] : memref<16x256xf32, #tpu.memory_space<vmem>>, vector<1x256xf32>
    %cst_110 = arith.constant dense<0.000000e+00> : vector<1x256xf32>
    %604 = tpu.matmul %573, %0, %cst_110 {dimension_numbers = #tpu.dot_dimension_numbers<[1], [0], [0], [1], [0, 0, 1, 1], [], []>} : vector<1x64xf32>, vector<64x256xf32>, vector<1x256xf32> -> vector<1x256xf32>
    %605 = arith.addf %603, %604 : vector<1x256xf32>
    %606 = vector.extract_strided_slice %605 {offsets = [0, 0], sizes = [1, 128], strides = [1, 1]} : vector<1x256xf32> to vector<1x128xf32>
    %607 = arith.negf %606 : vector<1x128xf32>
    %608 = math.exp %607 : vector<1x128xf32>
    %cst_111 = arith.constant 1.000000e+00 : f32
    %609 = vector.broadcast %cst_111 : f32 to vector<1x128xf32>
    %610 = arith.addf %609, %608 : vector<1x128xf32>
    %611 = arith.divf %609, %610 : vector<1x128xf32>
    %612 = vector.extract_strided_slice %611 {offsets = [0, 0], sizes = [1, 64], strides = [1, 1]} : vector<1x128xf32> to vector<1x64xf32>
    %613 = vector.extract_strided_slice %611 {offsets = [0, 64], sizes = [1, 64], strides = [1, 1]} : vector<1x128xf32> to vector<1x64xf32>
    %614 = vector.extract_strided_slice %605 {offsets = [0, 128], sizes = [1, 64], strides = [1, 1]} : vector<1x256xf32> to vector<1x64xf32>
    %615 = math.tanh %614 : vector<1x64xf32>
    %616 = vector.extract_strided_slice %605 {offsets = [0, 192], sizes = [1, 64], strides = [1, 1]} : vector<1x256xf32> to vector<1x64xf32>
    %617 = arith.negf %616 : vector<1x64xf32>
    %618 = math.exp %617 : vector<1x64xf32>
    %cst_112 = arith.constant 1.000000e+00 : f32
    %619 = vector.broadcast %cst_112 : f32 to vector<1x64xf32>
    %620 = arith.addf %619, %618 : vector<1x64xf32>
    %621 = arith.divf %619, %620 : vector<1x64xf32>
    %622 = arith.mulf %613, %571 : vector<1x64xf32>
    %623 = arith.mulf %612, %615 : vector<1x64xf32>
    %624 = arith.addf %622, %623 : vector<1x64xf32>
    %625 = math.tanh %624 : vector<1x64xf32>
    %626 = arith.mulf %621, %625 : vector<1x64xf32>
    %cst_113 = arith.constant dense<0.000000e+00> : vector<1x256xf32>
    %627 = tpu.matmul %626, %1, %cst_113 {dimension_numbers = #tpu.dot_dimension_numbers<[1], [0], [0], [1], [0, 0, 1, 1], [], []>} : vector<1x64xf32>, vector<64x256xf32>, vector<1x256xf32> -> vector<1x256xf32>
    %cst_114 = arith.constant dense<0.000000e+00> : vector<1x256xf32>
    %628 = tpu.matmul %598, %2, %cst_114 {dimension_numbers = #tpu.dot_dimension_numbers<[1], [0], [0], [1], [0, 0, 1, 1], [], []>} : vector<1x64xf32>, vector<64x256xf32>, vector<1x256xf32> -> vector<1x256xf32>
    %629 = arith.addf %627, %628 : vector<1x256xf32>
    %630 = arith.addf %629, %3 : vector<1x256xf32>
    %631 = vector.extract_strided_slice %630 {offsets = [0, 0], sizes = [1, 128], strides = [1, 1]} : vector<1x256xf32> to vector<1x128xf32>
    %632 = arith.negf %631 : vector<1x128xf32>
    %633 = math.exp %632 : vector<1x128xf32>
    %cst_115 = arith.constant 1.000000e+00 : f32
    %634 = vector.broadcast %cst_115 : f32 to vector<1x128xf32>
    %635 = arith.addf %634, %633 : vector<1x128xf32>
    %636 = arith.divf %634, %635 : vector<1x128xf32>
    %637 = vector.extract_strided_slice %636 {offsets = [0, 0], sizes = [1, 64], strides = [1, 1]} : vector<1x128xf32> to vector<1x64xf32>
    %638 = vector.extract_strided_slice %636 {offsets = [0, 64], sizes = [1, 64], strides = [1, 1]} : vector<1x128xf32> to vector<1x64xf32>
    %639 = vector.extract_strided_slice %630 {offsets = [0, 128], sizes = [1, 64], strides = [1, 1]} : vector<1x256xf32> to vector<1x64xf32>
    %640 = math.tanh %639 : vector<1x64xf32>
    %641 = vector.extract_strided_slice %630 {offsets = [0, 192], sizes = [1, 64], strides = [1, 1]} : vector<1x256xf32> to vector<1x64xf32>
    %642 = arith.negf %641 : vector<1x64xf32>
    %643 = math.exp %642 : vector<1x64xf32>
    %cst_116 = arith.constant 1.000000e+00 : f32
    %644 = vector.broadcast %cst_116 : f32 to vector<1x64xf32>
    %645 = arith.addf %644, %643 : vector<1x64xf32>
    %646 = arith.divf %644, %645 : vector<1x64xf32>
    %647 = arith.mulf %638, %596 : vector<1x64xf32>
    %648 = arith.mulf %637, %640 : vector<1x64xf32>
    %649 = arith.addf %647, %648 : vector<1x64xf32>
    %650 = math.tanh %649 : vector<1x64xf32>
    %651 = arith.mulf %646, %650 : vector<1x64xf32>
    %652 = arith.mulf %651, %4 : vector<1x64xf32>
    %cst_117 = arith.constant dense<0.000000e+00> : vector<1xf32>
    %653 = vector.multi_reduction <add>, %652, %cst_117 [1] : vector<1x64xf32> to vector<1xf32>
    %654 = vector.shape_cast %653 : vector<1xf32> to vector<1x1xf32>
    %655 = arith.maximumf %602, %654 : vector<1x1xf32>
    %c13 = arith.constant 13 : index
    %c0_118 = arith.constant 0 : index
    %656 = vector.load %arg0[%c13, %c0_118] : memref<16x256xf32, #tpu.memory_space<vmem>>, vector<1x256xf32>
    %cst_119 = arith.constant dense<0.000000e+00> : vector<1x256xf32>
    %657 = tpu.matmul %626, %0, %cst_119 {dimension_numbers = #tpu.dot_dimension_numbers<[1], [0], [0], [1], [0, 0, 1, 1], [], []>} : vector<1x64xf32>, vector<64x256xf32>, vector<1x256xf32> -> vector<1x256xf32>
    %658 = arith.addf %656, %657 : vector<1x256xf32>
    %659 = vector.extract_strided_slice %658 {offsets = [0, 0], sizes = [1, 128], strides = [1, 1]} : vector<1x256xf32> to vector<1x128xf32>
    %660 = arith.negf %659 : vector<1x128xf32>
    %661 = math.exp %660 : vector<1x128xf32>
    %cst_120 = arith.constant 1.000000e+00 : f32
    %662 = vector.broadcast %cst_120 : f32 to vector<1x128xf32>
    %663 = arith.addf %662, %661 : vector<1x128xf32>
    %664 = arith.divf %662, %663 : vector<1x128xf32>
    %665 = vector.extract_strided_slice %664 {offsets = [0, 0], sizes = [1, 64], strides = [1, 1]} : vector<1x128xf32> to vector<1x64xf32>
    %666 = vector.extract_strided_slice %664 {offsets = [0, 64], sizes = [1, 64], strides = [1, 1]} : vector<1x128xf32> to vector<1x64xf32>
    %667 = vector.extract_strided_slice %658 {offsets = [0, 128], sizes = [1, 64], strides = [1, 1]} : vector<1x256xf32> to vector<1x64xf32>
    %668 = math.tanh %667 : vector<1x64xf32>
    %669 = vector.extract_strided_slice %658 {offsets = [0, 192], sizes = [1, 64], strides = [1, 1]} : vector<1x256xf32> to vector<1x64xf32>
    %670 = arith.negf %669 : vector<1x64xf32>
    %671 = math.exp %670 : vector<1x64xf32>
    %cst_121 = arith.constant 1.000000e+00 : f32
    %672 = vector.broadcast %cst_121 : f32 to vector<1x64xf32>
    %673 = arith.addf %672, %671 : vector<1x64xf32>
    %674 = arith.divf %672, %673 : vector<1x64xf32>
    %675 = arith.mulf %666, %624 : vector<1x64xf32>
    %676 = arith.mulf %665, %668 : vector<1x64xf32>
    %677 = arith.addf %675, %676 : vector<1x64xf32>
    %678 = math.tanh %677 : vector<1x64xf32>
    %679 = arith.mulf %674, %678 : vector<1x64xf32>
    %cst_122 = arith.constant dense<0.000000e+00> : vector<1x256xf32>
    %680 = tpu.matmul %679, %1, %cst_122 {dimension_numbers = #tpu.dot_dimension_numbers<[1], [0], [0], [1], [0, 0, 1, 1], [], []>} : vector<1x64xf32>, vector<64x256xf32>, vector<1x256xf32> -> vector<1x256xf32>
    %cst_123 = arith.constant dense<0.000000e+00> : vector<1x256xf32>
    %681 = tpu.matmul %651, %2, %cst_123 {dimension_numbers = #tpu.dot_dimension_numbers<[1], [0], [0], [1], [0, 0, 1, 1], [], []>} : vector<1x64xf32>, vector<64x256xf32>, vector<1x256xf32> -> vector<1x256xf32>
    %682 = arith.addf %680, %681 : vector<1x256xf32>
    %683 = arith.addf %682, %3 : vector<1x256xf32>
    %684 = vector.extract_strided_slice %683 {offsets = [0, 0], sizes = [1, 128], strides = [1, 1]} : vector<1x256xf32> to vector<1x128xf32>
    %685 = arith.negf %684 : vector<1x128xf32>
    %686 = math.exp %685 : vector<1x128xf32>
    %cst_124 = arith.constant 1.000000e+00 : f32
    %687 = vector.broadcast %cst_124 : f32 to vector<1x128xf32>
    %688 = arith.addf %687, %686 : vector<1x128xf32>
    %689 = arith.divf %687, %688 : vector<1x128xf32>
    %690 = vector.extract_strided_slice %689 {offsets = [0, 0], sizes = [1, 64], strides = [1, 1]} : vector<1x128xf32> to vector<1x64xf32>
    %691 = vector.extract_strided_slice %689 {offsets = [0, 64], sizes = [1, 64], strides = [1, 1]} : vector<1x128xf32> to vector<1x64xf32>
    %692 = vector.extract_strided_slice %683 {offsets = [0, 128], sizes = [1, 64], strides = [1, 1]} : vector<1x256xf32> to vector<1x64xf32>
    %693 = math.tanh %692 : vector<1x64xf32>
    %694 = vector.extract_strided_slice %683 {offsets = [0, 192], sizes = [1, 64], strides = [1, 1]} : vector<1x256xf32> to vector<1x64xf32>
    %695 = arith.negf %694 : vector<1x64xf32>
    %696 = math.exp %695 : vector<1x64xf32>
    %cst_125 = arith.constant 1.000000e+00 : f32
    %697 = vector.broadcast %cst_125 : f32 to vector<1x64xf32>
    %698 = arith.addf %697, %696 : vector<1x64xf32>
    %699 = arith.divf %697, %698 : vector<1x64xf32>
    %700 = arith.mulf %691, %649 : vector<1x64xf32>
    %701 = arith.mulf %690, %693 : vector<1x64xf32>
    %702 = arith.addf %700, %701 : vector<1x64xf32>
    %703 = math.tanh %702 : vector<1x64xf32>
    %704 = arith.mulf %699, %703 : vector<1x64xf32>
    %705 = arith.mulf %704, %4 : vector<1x64xf32>
    %cst_126 = arith.constant dense<0.000000e+00> : vector<1xf32>
    %706 = vector.multi_reduction <add>, %705, %cst_126 [1] : vector<1x64xf32> to vector<1xf32>
    %707 = vector.shape_cast %706 : vector<1xf32> to vector<1x1xf32>
    %708 = arith.maximumf %655, %707 : vector<1x1xf32>
    %c14 = arith.constant 14 : index
    %c0_127 = arith.constant 0 : index
    %709 = vector.load %arg0[%c14, %c0_127] : memref<16x256xf32, #tpu.memory_space<vmem>>, vector<1x256xf32>
    %cst_128 = arith.constant dense<0.000000e+00> : vector<1x256xf32>
    %710 = tpu.matmul %679, %0, %cst_128 {dimension_numbers = #tpu.dot_dimension_numbers<[1], [0], [0], [1], [0, 0, 1, 1], [], []>} : vector<1x64xf32>, vector<64x256xf32>, vector<1x256xf32> -> vector<1x256xf32>
    %711 = arith.addf %709, %710 : vector<1x256xf32>
    %712 = vector.extract_strided_slice %711 {offsets = [0, 0], sizes = [1, 128], strides = [1, 1]} : vector<1x256xf32> to vector<1x128xf32>
    %713 = arith.negf %712 : vector<1x128xf32>
    %714 = math.exp %713 : vector<1x128xf32>
    %cst_129 = arith.constant 1.000000e+00 : f32
    %715 = vector.broadcast %cst_129 : f32 to vector<1x128xf32>
    %716 = arith.addf %715, %714 : vector<1x128xf32>
    %717 = arith.divf %715, %716 : vector<1x128xf32>
    %718 = vector.extract_strided_slice %717 {offsets = [0, 0], sizes = [1, 64], strides = [1, 1]} : vector<1x128xf32> to vector<1x64xf32>
    %719 = vector.extract_strided_slice %717 {offsets = [0, 64], sizes = [1, 64], strides = [1, 1]} : vector<1x128xf32> to vector<1x64xf32>
    %720 = vector.extract_strided_slice %711 {offsets = [0, 128], sizes = [1, 64], strides = [1, 1]} : vector<1x256xf32> to vector<1x64xf32>
    %721 = math.tanh %720 : vector<1x64xf32>
    %722 = vector.extract_strided_slice %711 {offsets = [0, 192], sizes = [1, 64], strides = [1, 1]} : vector<1x256xf32> to vector<1x64xf32>
    %723 = arith.negf %722 : vector<1x64xf32>
    %724 = math.exp %723 : vector<1x64xf32>
    %cst_130 = arith.constant 1.000000e+00 : f32
    %725 = vector.broadcast %cst_130 : f32 to vector<1x64xf32>
    %726 = arith.addf %725, %724 : vector<1x64xf32>
    %727 = arith.divf %725, %726 : vector<1x64xf32>
    %728 = arith.mulf %719, %677 : vector<1x64xf32>
    %729 = arith.mulf %718, %721 : vector<1x64xf32>
    %730 = arith.addf %728, %729 : vector<1x64xf32>
    %731 = math.tanh %730 : vector<1x64xf32>
    %732 = arith.mulf %727, %731 : vector<1x64xf32>
    %cst_131 = arith.constant dense<0.000000e+00> : vector<1x256xf32>
    %733 = tpu.matmul %732, %1, %cst_131 {dimension_numbers = #tpu.dot_dimension_numbers<[1], [0], [0], [1], [0, 0, 1, 1], [], []>} : vector<1x64xf32>, vector<64x256xf32>, vector<1x256xf32> -> vector<1x256xf32>
    %cst_132 = arith.constant dense<0.000000e+00> : vector<1x256xf32>
    %734 = tpu.matmul %704, %2, %cst_132 {dimension_numbers = #tpu.dot_dimension_numbers<[1], [0], [0], [1], [0, 0, 1, 1], [], []>} : vector<1x64xf32>, vector<64x256xf32>, vector<1x256xf32> -> vector<1x256xf32>
    %735 = arith.addf %733, %734 : vector<1x256xf32>
    %736 = arith.addf %735, %3 : vector<1x256xf32>
    %737 = vector.extract_strided_slice %736 {offsets = [0, 0], sizes = [1, 128], strides = [1, 1]} : vector<1x256xf32> to vector<1x128xf32>
    %738 = arith.negf %737 : vector<1x128xf32>
    %739 = math.exp %738 : vector<1x128xf32>
    %cst_133 = arith.constant 1.000000e+00 : f32
    %740 = vector.broadcast %cst_133 : f32 to vector<1x128xf32>
    %741 = arith.addf %740, %739 : vector<1x128xf32>
    %742 = arith.divf %740, %741 : vector<1x128xf32>
    %743 = vector.extract_strided_slice %742 {offsets = [0, 0], sizes = [1, 64], strides = [1, 1]} : vector<1x128xf32> to vector<1x64xf32>
    %744 = vector.extract_strided_slice %742 {offsets = [0, 64], sizes = [1, 64], strides = [1, 1]} : vector<1x128xf32> to vector<1x64xf32>
    %745 = vector.extract_strided_slice %736 {offsets = [0, 128], sizes = [1, 64], strides = [1, 1]} : vector<1x256xf32> to vector<1x64xf32>
    %746 = math.tanh %745 : vector<1x64xf32>
    %747 = vector.extract_strided_slice %736 {offsets = [0, 192], sizes = [1, 64], strides = [1, 1]} : vector<1x256xf32> to vector<1x64xf32>
    %748 = arith.negf %747 : vector<1x64xf32>
    %749 = math.exp %748 : vector<1x64xf32>
    %cst_134 = arith.constant 1.000000e+00 : f32
    %750 = vector.broadcast %cst_134 : f32 to vector<1x64xf32>
    %751 = arith.addf %750, %749 : vector<1x64xf32>
    %752 = arith.divf %750, %751 : vector<1x64xf32>
    %753 = arith.mulf %744, %702 : vector<1x64xf32>
    %754 = arith.mulf %743, %746 : vector<1x64xf32>
    %755 = arith.addf %753, %754 : vector<1x64xf32>
    %756 = math.tanh %755 : vector<1x64xf32>
    %757 = arith.mulf %752, %756 : vector<1x64xf32>
    %758 = arith.mulf %757, %4 : vector<1x64xf32>
    %cst_135 = arith.constant dense<0.000000e+00> : vector<1xf32>
    %759 = vector.multi_reduction <add>, %758, %cst_135 [1] : vector<1x64xf32> to vector<1xf32>
    %760 = vector.shape_cast %759 : vector<1xf32> to vector<1x1xf32>
    %761 = arith.maximumf %708, %760 : vector<1x1xf32>
    %c15 = arith.constant 15 : index
    %c0_136 = arith.constant 0 : index
    %762 = vector.load %arg0[%c15, %c0_136] : memref<16x256xf32, #tpu.memory_space<vmem>>, vector<1x256xf32>
    %cst_137 = arith.constant dense<0.000000e+00> : vector<1x256xf32>
    %763 = tpu.matmul %732, %0, %cst_137 {dimension_numbers = #tpu.dot_dimension_numbers<[1], [0], [0], [1], [0, 0, 1, 1], [], []>} : vector<1x64xf32>, vector<64x256xf32>, vector<1x256xf32> -> vector<1x256xf32>
    %764 = arith.addf %762, %763 : vector<1x256xf32>
    %765 = vector.extract_strided_slice %764 {offsets = [0, 0], sizes = [1, 128], strides = [1, 1]} : vector<1x256xf32> to vector<1x128xf32>
    %766 = arith.negf %765 : vector<1x128xf32>
    %767 = math.exp %766 : vector<1x128xf32>
    %cst_138 = arith.constant 1.000000e+00 : f32
    %768 = vector.broadcast %cst_138 : f32 to vector<1x128xf32>
    %769 = arith.addf %768, %767 : vector<1x128xf32>
    %770 = arith.divf %768, %769 : vector<1x128xf32>
    %771 = vector.extract_strided_slice %770 {offsets = [0, 0], sizes = [1, 64], strides = [1, 1]} : vector<1x128xf32> to vector<1x64xf32>
    %772 = vector.extract_strided_slice %770 {offsets = [0, 64], sizes = [1, 64], strides = [1, 1]} : vector<1x128xf32> to vector<1x64xf32>
    %773 = vector.extract_strided_slice %764 {offsets = [0, 128], sizes = [1, 64], strides = [1, 1]} : vector<1x256xf32> to vector<1x64xf32>
    %774 = math.tanh %773 : vector<1x64xf32>
    %775 = vector.extract_strided_slice %764 {offsets = [0, 192], sizes = [1, 64], strides = [1, 1]} : vector<1x256xf32> to vector<1x64xf32>
    %776 = arith.negf %775 : vector<1x64xf32>
    %777 = math.exp %776 : vector<1x64xf32>
    %cst_139 = arith.constant 1.000000e+00 : f32
    %778 = vector.broadcast %cst_139 : f32 to vector<1x64xf32>
    %779 = arith.addf %778, %777 : vector<1x64xf32>
    %780 = arith.divf %778, %779 : vector<1x64xf32>
    %781 = arith.mulf %772, %730 : vector<1x64xf32>
    %782 = arith.mulf %771, %774 : vector<1x64xf32>
    %783 = arith.addf %781, %782 : vector<1x64xf32>
    %784 = math.tanh %783 : vector<1x64xf32>
    %785 = arith.mulf %780, %784 : vector<1x64xf32>
    %cst_140 = arith.constant dense<0.000000e+00> : vector<1x256xf32>
    %786 = tpu.matmul %785, %1, %cst_140 {dimension_numbers = #tpu.dot_dimension_numbers<[1], [0], [0], [1], [0, 0, 1, 1], [], []>} : vector<1x64xf32>, vector<64x256xf32>, vector<1x256xf32> -> vector<1x256xf32>
    %cst_141 = arith.constant dense<0.000000e+00> : vector<1x256xf32>
    %787 = tpu.matmul %757, %2, %cst_141 {dimension_numbers = #tpu.dot_dimension_numbers<[1], [0], [0], [1], [0, 0, 1, 1], [], []>} : vector<1x64xf32>, vector<64x256xf32>, vector<1x256xf32> -> vector<1x256xf32>
    %788 = arith.addf %786, %787 : vector<1x256xf32>
    %789 = arith.addf %788, %3 : vector<1x256xf32>
    %790 = vector.extract_strided_slice %789 {offsets = [0, 0], sizes = [1, 128], strides = [1, 1]} : vector<1x256xf32> to vector<1x128xf32>
    %791 = arith.negf %790 : vector<1x128xf32>
    %792 = math.exp %791 : vector<1x128xf32>
    %cst_142 = arith.constant 1.000000e+00 : f32
    %793 = vector.broadcast %cst_142 : f32 to vector<1x128xf32>
    %794 = arith.addf %793, %792 : vector<1x128xf32>
    %795 = arith.divf %793, %794 : vector<1x128xf32>
    %796 = vector.extract_strided_slice %795 {offsets = [0, 0], sizes = [1, 64], strides = [1, 1]} : vector<1x128xf32> to vector<1x64xf32>
    %797 = vector.extract_strided_slice %795 {offsets = [0, 64], sizes = [1, 64], strides = [1, 1]} : vector<1x128xf32> to vector<1x64xf32>
    %798 = vector.extract_strided_slice %789 {offsets = [0, 128], sizes = [1, 64], strides = [1, 1]} : vector<1x256xf32> to vector<1x64xf32>
    %799 = math.tanh %798 : vector<1x64xf32>
    %800 = vector.extract_strided_slice %789 {offsets = [0, 192], sizes = [1, 64], strides = [1, 1]} : vector<1x256xf32> to vector<1x64xf32>
    %801 = arith.negf %800 : vector<1x64xf32>
    %802 = math.exp %801 : vector<1x64xf32>
    %cst_143 = arith.constant 1.000000e+00 : f32
    %803 = vector.broadcast %cst_143 : f32 to vector<1x64xf32>
    %804 = arith.addf %803, %802 : vector<1x64xf32>
    %805 = arith.divf %803, %804 : vector<1x64xf32>
    %806 = arith.mulf %797, %755 : vector<1x64xf32>
    %807 = arith.mulf %796, %799 : vector<1x64xf32>
    %808 = arith.addf %806, %807 : vector<1x64xf32>
    %809 = math.tanh %808 : vector<1x64xf32>
    %810 = arith.mulf %805, %809 : vector<1x64xf32>
    %811 = arith.mulf %810, %4 : vector<1x64xf32>
    %cst_144 = arith.constant dense<0.000000e+00> : vector<1xf32>
    %812 = vector.multi_reduction <add>, %811, %cst_144 [1] : vector<1x64xf32> to vector<1xf32>
    %813 = vector.shape_cast %812 : vector<1xf32> to vector<1x1xf32>
    %814 = arith.maximumf %761, %813 : vector<1x1xf32>
    %c0_145 = arith.constant 0 : index
    %c0_146 = arith.constant 0 : index
    %815 = memref.load %arg6[%c0_145, %c0_146] : memref<1x1xf32, #tpu.memory_space<smem>>
    %816 = vector.broadcast %815 : f32 to vector<1x1xf32>
    %817 = arith.addf %814, %816 : vector<1x1xf32>
    %c0_147 = arith.constant 0 : index
    %c0_148 = arith.constant 0 : index
    %818 = vector.load %arg7[%c0_147, %c0_148] : memref<1x1xf32, #tpu.memory_space<vmem>>, vector<1x1xf32>
    tpu.vector_store %arg7[%c0_147, %c0_148], %817 {strides = array<i32>} : memref<1x1xf32, #tpu.memory_space<vmem>>, vector<1x1xf32>,
    return
  }
}

</mosaic_0001>

<bundles_post_ra>
// kernel: lstm_forward.1
= control target key start
LH: loop header
LB: loop body
LE: loop exit
PB: predicated region body
PF: predicated region fallthrough
CT: control target
= control target key end

     0   :  { %13 = vsyncpa [#allocation4], 0  ;;  %s6615_s0 = inlined_call_operand.vmem [shape: f32[16,256], index: 0, kind: input, shape index: {}]   ;;  %s6616_s1 = inlined_call_operand.hbm [shape: f32[64,256], index: 1, kind: input, shape index: {}]   ;;  %s6617_s2 = inlined_call_operand.hbm [shape: f32[64,256], index: 2, kind: input, shape index: {}]   ;;  %s6618_s3 = inlined_call_operand.hbm [shape: f32[64,256], index: 3, kind: input, shape index: {}]   ;;  %s6619_s4 = inlined_call_operand.vmem [shape: f32[1,256], index: 4, kind: input, shape index: {}]   ;;  %s6620_s5 = inlined_call_operand.vmem [shape: f32[1,64], index: 5, kind: input, shape index: {}]   ;;  %s6621_s6 = inlined_call_operand.<no memory space> [shape: f32[1,1], index: 6, kind: input, shape index: {}]   ;;  %s6622_s7 = inlined_call_operand.hbm [shape: f32[1,1], index: 7, kind: output, shape index: {}]  }
   0x1   :  { %14 = vsyncpa [#allocation7], 0 }
   0x2   :  { %15 = vsyncpa [#allocation5], 0  ;;  %s35_s26 = sshll.u32 %s6617_s2, 4  ;;  %s4985_s27 = smov [#allocation6]   ;;  %s36_s26 = int_to_ptr.hbm [resolvable:$true] %s35_s26 }
   0x3   :  { %s37_s28 = sshll.u32 %s4985_s27, 4  ;;  %s22_s8 = sshll.u32 %s6616_s1, 4  ;;  %s38_s28 = int_to_ptr.vmem [resolvable:$true] %s37_s28  ;;  %s23_s8 = int_to_ptr.hbm [resolvable:$true] %s22_s8 }
   0x4   :  { %s4986_s9 = smov 256   ;;  %s4987_s10 = smov 16  }
   0x5   :  { %43 = dma.hbm_to_vmem [thread:$0]  %s36_s26, 2048, %s38_s28, [#allocation7], %s4986_s9, %s4986_s9, %s4987_s10  }
   0x6   :  { %s4988_s11 = smov [#allocation3]   ;;  %s48_s15 = sshll.u32 %s6618_s3, 4  ;;  %s49_s15 = int_to_ptr.hbm [resolvable:$true] %s48_s15 }
   0x7   :  { %s24_s12 = sshll.u32 %s4988_s11, 4  ;;  %s4989_s2 = smov [#allocation8]   ;;  %s25_s12 = int_to_ptr.vmem [resolvable:$true] %s24_s12 }
   0x8   :  { %30 = dma.hbm_to_vmem [thread:$0]  %s23_s8, 2048, %s25_s12, [#allocation4], %s4986_s9, %s4986_s9, %s4987_s10  }
   0x9   :  { %s50_s16 = sshll.u32 %s4989_s2, 4  ;;  %s51_s16 = int_to_ptr.vmem [resolvable:$true] %s50_s16 }
   0xa   :  { %56 = dma.hbm_to_vmem [thread:$0]  %s49_s15, 2048, %s51_s16, [#allocation7], %s4986_s9, %s4986_s9, %s4987_s10  }
   0xb   :  { %4979 = dma.done.wait [#allocation4], 2048  }
   0xc   :  { %4980 = vsyncadd [#allocation4], 4294965248 }
   0xd   :  { %4981 = dma.done.wait [#allocation7], 4096  }
   0xe   :  { %4982 = vsyncadd [#allocation7], 4294963200  ;;  %v5042_v0 = vld [vmem:[#allocation3 + $0x78] sm:$0xff]  ;;  %v5044_v1 = vld [vmem:[#allocation3 + $0x70] sm:$0xff]  ;;  %v4990_v16 = vmov 0.0   ;;  %vm173_vm0 = vcmask 1040384  }
   0xf   :  { %v5046_v2 = vld [vmem:[#allocation3 + $0x68] sm:$0xff]  ;;  %158 = vmatpush.msra.mxu1 %v5042_v0  ;;  %138 = vmatpush.msra.mxu0 %v5044_v1  ;;  %v5050_v3 = vld [vmem:[#allocation3 + $0x60] sm:$0xff]  ;;  %v5052_v4 = vld [vmem:[#allocation3 + $0x58] sm:$0xff]  ;;  %s4991_s17 = smov 64   ;;  %vm126_vm9 = vcmask 523264   ;;  %s4120_s28 = sshll.u32 %s6622_s7, 4  ;;  %s4121_s28 = int_to_ptr.hbm [resolvable:$true] %s4120_s28 }
  0x10   :  { %v5054_v5 = vld [vmem:[#allocation3 + $0x50] sm:$0xff]  ;;  %v5058_v6 = vld [vmem:[#allocation3 + $0x48] sm:$0xff]  ;;  %v5060_v7 = vld [vmem:[#allocation3 + $0x40] sm:$0xff] }
  0x11   :  { %159 = vmatpush.msra.mxu1 %v5046_v2  ;;  %139 = vmatpush.msra.mxu0 %v5050_v3  ;;  %v5064_v8 = vld [vmem:[#allocation3 + $0x38] sm:$0xff]  ;;  %v5066_v9 = vld [vmem:[#allocation3 + $0x30] sm:$0xff]  ;;  %v5070_v10 = vld [vmem:[#allocation3 + $0x28] sm:$0xff] }
  0x12   :  { %v5072_v11 = vld [vmem:[#allocation3 + $0x20] sm:$0xff]  ;;  %v5076_v12 = vld [vmem:[#allocation3 + $0x18] sm:$0xff]  ;;  %v5078_v13 = vld [vmem:[#allocation3 + $0x10] sm:$0xff] }
  0x13   :  { %160 = vmatpush.msra.mxu1 %v5052_v4  ;;  %140 = vmatpush.msra.mxu0 %v5054_v5  ;;  %6684 = vst [vmem:[#allocation13_spill] sm:$0xff] %v5076_v12  ;;  %v5082_v14 = vld [vmem:[#allocation3 + $0x8] sm:$0xff]  ;;  %v5084_v15 = vld [vmem:[#allocation3] sm:$0xff]  ;;  %v5098_v39 = vld [vmem:[#allocation8 + $0x70] sm:$0xff] }
  0x14   :  { %6685 = vst [vmem:[#allocation14_spill] sm:$0xff] %v5082_v14  ;;  %v125_v20 = vld [vmem:[%s6615_s0] ss:$8 sm:$0x3]  ;;  %v5100_v40 = vld [vmem:[#allocation8 + $0x78] sm:$0xff]  ;;  %244 = vmatpush.msra.mxu2 %v5098_v39  ;;  %v5108_v43 = vld [vmem:[#allocation8 + $0x50] sm:$0xff] }
  0x15   :  { %161 = vmatpush.msra.mxu1 %v5058_v6  ;;  %141 = vmatpush.msra.mxu0 %v5060_v7  ;;  %6686 = vst [vmem:[#allocation15_spill] sm:$0xff] %v5084_v15  ;;  %v5102_v41 = vld [vmem:[#allocation8 + $0x60] sm:$0xff]  ;;  %v5106_v42 = vld [vmem:[#allocation8 + $0x68] sm:$0xff]  ;;  %v5110_v44 = vld [vmem:[#allocation8 + $0x58] sm:$0xff] }
  0x16   :  { %264 = vmatpush.msra.mxu3 %v5100_v40  ;;  %245 = vmatpush.msra.mxu2 %v5102_v41  ;;  %v5114_v45 = vld [vmem:[#allocation8 + $0x40] sm:$0xff]  ;;  %v5116_v46 = vld [vmem:[#allocation8 + $0x48] sm:$0xff]  ;;  %v5120_v47 = vld [vmem:[#allocation8 + $0x30] sm:$0xff] }
  0x17   :  { %162 = vmatpush.msra.mxu1 %v5064_v8  ;;  %142 = vmatpush.msra.mxu0 %v5066_v9  ;;  %v5122_v48 = vld [vmem:[#allocation6 + $0x70] sm:$0xff]  ;;  %v5124_v49 = vld [vmem:[#allocation6 + $0x78] sm:$0xff]  ;;  %v5130_v51 = vld [vmem:[#allocation6 + $0x60] sm:$0xff] }
  0x18   :  { %265 = vmatpush.msra.mxu3 %v5106_v42  ;;  %246 = vmatpush.msra.mxu2 %v5108_v43  ;;  %v5126_v50 = vld [vmem:[#allocation8 + $0x38] sm:$0xff]  ;;  %v5132_v52 = vld [vmem:[#allocation6 + $0x68] sm:$0xff]  ;;  %v5136_v53 = vld [vmem:[#allocation6 + $0x50] sm:$0xff] }
  0x19   :  { %163 = vmatpush.msra.mxu1 %v5070_v10  ;;  %143 = vmatpush.msra.mxu0 %v5072_v11  ;;  %v5138_v54 = vld [vmem:[#allocation6 + $0x58] sm:$0xff]  ;;  %v5140_v55 = vld [vmem:[#allocation8 + $0x20] sm:$0xff]  ;;  %v5142_v56 = vld [vmem:[#allocation8 + $0x28] sm:$0xff] }
  0x1a   :  { %266 = vmatpush.msra.mxu3 %v5110_v44  ;;  %247 = vmatpush.msra.mxu2 %v5114_v45  ;;  %v5148_v58 = vld [vmem:[#allocation6 + $0x40] sm:$0xff]  ;;  %v5150_v59 = vld [vmem:[#allocation6 + $0x48] sm:$0xff]  ;;  %v5152_v61 = vld [vmem:[#allocation8 + $0x10] sm:$0xff] }
  0x1b   :  { %164 = vmatpush.msra.mxu1 %v5076_v12  ;;  %144 = vmatpush.msra.mxu0 %v5078_v13  ;;  %6687 = vst [vmem:[#allocation16_spill] sm:$0xff] %v5152_v61  ;;  %v5154_v62 = vld [vmem:[#allocation8 + $0x18] sm:$0xff] }
  0x1c   :  { %267 = vmatpush.msra.mxu3 %v5116_v46  ;;  %248 = vmatpush.msra.mxu2 %v5120_v47  ;;  %6688 = vst [vmem:[#allocation17_spill] sm:$0xff] %v5154_v62 }
  0x1d   :  { %165 = vmatpush.msra.mxu1 %v5082_v14  ;;  %145 = vmatpush.msra.mxu0 %v5084_v15 }
  0x1e   :  { %166 = vmatmul.f32.vlgmr.msra.gmra.mxu1 %v4990_v16  ;;  %146 = vmatmul.f32.vlgmr.msra.gmra.mxu0 %v4990_v16 }
  0x1f   :  { %287 = vmatpush.msrb.mxu0 %v5122_v48  ;;  %307 = vmatpush.msrb.mxu1 %v5124_v49 }
  0x20   :  { %268 = vmatpush.msra.mxu3 %v5126_v50  ;;  %249 = vmatpush.msra.mxu2 %v5140_v55 }
  0x21   :  { %288 = vmatpush.msrb.mxu0 %v5130_v51  ;;  %308 = vmatpush.msrb.mxu1 %v5132_v52 }
  0x22   :  { %269 = vmatpush.msra.mxu3 %v5142_v56  ;;  %250 = vmatpush.msra.mxu2 %v5152_v61 }
  0x23   :  { %289 = vmatpush.msrb.mxu0 %v5136_v53  ;;  %309 = vmatpush.msrb.mxu1 %v5138_v54 }
  0x24   :  { %270 = vmatpush.msra.mxu3 %v5154_v62 }
  0x25   :  { %290 = vmatpush.msrb.mxu0 %v5148_v58  ;;  %310 = vmatpush.msrb.mxu1 %v5150_v59 }
  0x9b   :  { %v167_v17 = vpop.f32.mrf.mxu1  ;;  %v147_v18 = vpop.f32.mrf.mxu0 }
  0x9c   :  { %v172_v19 = vrot.slane %v167_v17, 7  ;;  %v5162_v17 = vld [vmem:[#allocation6 + $0x30] sm:$0xff] }
  0x9d   :  { %291 = vmatpush.msrb.mxu0 %v5162_v17 }
  0x9e   :  { %v174_v21 = vsel %vm173_vm0, %v147_v18, %v172_v19  ;;  %v5164_v18 = vld [vmem:[#allocation6 + $0x38] sm:$0xff]  ;;  %v5166_v19 = vld [vmem:[#allocation8] sm:$0xff] }
  0x9f   :  { %v176_v22 = vadd.f32 %v174_v21, %v125_v20  ;;  %6689 = vst [vmem:[#allocation18_spill] sm:$0xff] %v5166_v19  ;;  %v5168_v20 = vld [vmem:[#allocation8 + $0x8] sm:$0xff]  ;;  %311 = vmatpush.msrb.mxu1 %v5164_v18  ;;  %251 = vmatpush.msra.mxu2 %v5166_v19  ;;  %v5181_v21 = vld [vmem:[#allocation6 + $0x20] sm:$0xff] }
  0xa0   :  { %6690 = vst [vmem:[#allocation19_spill] sm:$0xff] %v5168_v20  ;;  %271 = vmatpush.msra.mxu3 %v5168_v20  ;;  %252 = vmatmul.f32.vlgmr.msra.gmra.mxu2 %v4990_v16 }
  0xa1   :  { %v4131_v23 = vmul.f32 -1.442695, %v176_v22  ;;  %v197_v27 = vrot.slane %v176_v22, 1  ;;  %384 = vmatpush.msrb.mxu2 %v5044_v1  ;;  %272 = vmatmul.f32.vlgmr.msra.gmra.mxu3 %v4990_v16 }
  0xa2   :  { %404 = vmatpush.msrb.mxu3 %v5042_v0  ;;  %292 = vmatpush.msrb.mxu0 %v5181_v21 }
  0xa3   :  { %4311 = vpow2.f32 %v4131_v23  ;;  %385 = vmatpush.msrb.mxu2 %v5050_v3  ;;  %v5189_v23 = vld [vmem:[#allocation6 + $0x10] sm:$0xff] }
  0xa4   :  { %405 = vmatpush.msrb.mxu3 %v5046_v2  ;;  %293 = vmatpush.msrb.mxu0 %v5189_v23 }
  0xa5   :  { %386 = vmatpush.msrb.mxu2 %v5054_v5 }
  0xa6   :  { %406 = vmatpush.msrb.mxu3 %v5052_v4 }
  0xa7   :  { %387 = vmatpush.msrb.mxu2 %v5060_v7 }
  0xa8   :  { %407 = vmatpush.msrb.mxu3 %v5058_v6 }
  0xa9   :  { %v4312_v24 = vpop.eup %4311  ;;  %388 = vmatpush.msrb.mxu2 %v5066_v9 }
  0xaa   :  { %v180_v25 = vadd.f32 1.0, %v4312_v24  ;;  %408 = vmatpush.msrb.mxu3 %v5064_v8 }
  0xab   :  { %389 = vmatpush.msrb.mxu2 %v5072_v11 }
  0xac   :  { %4313 = vrcp.f32 %v180_v25  ;;  %v192_v30 = vand.u32 2147483648, %v180_v25  ;;  %v190_v32 = vand.u32 2147483647, %v180_v25  ;;  %vm186_vm2 = vweird.f32 %v180_v25  ;;  %409 = vmatpush.msrb.mxu3 %v5070_v10 }
  0xad   :  { %4315 = vtanh.f32 %v197_v27  ;;  %390 = vmatpush.msrb.mxu2 %v5078_v13 }
  0xae   :  { %v193_v34 = vor.u32 1.1754944e-38, %v192_v30  ;;  %vm191_vm4 = vcmp.eq.f32.partialorder %v190_v32, 8.507059e+37  ;;  %410 = vmatpush.msrb.mxu3 %v5076_v12  ;;  %v5224_v30 = vld [vmem:[#allocation6] sm:$0xff] }
  0xaf   :  { %391 = vmatpush.msrb.mxu2 %v5084_v15  ;;  %294 = vmatpush.msrb.mxu0 %v5224_v30 }
  0xb0   :  { %411 = vmatpush.msrb.mxu3 %v5082_v14 }
  0xb1   :  { %537 = vmatpush.msra.mxu2 %v5122_v48  ;;  %494 = vmatpush.msra.mxu0 %v5098_v39 }
  0xb2   :  { %v4314_v26 = vpop.eup %4313  ;;  %557 = vmatpush.msra.mxu3 %v5124_v49 }
  0xb3   :  { %v182_v28 = vmul.f32 %v4314_v26, %v180_v25  ;;  %vm187_vm1 = vweird.f32 %v4314_v26  ;;  %v4316_v36 = vpop.eup %4315  ;;  %v5193_v25 = vld [vmem:[#allocation6 + $0x18] sm:$0xff]  ;;  %538 = vmatpush.msra.mxu2 %v5130_v51  ;;  %495 = vmatpush.msra.mxu0 %v5102_v41 }
  0xb4   :  { %vm188_vm3 = vmor %vm186_vm2, %vm187_vm1  ;;  %558 = vmatpush.msra.mxu3 %v5132_v52 }
  0xb5   :  { %v183_v29 = vsub.f32 1.0, %v182_v28  ;;  %539 = vmatpush.msra.mxu2 %v5136_v53  ;;  %496 = vmatpush.msra.mxu0 %v5108_v43 }
  0xb6   :  { %559 = vmatpush.msra.mxu3 %v5138_v54 }
  0xb7   :  { %v184_v31 = vmul.f32 %v4314_v26, %v183_v29  ;;  %540 = vmatpush.msra.mxu2 %v5148_v58  ;;  %497 = vmatpush.msra.mxu0 %v5114_v45 }
  0xb8   :  { %560 = vmatpush.msra.mxu3 %v5150_v59 }
  0xb9   :  { %v185_v33 = vadd.f32 %v4314_v26, %v184_v31  ;;  %541 = vmatpush.msra.mxu2 %v5162_v17  ;;  %v5226_v31 = vld [vmem:[#allocation6 + $0x8] sm:$0xff]  ;;  %498 = vmatpush.msra.mxu0 %v5120_v47 }
  0xba   :  { %561 = vmatpush.msra.mxu3 %v5164_v18 }
  0xbb   :  { %v189_v35 = vsel %vm188_vm3, %v4314_v26, %v185_v33  ;;  %542 = vmatpush.msra.mxu2 %v5181_v21  ;;  %499 = vmatpush.msra.mxu0 %v5140_v55 }
  0xbc   :  { %v194_v37 = vsel %vm191_vm4, %v193_v34, %v189_v35 }
  0xbd   :  { %v224_v38 = vmul.f32 %v4316_v36, %v194_v37  ;;  %v223_v57 = vmul.f32 0.0, %v194_v37  ;;  %543 = vmatpush.msra.mxu2 %v5189_v23  ;;  %500 = vmatpush.msra.mxu0 %v5152_v61 }
  0xbf   :  { %226 = vrot.lane.b32.xlu0 %v224_v38, %s4991_s17  ;;  %544 = vmatpush.msra.mxu2 %v5224_v30 }
  0xc0   :  { %501 = vmatpush.msra.mxu0 %v5166_v19 }
  0xc7   :  { %200 = vrot.lane.b32.xlu0 %v176_v22, %s4991_s17  ;;  %v5183_v22 = vld [vmem:[#allocation6 + $0x28] sm:$0xff] }
  0xc8   :  { %312 = vmatpush.msrb.mxu1 %v5183_v22  ;;  %562 = vmatpush.msra.mxu3 %v5183_v22 }
  0xca   :  { %313 = vmatpush.msrb.mxu1 %v5193_v25  ;;  %563 = vmatpush.msra.mxu3 %v5193_v25 }
  0xcc   :  { %314 = vmatpush.msrb.mxu1 %v5226_v31  ;;  %564 = vmatpush.msra.mxu3 %v5226_v31 }
  0xce   :  { %514 = vmatpush.msra.mxu1 %v5100_v40 }
  0xd0   :  { %515 = vmatpush.msra.mxu1 %v5106_v42 }
  0xd2   :  { %516 = vmatpush.msra.mxu1 %v5110_v44 }
  0xd4   :  { %517 = vmatpush.msra.mxu1 %v5116_v46 }
  0xd6   :  { %518 = vmatpush.msra.mxu1 %v5126_v50 }
  0xd8   :  { %519 = vmatpush.msra.mxu1 %v5142_v56 }
  0xda   :  { %520 = vmatpush.msra.mxu1 %v5154_v62 }
  0xdc   :  { %521 = vmatpush.msra.mxu1 %v5168_v20 }
 0x131   :  { %v227_v60 = vpop.permute.xlu0 %226 }
 0x132   :  { %v5158_v63 = vadd.f32 %v227_v60, %v223_v57 }
 0x134   :  { %4317 = vtanh.f32 %v5158_v63 }
 0x139   :  { %v201_v16 = vpop.permute.xlu0 %200 }
 0x13a   :  { %v4318_v24 = vpop.eup %4317  ;;  %v202_v26 = vrot.slane %v201_v16, 1 }
 0x13b   :  { %232 = vrot.lane.b32.xlu1 %v4318_v24, %s4991_s17 }
 0x13c   :  { %v4132_v27 = vmul.f32 -1.442695, %v202_v26 }
 0x13e   :  { %4319 = vpow2.f32 %v4132_v27  ;;  %v123_v27 = vld [vmem:[%s6619_s4] sm:$0x3] }
 0x144   :  { %v4320_v28 = vpop.eup %4319 }
 0x145   :  { %v207_v29 = vadd.f32 1.0, %v4320_v28  ;;  %v273_v28 = vpop.f32.mrf.mxu3 }
 0x147   :  { %4321 = vrcp.f32 %v207_v29  ;;  %v219_v37 = vand.u32 2147483648, %v207_v29  ;;  %vm213_vm6 = vweird.f32 %v207_v29  ;;  %v217_v38 = vand.u32 2147483647, %v207_v29 }
 0x149   :  { %v220_v60 = vor.u32 1.1754944e-38, %v219_v37  ;;  %vm218_vm8 = vcmp.eq.f32.partialorder %v217_v38, 8.507059e+37  ;;  %v4137_v38 = vld [vmem:[%s6615_s0 + $0x1] ss:$8 sm:$0x3] }
 0x14d   :  { %v4322_v32 = vpop.eup %4321 }
 0x14e   :  { %v209_v33 = vmul.f32 %v4322_v32, %v207_v29  ;;  %vm214_vm5 = vweird.f32 %v4322_v32  ;;  %v253_v29 = vpop.f32.mrf.mxu2 }
 0x14f   :  { %vm215_vm7 = vmor %vm213_vm6, %vm214_vm5 }
 0x150   :  { %v210_v34 = vsub.f32 1.0, %v209_v33 }
 0x152   :  { %v211_v35 = vmul.f32 %v4322_v32, %v210_v34 }
 0x154   :  { %v212_v36 = vadd.f32 %v4322_v32, %v211_v35 }
 0x156   :  { %v216_v57 = vsel %vm215_vm7, %v4322_v32, %v212_v36  ;;  %v5287_v32 = vperm.slane %v123_v27, 0 }
 0x157   :  { %v221_v24 = vsel %vm218_vm8, %v220_v60, %v216_v57 }
 0x158   :  { %6691 = vst [vmem:[#allocation20_spill] sm:$0xff] %v5287_v32 }
 0x1ad   :  { %v233_v16 = vpop.permute.xlu1 %232 }
 0x1ae   :  { %v235_v26 = vmul.f32 %v233_v16, %v221_v24 }
 0x1b0   :  { %4133 = vmatmul.msk.f32.vlgmr.msrb.gmra.mxu0 %vm126_vm9, %v235_v26  ;;  %4134 = vmatmul.msk.f32.vlgmr.msrb.gmra.mxu1 %vm126_vm9, %v235_v26 }
 0x1b1   :  { %4138 = vmatmul.msk.f32.vlgmr.msrb.gmra.mxu2 %vm126_vm9, %v235_v26  ;;  %4139 = vmatmul.msk.f32.vlgmr.msrb.gmra.mxu3 %vm126_vm9, %v235_v26 }
 0x1b2   :  { %629 = vmatpush.msrb.mxu0 %v5044_v1  ;;  %649 = vmatpush.msrb.mxu1 %v5042_v0 }
 0x1b3   :  { %739 = vmatpush.msrb.mxu2 %v5098_v39  ;;  %759 = vmatpush.msrb.mxu3 %v5100_v40 }
 0x1b4   :  { %630 = vmatpush.msrb.mxu0 %v5050_v3  ;;  %650 = vmatpush.msrb.mxu1 %v5046_v2 }
 0x1b5   :  { %740 = vmatpush.msrb.mxu2 %v5102_v41  ;;  %760 = vmatpush.msrb.mxu3 %v5106_v42 }
 0x1b6   :  { %631 = vmatpush.msrb.mxu0 %v5054_v5  ;;  %651 = vmatpush.msrb.mxu1 %v5052_v4 }
 0x1b7   :  { %741 = vmatpush.msrb.mxu2 %v5108_v43  ;;  %761 = vmatpush.msrb.mxu3 %v5110_v44 }
 0x1b8   :  { %632 = vmatpush.msrb.mxu0 %v5060_v7  ;;  %652 = vmatpush.msrb.mxu1 %v5058_v6 }
 0x1b9   :  { %742 = vmatpush.msrb.mxu2 %v5114_v45  ;;  %762 = vmatpush.msrb.mxu3 %v5116_v46 }
 0x1ba   :  { %633 = vmatpush.msrb.mxu0 %v5066_v9  ;;  %653 = vmatpush.msrb.mxu1 %v5064_v8 }
 0x1bb   :  { %743 = vmatpush.msrb.mxu2 %v5120_v47  ;;  %763 = vmatpush.msrb.mxu3 %v5126_v50 }
 0x1bc   :  { %634 = vmatpush.msrb.mxu0 %v5072_v11  ;;  %654 = vmatpush.msrb.mxu1 %v5070_v10 }
 0x1bd   :  { %744 = vmatpush.msrb.mxu2 %v5140_v55  ;;  %764 = vmatpush.msrb.mxu3 %v5142_v56 }
 0x1be   :  { %635 = vmatpush.msrb.mxu0 %v5078_v13  ;;  %655 = vmatpush.msrb.mxu1 %v5076_v12 }
 0x1bf   :  { %745 = vmatpush.msrb.mxu2 %v5152_v61  ;;  %765 = vmatpush.msrb.mxu3 %v5154_v62 }
 0x1c0   :  { %636 = vmatpush.msrb.mxu0 %v5084_v15  ;;  %656 = vmatpush.msrb.mxu1 %v5082_v14 }
 0x1c1   :  { %746 = vmatpush.msrb.mxu2 %v5166_v19  ;;  %766 = vmatpush.msrb.mxu3 %v5168_v20 }
 0x22d   :  { %v296_v33 = vpop.f32.mrf.mxu0  ;;  %v316_v14 = vpop.f32.mrf.mxu1 }
 0x22e   :  { %v297_v34 = vadd.f32 %v296_v33, %v253_v29  ;;  %v317_v29 = vadd.f32 %v316_v14, %v273_v28  ;;  %v5294_v33 = vperm.slane %v123_v27, 1 }
 0x230   :  { %v324_v35 = vadd.f32 %v5287_v32, %v297_v34  ;;  %6692 = vst [vmem:[#allocation21_spill] sm:$0xff] %v5294_v33 }
 0x232   :  { %v4135_v36 = vmul.f32 -1.442695, %v324_v35 }
 0x234   :  { %4323 = vpow2.f32 %v4135_v36  ;;  %v413_v37 = vpop.f32.mrf.mxu3  ;;  %v393_v60 = vpop.f32.mrf.mxu2  ;;  %v325_v36 = vadd.f32 %v5294_v33, %v317_v29 }
 0x235   :  { %v418_v57 = vrot.slane %v413_v37, 7 }
 0x237   :  { %v419_v24 = vsel %vm173_vm0, %v393_v60, %v418_v57 }
 0x238   :  { %v421_v16 = vadd.f32 %v4137_v38, %v419_v24 }
 0x23a   :  { %v4324_v26 = vpop.eup %4323  ;;  %v4140_v20 = vmul.f32 -1.442695, %v421_v16 }
 0x23b   :  { %v329_v19 = vadd.f32 1.0, %v4324_v26  ;;  %v442_v26 = vrot.slane %v421_v16, 1 }
 0x23c   :  { %4325 = vpow2.f32 %v4140_v20 }
 0x23d   :  { %4327 = vrcp.f32 %v329_v19  ;;  %v341_v57 = vand.u32 2147483648, %v329_v19  ;;  %v339_v60 = vand.u32 2147483647, %v329_v19  ;;  %vm335_vm11 = vweird.f32 %v329_v19 }
 0x23f   :  { %v342_v14 = vor.u32 1.1754944e-38, %v341_v57  ;;  %vm340_vm13 = vcmp.eq.f32.partialorder %v339_v60, 8.507059e+37 }
 0x242   :  { %v4326_v34 = vpop.eup %4325 }
 0x243   :  { %v4328_v35 = vpop.eup %4327  ;;  %v425_v32 = vadd.f32 1.0, %v4326_v34 }
 0x244   :  { %v331_v15 = vmul.f32 %v4328_v35, %v329_v19  ;;  %vm336_vm10 = vweird.f32 %v4328_v35 }
 0x245   :  { %4329 = vrcp.f32 %v425_v32  ;;  %vm337_vm12 = vmor %vm335_vm11, %vm336_vm10  ;;  %v437_v61 = vand.u32 2147483648, %v425_v32  ;;  %vm431_vm15 = vweird.f32 %v425_v32 }
 0x246   :  { %v332_v37 = vsub.f32 1.0, %v331_v15  ;;  %4331 = vtanh.f32 %v325_v36 }
 0x247   :  { %4333 = vtanh.f32 %v442_v26  ;;  %v438_v19 = vor.u32 1.1754944e-38, %v437_v61 }
 0x248   :  { %v333_v38 = vmul.f32 %v4328_v35, %v332_v37  ;;  %v435_v37 = vand.u32 2147483647, %v425_v32 }
 0x24a   :  { %v334_v24 = vadd.f32 %v4328_v35, %v333_v38  ;;  %vm436_vm2 = vcmp.eq.f32.partialorder %v435_v37, 8.507059e+37 }
 0x24b   :  { %v4330_v20 = vpop.eup %4329 }
 0x24c   :  { %v338_v27 = vsel %vm337_vm12, %v4328_v35, %v334_v24  ;;  %v427_v28 = vmul.f32 %v4330_v20, %v425_v32  ;;  %v4332_v62 = vpop.eup %4331  ;;  %vm432_vm14 = vweird.f32 %v4330_v20 }
 0x24d   :  { %v343_v29 = vsel %vm340_vm13, %v342_v14, %v338_v27  ;;  %vm433_vm1 = vmor %vm431_vm15, %vm432_vm14  ;;  %v4334_v35 = vpop.eup %4333 }
 0x24e   :  { %v366_v34 = vmul.f32 %v4332_v62, %v343_v29  ;;  %v428_v33 = vsub.f32 1.0, %v427_v28  ;;  %v4136_v62 = vmul.f32 -1.442695, %v325_v36  ;;  %v365_v28 = vmul.f32 0.0, %v343_v29 }
 0x250   :  { %368 = vrot.lane.b32.xlu2 %v366_v34, %s4991_s17  ;;  %v429_v15 = vmul.f32 %v4330_v20, %v428_v33  ;;  %4335 = vpow2.f32 %v4136_v62 }
 0x252   :  { %v430_v38 = vadd.f32 %v4330_v20, %v429_v15 }
 0x254   :  { %v434_v12 = vsel %vm433_vm1, %v4330_v20, %v430_v38 }
 0x255   :  { %v439_v57 = vsel %vm436_vm2, %v438_v19, %v434_v12 }
 0x256   :  { %v469_v60 = vmul.f32 %v4334_v35, %v439_v57  ;;  %v4336_v24 = vpop.eup %4335  ;;  %v468_v29 = vmul.f32 %v439_v57, %v5158_v63 }
 0x257   :  { %v349_v26 = vadd.f32 1.0, %v4336_v24 }
 0x258   :  { %471 = vrot.lane.b32.xlu1 %v469_v60, %s4991_s17  ;;  %445 = vrot.lane.b32.xlu2 %v421_v16, %s4991_s17 }
 0x259   :  { %4337 = vrcp.f32 %v349_v26  ;;  %v361_v12 = vand.u32 2147483648, %v349_v26  ;;  %vm355_vm4 = vweird.f32 %v349_v26  ;;  %v359_v16 = vand.u32 2147483647, %v349_v26 }
 0x25b   :  { %v362_v15 = vor.u32 1.1754944e-38, %v361_v12  ;;  %vm360_vm6 = vcmp.eq.f32.partialorder %v359_v16, 8.507059e+37 }
 0x25f   :  { %v4338_v33 = vpop.eup %4337 }
 0x260   :  { %v351_v14 = vmul.f32 %v4338_v33, %v349_v26  ;;  %vm356_vm3 = vweird.f32 %v4338_v33 }
 0x261   :  { %vm357_vm5 = vmor %vm355_vm4, %vm356_vm3 }
 0x262   :  { %v352_v27 = vsub.f32 1.0, %v351_v14 }
 0x264   :  { %v353_v32 = vmul.f32 %v4338_v33, %v352_v27 }
 0x266   :  { %v354_v34 = vadd.f32 %v4338_v33, %v353_v32 }
 0x268   :  { %v358_v36 = vsel %vm357_vm5, %v4338_v33, %v354_v34 }
 0x269   :  { %v363_v38 = vsel %vm360_vm6, %v362_v15, %v358_v36 }
 0x2aa   :  { %v369_v61 = vpop.permute.xlu2 %368 }
 0x2ab   :  { %v5300_v20 = vadd.f32 %v369_v61, %v365_v28 }
 0x2ad   :  { %4339 = vtanh.f32 %v5300_v20 }
 0x2b2   :  { %v446_v24 = vpop.permute.xlu2 %445 }
 0x2b3   :  { %v4340_v37 = vpop.eup %4339  ;;  %v447_v26 = vrot.slane %v446_v24, 1 }
 0x2b4   :  { %v373_v19 = vmul.f32 %v4340_v37, %v363_v38 }
 0x2b5   :  { %v4141_v33 = vmul.f32 -1.442695, %v447_v26 }
 0x2b6   :  { %482 = vrot.lane.b32.xlu1 %v373_v19, %s4991_s17 }
 0x2ca   :  { %v472_v35 = vpop.permute.xlu1 %471 }
 0x2cb   :  { %v5305_v60 = vadd.f32 %v472_v35, %v468_v29 }
 0x2cd   :  { %4341 = vtanh.f32 %v5305_v60 }
 0x2ce   :  { %4343 = vpow2.f32 %v4141_v33  ;;  %v6700_v33 = vld [vmem:[#allocation20_spill] sm:$0xff] }
 0x2d3   :  { %v4342_v62 = vpop.eup %4341 }
 0x2d4   :  { %477 = vrot.lane.b32.xlu0 %v4342_v62, %s4991_s17  ;;  %v4344_v14 = vpop.eup %4343 }
 0x2d5   :  { %v452_v27 = vadd.f32 1.0, %v4344_v14 }
 0x2d7   :  { %4345 = vrcp.f32 %v452_v27  ;;  %v464_v12 = vand.u32 2147483648, %v452_v27  ;;  %vm458_vm8 = vweird.f32 %v452_v27  ;;  %v462_v16 = vand.u32 2147483647, %v452_v27 }
 0x2d9   :  { %v465_v15 = vor.u32 1.1754944e-38, %v464_v12  ;;  %vm463_vm11 = vcmp.eq.f32.partialorder %v462_v16, 8.507059e+37 }
 0x2dd   :  { %v4346_v63 = vpop.eup %4345 }
 0x2de   :  { %v454_v57 = vmul.f32 %v4346_v63, %v452_v27  ;;  %vm459_vm7 = vweird.f32 %v4346_v63 }
 0x2df   :  { %vm460_vm10 = vmor %vm458_vm8, %vm459_vm7 }
 0x2e0   :  { %v455_v28 = vsub.f32 1.0, %v454_v57 }
 0x2e2   :  { %v456_v61 = vmul.f32 %v4346_v63, %v455_v28 }
 0x2e4   :  { %v457_v34 = vadd.f32 %v4346_v63, %v456_v61 }
 0x2e6   :  { %v461_v36 = vsel %vm460_vm10, %v4346_v63, %v457_v34 }
 0x2e7   :  { %v466_v38 = vsel %vm463_vm11, %v465_v15, %v461_v36 }
 0x328   :  { %v483_v32 = vpop.permute.xlu1 %482 }
 0x329   :  { %4142 = vmatmul.msk.f32.vlgmr.msra.gmra.mxu0 %vm126_vm9, %v483_v32  ;;  %4143 = vmatmul.msk.f32.vlgmr.msra.gmra.mxu1 %vm126_vm9, %v483_v32 }
 0x32a   :  { %782 = vmatpush.msra.mxu0 %v5122_v48  ;;  %802 = vmatpush.msra.mxu1 %v5124_v49 }
 0x32c   :  { %783 = vmatpush.msra.mxu0 %v5130_v51  ;;  %803 = vmatpush.msra.mxu1 %v5132_v52 }
 0x32e   :  { %784 = vmatpush.msra.mxu0 %v5136_v53  ;;  %804 = vmatpush.msra.mxu1 %v5138_v54 }
 0x330   :  { %785 = vmatpush.msra.mxu0 %v5148_v58  ;;  %805 = vmatpush.msra.mxu1 %v5150_v59 }
 0x332   :  { %786 = vmatpush.msra.mxu0 %v5162_v17  ;;  %806 = vmatpush.msra.mxu1 %v5164_v18 }
 0x334   :  { %787 = vmatpush.msra.mxu0 %v5181_v21  ;;  %807 = vmatpush.msra.mxu1 %v5183_v22 }
 0x336   :  { %788 = vmatpush.msra.mxu0 %v5189_v23  ;;  %808 = vmatpush.msra.mxu1 %v5193_v25 }
 0x338   :  { %789 = vmatpush.msra.mxu0 %v5224_v30  ;;  %809 = vmatpush.msra.mxu1 %v5226_v31 }
 0x346   :  { %v478_v37 = vpop.permute.xlu0 %477 }
 0x347   :  { %v480_v19 = vmul.f32 %v478_v37, %v466_v38  ;;  %v6701_v38 = vld [vmem:[#allocation21_spill] sm:$0xff] }
 0x349   :  { %4144 = vmatmul.msk.f32.vlgmr.msra.gmra.mxu2 %vm126_vm9, %v480_v19  ;;  %4145 = vmatmul.msk.f32.vlgmr.msra.gmra.mxu3 %vm126_vm9, %v480_v19 }
 0x34a   :  { %4149 = vmatmul.msk.f32.vlgmr.msrb.gmra.mxu0 %vm126_vm9, %v480_v19  ;;  %4150 = vmatmul.msk.f32.vlgmr.msrb.gmra.mxu1 %vm126_vm9, %v480_v19 }
 0x34b   :  { %874 = vmatpush.msra.mxu2 %v5044_v1  ;;  %894 = vmatpush.msra.mxu3 %v5042_v0  ;;  %v6693_v0 = vld [vmem:[#allocation13_spill] sm:$0xff]  ;;  %v6694_v1 = vld [vmem:[#allocation16_spill] sm:$0xff] }
 0x34c   :  { %984 = vmatpush.msrb.mxu0 %v5098_v39  ;;  %1004 = vmatpush.msrb.mxu1 %v5100_v40 }
 0x34d   :  { %875 = vmatpush.msra.mxu2 %v5050_v3  ;;  %895 = vmatpush.msra.mxu3 %v5046_v2  ;;  %v6695_v2 = vld [vmem:[#allocation17_spill] sm:$0xff]  ;;  %v6696_v3 = vld [vmem:[#allocation15_spill] sm:$0xff] }
 0x34e   :  { %985 = vmatpush.msrb.mxu0 %v5102_v41  ;;  %1005 = vmatpush.msrb.mxu1 %v5106_v42 }
 0x34f   :  { %876 = vmatpush.msra.mxu2 %v5054_v5  ;;  %896 = vmatpush.msra.mxu3 %v5052_v4  ;;  %v6697_v4 = vld [vmem:[#allocation14_spill] sm:$0xff] }
 0x350   :  { %986 = vmatpush.msrb.mxu0 %v5108_v43  ;;  %1006 = vmatpush.msrb.mxu1 %v5110_v44  ;;  %v6698_v5 = vld [vmem:[#allocation18_spill] sm:$0xff] }
 0x351   :  { %877 = vmatpush.msra.mxu2 %v5060_v7  ;;  %897 = vmatpush.msra.mxu3 %v5058_v6  ;;  %v6699_v6 = vld [vmem:[#allocation19_spill] sm:$0xff] }
 0x352   :  { %987 = vmatpush.msrb.mxu0 %v5114_v45  ;;  %1007 = vmatpush.msrb.mxu1 %v5116_v46 }
 0x353   :  { %878 = vmatpush.msra.mxu2 %v5066_v9  ;;  %898 = vmatpush.msra.mxu3 %v5064_v8 }
 0x354   :  { %988 = vmatpush.msrb.mxu0 %v5120_v47  ;;  %1008 = vmatpush.msrb.mxu1 %v5126_v50 }
 0x355   :  { %879 = vmatpush.msra.mxu2 %v5072_v11  ;;  %899 = vmatpush.msra.mxu3 %v5070_v10  ;;  %v4148_v11 = vld [vmem:[%s6615_s0 + $0x2] ss:$8 sm:$0x3] }
 0x356   :  { %989 = vmatpush.msrb.mxu0 %v5140_v55  ;;  %1009 = vmatpush.msrb.mxu1 %v5142_v56 }
 0x357   :  { %880 = vmatpush.msra.mxu2 %v5078_v13  ;;  %900 = vmatpush.msra.mxu3 %v6693_v0 }
 0x358   :  { %990 = vmatpush.msrb.mxu0 %v6694_v1  ;;  %1010 = vmatpush.msrb.mxu1 %v6695_v2 }
 0x359   :  { %881 = vmatpush.msra.mxu2 %v6696_v3  ;;  %901 = vmatpush.msra.mxu3 %v6697_v4 }
 0x35a   :  { %991 = vmatpush.msrb.mxu0 %v6698_v5  ;;  %1011 = vmatpush.msrb.mxu1 %v6699_v6 }
 0x3a6   :  { %v523_v7 = vpop.f32.mrf.mxu1  ;;  %v503_v8 = vpop.f32.mrf.mxu0 }
 0x3c7   :  { %v658_v9 = vpop.f32.mrf.mxu1  ;;  %v638_v13 = vpop.f32.mrf.mxu0 }
 0x3c8   :  { %v663_v10 = vrot.slane %v658_v9, 7 }
 0x3ca   :  { %v664_v29 = vsel %vm173_vm0, %v638_v13, %v663_v10 }
 0x3cb   :  { %v666_v35 = vadd.f32 %v4148_v11, %v664_v29 }
 0x3cc   :  { %v546_v62 = vpop.f32.mrf.mxu2  ;;  %v566_v61 = vpop.f32.mrf.mxu3 }
 0x3cd   :  { %v547_v24 = vadd.f32 %v546_v62, %v503_v8  ;;  %690 = vrot.lane.b32.xlu1 %v666_v35, %s4991_s17  ;;  %v4151_v26 = vmul.f32 -1.442695, %v666_v35  ;;  %v567_v12 = vadd.f32 %v566_v61, %v523_v7  ;;  %v687_v16 = vrot.slane %v666_v35, 1 }
 0x3cf   :  { %v569_v14 = vadd.f32 %v547_v24, %v6700_v33  ;;  %4347 = vpow2.f32 %v4151_v26  ;;  %v570_v19 = vadd.f32 %v567_v12, %v6701_v38 }
 0x3d1   :  { %v4146_v27 = vmul.f32 -1.442695, %v569_v14 }
 0x3d3   :  { %4349 = vpow2.f32 %v4146_v27 }
 0x3d5   :  { %v4348_v32 = vpop.eup %4347 }
 0x3d6   :  { %v670_v63 = vadd.f32 1.0, %v4348_v32 }
 0x3d8   :  { %4351 = vrcp.f32 %v670_v63  ;;  %v680_v0 = vand.u32 2147483647, %v670_v63  ;;  %v682_v3 = vand.u32 2147483648, %v670_v63  ;;  %vm676_vm13 = vweird.f32 %v670_v63 }
 0x3d9   :  { %v4350_v57 = vpop.eup %4349 }
 0x3da   :  { %v574_v28 = vadd.f32 1.0, %v4350_v57  ;;  %vm681_vm15 = vcmp.eq.f32.partialorder %v680_v0, 8.507059e+37  ;;  %v683_v11 = vor.u32 1.1754944e-38, %v682_v3 }
 0x3dc   :  { %4353 = vrcp.f32 %v574_v28  ;;  %v586_v7 = vand.u32 2147483648, %v574_v28  ;;  %v584_v35 = vand.u32 2147483647, %v574_v28  ;;  %vm580_vm2 = vweird.f32 %v574_v28 }
 0x3dd   :  { %4355 = vtanh.f32 %v687_v16 }
 0x3de   :  { %v4352_v34 = vpop.eup %4351  ;;  %4357 = vtanh.f32 %v570_v19  ;;  %v587_v27 = vor.u32 1.1754944e-38, %v586_v7  ;;  %vm585_vm4 = vcmp.eq.f32.partialorder %v584_v35, 8.507059e+37 }
 0x3df   :  { %v672_v36 = vmul.f32 %v4352_v34, %v670_v63  ;;  %vm677_vm12 = vweird.f32 %v4352_v34 }
 0x3e0   :  { %vm678_vm14 = vmor %vm676_vm13, %vm677_vm12 }
 0x3e1   :  { %v673_v15 = vsub.f32 1.0, %v672_v36 }
 0x3e2   :  { %v4354_v37 = vpop.eup %4353 }
 0x3e3   :  { %v674_v4 = vmul.f32 %v4352_v34, %v673_v15  ;;  %v576_v8 = vmul.f32 %v4354_v37, %v574_v28  ;;  %vm581_vm1 = vweird.f32 %v4354_v37  ;;  %v4356_v62 = vpop.eup %4355 }
 0x3e4   :  { %vm582_vm3 = vmor %vm580_vm2, %vm581_vm1  ;;  %v4358_v63 = vpop.eup %4357 }
 0x3e5   :  { %v675_v9 = vadd.f32 %v4352_v34, %v674_v4  ;;  %v577_v10 = vsub.f32 1.0, %v576_v8 }
 0x3e7   :  { %v679_v13 = vsel %vm678_vm14, %v4352_v34, %v675_v9  ;;  %v578_v29 = vmul.f32 %v4354_v37, %v577_v10  ;;  %v4147_v34 = vmul.f32 -1.442695, %v570_v19 }
 0x3e8   :  { %v684_v24 = vsel %vm681_vm15, %v683_v11, %v679_v13 }
 0x3e9   :  { %v714_v26 = vmul.f32 %v4356_v62, %v684_v24  ;;  %v579_v14 = vadd.f32 %v4354_v37, %v578_v29  ;;  %4359 = vpow2.f32 %v4147_v34 }
 0x3eb   :  { %716 = vrot.lane.b32.xlu0 %v714_v26, %s4991_s17  ;;  %v583_v32 = vsel %vm582_vm3, %v4354_v37, %v579_v14 }
 0x3ec   :  { %v588_v57 = vsel %vm585_vm4, %v587_v27, %v583_v32 }
 0x3ed   :  { %v611_v61 = vmul.f32 %v4358_v63, %v588_v57  ;;  %v610_v3 = vmul.f32 %v588_v57, %v5300_v20  ;;  %v713_v20 = vmul.f32 %v684_v24, %v5305_v60  ;;  %v5420_v57 = vld [vmem:[#allocation3 + $0x50] sm:$0xff] }
 0x3ef   :  { %613 = vrot.lane.b32.xlu2 %v611_v61, %s4991_s17  ;;  %v4360_v12 = vpop.eup %4359  ;;  %v5423_v61 = vld [vmem:[#allocation3 + $0x58] sm:$0xff] }
 0x3f0   :  { %v594_v16 = vadd.f32 1.0, %v4360_v12 }
 0x3f2   :  { %4361 = vrcp.f32 %v594_v16  ;;  %v606_v9 = vand.u32 2147483648, %v594_v16  ;;  %vm600_vm6 = vweird.f32 %v594_v16  ;;  %v604_v19 = vand.u32 2147483647, %v594_v16 }
 0x3f4   :  { %v607_v11 = vor.u32 1.1754944e-38, %v606_v9  ;;  %vm605_vm8 = vcmp.eq.f32.partialorder %v604_v19, 8.507059e+37 }
 0x3f8   :  { %v4362_v36 = vpop.eup %4361 }
 0x3f9   :  { %v596_v15 = vmul.f32 %v4362_v36, %v594_v16  ;;  %vm601_vm5 = vweird.f32 %v4362_v36 }
 0x3fa   :  { %vm602_vm7 = vmor %vm600_vm6, %vm601_vm5 }
 0x3fb   :  { %v597_v0 = vsub.f32 1.0, %v596_v15  ;;  %v4159_v15 = vld [vmem:[%s6615_s0 + $0x3] ss:$8 sm:$0x3] }
 0x3fd   :  { %v598_v28 = vmul.f32 %v4362_v36, %v597_v0 }
 0x3ff   :  { %v599_v37 = vadd.f32 %v4362_v36, %v598_v28 }
 0x401   :  { %v603_v10 = vsel %vm602_vm7, %v4362_v36, %v599_v37 }
 0x402   :  { %v608_v13 = vsel %vm605_vm8, %v607_v11, %v603_v10 }
 0x43f   :  { %v691_v14 = vpop.permute.xlu1 %690 }
 0x440   :  { %v692_v27 = vrot.slane %v691_v14, 1 }
 0x442   :  { %v4152_v32 = vmul.f32 -1.442695, %v692_v27 }
 0x449   :  { %v614_v4 = vpop.permute.xlu2 %613 }
 0x44a   :  { %v5373_v8 = vadd.f32 %v614_v4, %v610_v3 }
 0x44c   :  { %4363 = vtanh.f32 %v5373_v8 }
 0x452   :  { %v4364_v7 = vpop.eup %4363 }
 0x453   :  { %v618_v29 = vmul.f32 %v4364_v7, %v608_v13 }
 0x455   :  { %727 = vrot.lane.b32.xlu2 %v618_v29, %s4991_s17 }
 0x45d   :  { %v717_v35 = vpop.permute.xlu0 %716 }
 0x45e   :  { %v5378_v62 = vadd.f32 %v717_v35, %v713_v20 }
 0x460   :  { %4365 = vtanh.f32 %v5378_v62 }
 0x461   :  { %4367 = vpow2.f32 %v4152_v32 }
 0x466   :  { %v4366_v26 = vpop.eup %4365 }
 0x467   :  { %722 = vrot.lane.b32.xlu0 %v4366_v26, %s4991_s17  ;;  %v4368_v60 = vpop.eup %4367 }
 0x468   :  { %v697_v24 = vadd.f32 1.0, %v4368_v60 }
 0x46a   :  { %4369 = vrcp.f32 %v697_v24  ;;  %vm703_vm11 = vweird.f32 %v697_v24 }
 0x4af   :  { %v728_v63 = vpop.permute.xlu2 %727 }
 0x4b0   :  { %4153 = vmatmul.msk.f32.vlgmr.msrb.gmra.mxu2 %vm126_vm9, %v728_v63  ;;  %4154 = vmatmul.msk.f32.vlgmr.msrb.gmra.mxu3 %vm126_vm9, %v728_v63 }
 0x4b1   :  { %1027 = vmatpush.msrb.mxu2 %v5122_v48  ;;  %1047 = vmatpush.msrb.mxu3 %v5124_v49  ;;  %v4370_v48 = vpop.eup %4369 }
 0x4b2   :  { %v699_v49 = vmul.f32 %v4370_v48, %v697_v24  ;;  %vm704_vm10 = vweird.f32 %v4370_v48 }
 0x4b3   :  { %1028 = vmatpush.msrb.mxu2 %v5130_v51  ;;  %1048 = vmatpush.msrb.mxu3 %v5132_v52  ;;  %vm705_vm12 = vmor %vm703_vm11, %vm704_vm10 }
 0x4b4   :  { %v700_v51 = vsub.f32 1.0, %v699_v49 }
 0x4b5   :  { %1029 = vmatpush.msrb.mxu2 %v5136_v53  ;;  %1049 = vmatpush.msrb.mxu3 %v5138_v54  ;;  %v709_v54 = vand.u32 2147483648, %v697_v24 }
 0x4b6   :  { %v701_v52 = vmul.f32 %v4370_v48, %v700_v51 }
 0x4b7   :  { %1030 = vmatpush.msrb.mxu2 %v5148_v58  ;;  %1050 = vmatpush.msrb.mxu3 %v5150_v59  ;;  %v707_v58 = vand.u32 2147483647, %v697_v24 }
 0x4b8   :  { %v702_v53 = vadd.f32 %v4370_v48, %v701_v52 }
 0x4b9   :  { %1031 = vmatpush.msrb.mxu2 %v5162_v17  ;;  %1051 = vmatpush.msrb.mxu3 %v5164_v18  ;;  %v710_v17 = vor.u32 1.1754944e-38, %v709_v54  ;;  %vm708_vm13 = vcmp.eq.f32.partialorder %v707_v58, 8.507059e+37 }
 0x4ba   :  { %v706_v59 = vsel %vm705_vm12, %v4370_v48, %v702_v53 }
 0x4bb   :  { %1032 = vmatpush.msrb.mxu2 %v5181_v21  ;;  %1052 = vmatpush.msrb.mxu3 %v5183_v22  ;;  %v711_v18 = vsel %vm708_vm13, %v710_v17, %v706_v59 }
 0x4bd   :  { %1033 = vmatpush.msrb.mxu2 %v5189_v23  ;;  %1053 = vmatpush.msrb.mxu3 %v5193_v25  ;;  %v5404_v23 = vld [vmem:[#allocation3 + $0x70] sm:$0xff]  ;;  %v5407_v25 = vld [vmem:[#allocation3 + $0x78] sm:$0xff] }
 0x4bf   :  { %1034 = vmatpush.msrb.mxu2 %v5224_v30  ;;  %1054 = vmatpush.msrb.mxu3 %v5226_v31  ;;  %v5412_v30 = vld [vmem:[#allocation3 + $0x60] sm:$0xff]  ;;  %v5415_v31 = vld [vmem:[#allocation3 + $0x68] sm:$0xff] }
 0x4d9   :  { %v723_v21 = vpop.permute.xlu0 %722 }
 0x4da   :  { %v725_v22 = vmul.f32 %v723_v21, %v711_v18 }
 0x4dc   :  { %4155 = vmatmul.msk.f32.vlgmr.msra.gmra.mxu0 %vm126_vm9, %v725_v22  ;;  %4156 = vmatmul.msk.f32.vlgmr.msra.gmra.mxu1 %vm126_vm9, %v725_v22 }
 0x4dd   :  { %4160 = vmatmul.msk.f32.vlgmr.msra.gmra.mxu2 %vm126_vm9, %v725_v22  ;;  %4161 = vmatmul.msk.f32.vlgmr.msra.gmra.mxu3 %vm126_vm9, %v725_v22 }
 0x4de   :  { %1119 = vmatpush.msra.mxu0 %v5404_v23  ;;  %1139 = vmatpush.msra.mxu1 %v5407_v25 }
 0x4df   :  { %1229 = vmatpush.msra.mxu2 %v5098_v39  ;;  %1249 = vmatpush.msra.mxu3 %v5100_v40  ;;  %v5428_v39 = vld [vmem:[#allocation3 + $0x40] sm:$0xff]  ;;  %v5431_v40 = vld [vmem:[#allocation3 + $0x48] sm:$0xff] }
 0x4e0   :  { %1120 = vmatpush.msra.mxu0 %v5412_v30  ;;  %1140 = vmatpush.msra.mxu1 %v5415_v31 }
 0x4e1   :  { %1230 = vmatpush.msra.mxu2 %v5102_v41  ;;  %1250 = vmatpush.msra.mxu3 %v5106_v42  ;;  %v5436_v41 = vld [vmem:[#allocation3 + $0x30] sm:$0xff]  ;;  %v5439_v42 = vld [vmem:[#allocation3 + $0x38] sm:$0xff] }
 0x4e2   :  { %1121 = vmatpush.msra.mxu0 %v5420_v57  ;;  %1141 = vmatpush.msra.mxu1 %v5423_v61 }
 0x4e3   :  { %1231 = vmatpush.msra.mxu2 %v5108_v43  ;;  %1251 = vmatpush.msra.mxu3 %v5110_v44  ;;  %v5444_v43 = vld [vmem:[#allocation3 + $0x20] sm:$0xff]  ;;  %v5447_v44 = vld [vmem:[#allocation3 + $0x28] sm:$0xff] }
 0x4e4   :  { %1122 = vmatpush.msra.mxu0 %v5428_v39  ;;  %1142 = vmatpush.msra.mxu1 %v5431_v40 }
 0x4e5   :  { %1232 = vmatpush.msra.mxu2 %v5114_v45  ;;  %1252 = vmatpush.msra.mxu3 %v5116_v46  ;;  %v5452_v45 = vld [vmem:[#allocation3 + $0x10] sm:$0xff]  ;;  %v5455_v46 = vld [vmem:[#allocation3 + $0x18] sm:$0xff] }
 0x4e6   :  { %1123 = vmatpush.msra.mxu0 %v5436_v41  ;;  %1143 = vmatpush.msra.mxu1 %v5439_v42 }
 0x4e7   :  { %1233 = vmatpush.msra.mxu2 %v5120_v47  ;;  %1253 = vmatpush.msra.mxu3 %v5126_v50  ;;  %v5460_v47 = vld [vmem:[#allocation3] sm:$0xff]  ;;  %v5463_v50 = vld [vmem:[#allocation3 + $0x8] sm:$0xff] }
 0x4e8   :  { %1124 = vmatpush.msra.mxu0 %v5444_v43  ;;  %1144 = vmatpush.msra.mxu1 %v5447_v44 }
 0x4e9   :  { %1234 = vmatpush.msra.mxu2 %v5140_v55  ;;  %1254 = vmatpush.msra.mxu3 %v5142_v56 }
 0x4ea   :  { %1125 = vmatpush.msra.mxu0 %v5452_v45  ;;  %1145 = vmatpush.msra.mxu1 %v5455_v46 }
 0x4eb   :  { %1235 = vmatpush.msra.mxu2 %v6694_v1  ;;  %1255 = vmatpush.msra.mxu3 %v6695_v2 }
 0x4ec   :  { %1126 = vmatpush.msra.mxu0 %v5460_v47  ;;  %1146 = vmatpush.msra.mxu1 %v5463_v50 }
 0x4ed   :  { %1236 = vmatpush.msra.mxu2 %v6698_v5  ;;  %1256 = vmatpush.msra.mxu3 %v6699_v6 }
 0x533   :  { %v768_v55 = vpop.f32.mrf.mxu3  ;;  %v748_v56 = vpop.f32.mrf.mxu2 }
 0x559   :  { %v791_v34 = vpop.f32.mrf.mxu0  ;;  %v811_v37 = vpop.f32.mrf.mxu1 }
 0x55a   :  { %v792_v12 = vadd.f32 %v791_v34, %v748_v56  ;;  %v812_v9 = vadd.f32 %v811_v37, %v768_v55 }
 0x55c   :  { %v814_v1 = vadd.f32 %v792_v12, %v6700_v33  ;;  %v815_v11 = vadd.f32 %v812_v9, %v6701_v38 }
 0x55e   :  { %v4157_v16 = vmul.f32 -1.442695, %v814_v1  ;;  %v4158_v56 = vmul.f32 -1.442695, %v815_v11 }
 0x560   :  { %4371 = vpow2.f32 %v4157_v16  ;;  %v903_v2 = vpop.f32.mrf.mxu3  ;;  %v883_v0 = vpop.f32.mrf.mxu2 }
 0x561   :  { %v908_v36 = vrot.slane %v903_v2, 7 }
 0x563   :  { %v909_v28 = vsel %vm173_vm0, %v883_v0, %v908_v36 }
 0x564   :  { %v911_v5 = vadd.f32 %v4159_v15, %v909_v28 }
 0x566   :  { %v4372_v3 = vpop.eup %4371  ;;  %935 = vrot.lane.b32.xlu0 %v911_v5, %s4991_s17  ;;  %v4162_v6 = vmul.f32 -1.442695, %v911_v5  ;;  %v932_v32 = vrot.slane %v911_v5, 1 }
 0x567   :  { %v819_v4 = vadd.f32 1.0, %v4372_v3 }
 0x568   :  { %4373 = vpow2.f32 %v4162_v6 }
 0x569   :  { %4375 = vrcp.f32 %v819_v4  ;;  %v831_v20 = vand.u32 2147483648, %v819_v4  ;;  %v829_v26 = vand.u32 2147483647, %v819_v4  ;;  %vm825_vm15 = vweird.f32 %v819_v4 }
 0x56b   :  { %v832_v63 = vor.u32 1.1754944e-38, %v831_v20  ;;  %vm830_vm2 = vcmp.eq.f32.partialorder %v829_v26, 8.507059e+37  ;;  %v5492_v26 = vld [vmem:[#allocation6 + $0x78] sm:$0xff] }
 0x56e   :  { %v4374_v19 = vpop.eup %4373 }
 0x56f   :  { %v4376_v10 = vpop.eup %4375  ;;  %v915_v7 = vadd.f32 1.0, %v4374_v19 }
 0x570   :  { %v821_v13 = vmul.f32 %v4376_v10, %v819_v4  ;;  %vm826_vm14 = vweird.f32 %v4376_v10 }
 0x571   :  { %4377 = vrcp.f32 %v915_v7  ;;  %vm827_vm1 = vmor %vm825_vm15, %vm826_vm14  ;;  %v927_v53 = vand.u32 2147483648, %v915_v7  ;;  %v925_v58 = vand.u32 2147483647, %v915_v7  ;;  %vm921_vm4 = vweird.f32 %v915_v7 }
 0x572   :  { %v822_v29 = vsub.f32 1.0, %v821_v13  ;;  %4379 = vtanh.f32 %v815_v11 }
 0x573   :  { %4381 = vtanh.f32 %v932_v32  ;;  %v928_v17 = vor.u32 1.1754944e-38, %v927_v53  ;;  %vm926_vm6 = vcmp.eq.f32.partialorder %v925_v58, 8.507059e+37  ;;  %v5501_v32 = vld [vmem:[#allocation6 + $0x50] sm:$0xff]  ;;  %v5522_v53 = vld [vmem:[#allocation6 + $0x28] sm:$0xff]  ;;  %v5528_v58 = vld [vmem:[#allocation6 + $0x18] sm:$0xff] }
 0x574   :  { %v823_v35 = vmul.f32 %v4376_v10, %v822_v29  ;;  %4383 = vpow2.f32 %v4158_v56 }
 0x576   :  { %v824_v14 = vadd.f32 %v4376_v10, %v823_v35  ;;  %v5489_v35 = vld [vmem:[#allocation6 + $0x70] sm:$0xff] }
 0x577   :  { %v4378_v27 = vpop.eup %4377 }
 0x578   :  { %v828_v60 = vsel %vm827_vm1, %v4376_v10, %v824_v14  ;;  %v917_v24 = vmul.f32 %v4378_v27, %v915_v7  ;;  %v4380_v48 = vpop.eup %4379  ;;  %vm922_vm3 = vweird.f32 %v4378_v27  ;;  %v5498_v14 = vld [vmem:[#allocation6 + $0x68] sm:$0xff] }
 0x579   :  { %v833_v49 = vsel %vm830_vm2, %v832_v63, %v828_v60  ;;  %vm923_vm5 = vmor %vm921_vm4, %vm922_vm3  ;;  %v4382_v21 = vpop.eup %4381  ;;  %v5504_v63 = vld [vmem:[#allocation6 + $0x58] sm:$0xff]  ;;  %v5507_v60 = vld [vmem:[#allocation6 + $0x40] sm:$0xff] }
 0x57a   :  { %v856_v51 = vmul.f32 %v4380_v48, %v833_v49  ;;  %v918_v52 = vsub.f32 1.0, %v917_v24  ;;  %v4384_v34 = vpop.eup %4383  ;;  %v855_v15 = vmul.f32 %v833_v49, %v5373_v8  ;;  %v5510_v24 = vld [vmem:[#allocation6 + $0x48] sm:$0xff]  ;;  %v5513_v49 = vld [vmem:[#allocation6 + $0x30] sm:$0xff] }
 0x57b   :  { %v839_v12 = vadd.f32 1.0, %v4384_v34 }
 0x57c   :  { %858 = vrot.lane.b32.xlu2 %v856_v51, %s4991_s17  ;;  %v919_v54 = vmul.f32 %v4378_v27, %v918_v52  ;;  %v5516_v51 = vld [vmem:[#allocation6 + $0x38] sm:$0xff]  ;;  %v5519_v52 = vld [vmem:[#allocation6 + $0x20] sm:$0xff] }
 0x57d   :  { %4385 = vrcp.f32 %v839_v12  ;;  %v851_v3 = vand.u32 2147483648, %v839_v12  ;;  %vm845_vm8 = vweird.f32 %v839_v12  ;;  %v849_v6 = vand.u32 2147483647, %v839_v12 }
 0x57e   :  { %v920_v59 = vadd.f32 %v4378_v27, %v919_v54  ;;  %v5525_v54 = vld [vmem:[#allocation6 + $0x10] sm:$0xff] }
 0x57f   :  { %v852_v37 = vor.u32 1.1754944e-38, %v851_v3  ;;  %vm850_vm11 = vcmp.eq.f32.partialorder %v849_v6, 8.507059e+37  ;;  %v5543_v3 = vld [vmem:[#allocation8 + $0x70] sm:$0xff]  ;;  %v5546_v6 = vld [vmem:[#allocation8 + $0x78] sm:$0xff] }
 0x580   :  { %v924_v18 = vsel %vm923_vm5, %v4378_v27, %v920_v59  ;;  %v5531_v59 = vld [vmem:[#allocation6] sm:$0xff] }
 0x581   :  { %v929_v22 = vsel %vm926_vm6, %v928_v17, %v924_v18  ;;  %v5534_v17 = vld [vmem:[#allocation6 + $0x8] sm:$0xff] }
 0x582   :  { %v959_v55 = vmul.f32 %v4382_v21, %v929_v22  ;;  %v958_v8 = vmul.f32 %v929_v22, %v5378_v62  ;;  %v5495_v62 = vld [vmem:[#allocation6 + $0x60] sm:$0xff] }
 0x583   :  { %v4386_v1 = vpop.eup %4385 }
 0x584   :  { %961 = vrot.lane.b32.xlu1 %v959_v55, %s4991_s17  ;;  %v841_v16 = vmul.f32 %v4386_v1, %v839_v12  ;;  %vm846_vm7 = vweird.f32 %v4386_v1 }
 0x585   :  { %vm847_vm10 = vmor %vm845_vm8, %vm846_vm7 }
 0x586   :  { %v842_v2 = vsub.f32 1.0, %v841_v16 }
 0x588   :  { %v843_v36 = vmul.f32 %v4386_v1, %v842_v2 }
 0x58a   :  { %v844_v5 = vadd.f32 %v4386_v1, %v843_v36 }
 0x58c   :  { %v848_v4 = vsel %vm847_vm10, %v4386_v1, %v844_v5 }
 0x58d   :  { %v853_v19 = vsel %vm850_vm11, %v852_v37, %v848_v4  ;;  %v5551_v4 = vld [vmem:[#allocation8 + $0x60] sm:$0xff]  ;;  %v5554_v37 = vld [vmem:[#allocation8 + $0x68] sm:$0xff] }
 0x5d6   :  { %v859_v0 = vpop.permute.xlu2 %858 }
 0x5d7   :  { %v5478_v28 = vadd.f32 %v859_v0, %v855_v15 }
 0x5d8   :  { %v936_v20 = vpop.permute.xlu0 %935 }
 0x5d9   :  { %4387 = vtanh.f32 %v5478_v28  ;;  %v937_v27 = vrot.slane %v936_v20, 1  ;;  %v5586_v20 = vld [vmem:[#allocation8 + $0x28] sm:$0xff] }
 0x5da   :  { %6704 = vst [vmem:[#allocation17_spill] sm:$0xff] %v5586_v20 }
 0x5db   :  { %v4163_v48 = vmul.f32 -1.442695, %v937_v27  ;;  %v5591_v27 = vld [vmem:[#allocation8 + $0x10] sm:$0xff] }
 0x5dc   :  { %6705 = vst [vmem:[#allocation15_spill] sm:$0xff] %v5591_v27 }
 0x5df   :  { %v4388_v9 = vpop.eup %4387 }
 0x5e0   :  { %v863_v10 = vmul.f32 %v4388_v9, %v853_v19  ;;  %v5559_v9 = vld [vmem:[#allocation8 + $0x50] sm:$0xff]  ;;  %v5562_v19 = vld [vmem:[#allocation8 + $0x58] sm:$0xff] }
 0x5e2   :  { %972 = vrot.lane.b32.xlu2 %v863_v10, %s4991_s17  ;;  %v5567_v10 = vld [vmem:[#allocation8 + $0x40] sm:$0xff] }
 0x5f6   :  { %v962_v11 = vpop.permute.xlu1 %961 }
 0x5f7   :  { %v5483_v7 = vadd.f32 %v962_v11, %v958_v8  ;;  %v5570_v8 = vld [vmem:[#allocation8 + $0x48] sm:$0xff]  ;;  %v5575_v11 = vld [vmem:[#allocation8 + $0x30] sm:$0xff] }
 0x5f9   :  { %4389 = vtanh.f32 %v5483_v7 }
 0x5fa   :  { %4391 = vpow2.f32 %v4163_v48  ;;  %v5594_v48 = vld [vmem:[#allocation8 + $0x18] sm:$0xff] }
 0x5fb   :  { %6706 = vst [vmem:[#allocation14_spill] sm:$0xff] %v5594_v48 }
 0x5ff   :  { %v4390_v13 = vpop.eup %4389 }
 0x600   :  { %967 = vrot.lane.b32.xlu1 %v4390_v13, %s4991_s17  ;;  %v4392_v18 = vpop.eup %4391  ;;  %v5578_v13 = vld [vmem:[#allocation8 + $0x38] sm:$0xff] }
 0x601   :  { %v942_v21 = vadd.f32 1.0, %v4392_v18  ;;  %6702 = vst [vmem:[#allocation13_spill] sm:$0xff] %v5578_v13  ;;  %v5599_v18 = vld [vmem:[#allocation8] sm:$0xff] }
 0x602   :  { %6707 = vst [vmem:[#allocation18_spill] sm:$0xff] %v5599_v18 }
 0x603   :  { %4393 = vrcp.f32 %v942_v21  ;;  %v954_v1 = vand.u32 2147483648, %v942_v21  ;;  %vm948_vm13 = vweird.f32 %v942_v21  ;;  %v952_v16 = vand.u32 2147483647, %v942_v21 }
 0x605   :  { %v955_v36 = vor.u32 1.1754944e-38, %v954_v1  ;;  %vm953_vm15 = vcmp.eq.f32.partialorder %v952_v16, 8.507059e+37 }
 0x609   :  { %v4394_v22 = vpop.eup %4393 }
 0x60a   :  { %v944_v55 = vmul.f32 %v4394_v22, %v942_v21  ;;  %vm949_vm12 = vweird.f32 %v4394_v22  ;;  %v5602_v21 = vld [vmem:[#allocation8 + $0x8] sm:$0xff] }
 0x60b   :  { %vm950_vm14 = vmor %vm948_vm13, %vm949_vm12  ;;  %6708 = vst [vmem:[#allocation19_spill] sm:$0xff] %v5602_v21 }
 0x60c   :  { %v945_v56 = vsub.f32 1.0, %v944_v55 }
 0x60e   :  { %v946_v34 = vmul.f32 %v4394_v22, %v945_v56 }
 0x610   :  { %v947_v12 = vadd.f32 %v4394_v22, %v946_v34 }
 0x612   :  { %v951_v2 = vsel %vm950_vm14, %v4394_v22, %v947_v12  ;;  %v4170_v12 = vld [vmem:[%s6615_s0 + $0x4] ss:$8 sm:$0x3] }
 0x613   :  { %v956_v15 = vsel %vm953_vm15, %v955_v36, %v951_v2 }
 0x63c   :  { %v973_v29 = vpop.permute.xlu2 %972 }
 0x63d   :  { %4164 = vmatmul.msk.f32.vlgmr.msrb.gmra.mxu0 %vm126_vm9, %v973_v29  ;;  %4165 = vmatmul.msk.f32.vlgmr.msrb.gmra.mxu1 %vm126_vm9, %v973_v29  ;;  %v5583_v29 = vld [vmem:[#allocation8 + $0x20] sm:$0xff] }
 0x63e   :  { %1272 = vmatpush.msrb.mxu0 %v5489_v35  ;;  %1292 = vmatpush.msrb.mxu1 %v5492_v26  ;;  %6703 = vst [vmem:[#allocation16_spill] sm:$0xff] %v5583_v29 }
 0x640   :  { %1273 = vmatpush.msrb.mxu0 %v5495_v62  ;;  %1293 = vmatpush.msrb.mxu1 %v5498_v14 }
 0x642   :  { %1274 = vmatpush.msrb.mxu0 %v5501_v32  ;;  %1294 = vmatpush.msrb.mxu1 %v5504_v63 }
 0x644   :  { %1275 = vmatpush.msrb.mxu0 %v5507_v60  ;;  %1295 = vmatpush.msrb.mxu1 %v5510_v24 }
 0x646   :  { %1276 = vmatpush.msrb.mxu0 %v5513_v49  ;;  %1296 = vmatpush.msrb.mxu1 %v5516_v51 }
 0x648   :  { %1277 = vmatpush.msrb.mxu0 %v5519_v52  ;;  %1297 = vmatpush.msrb.mxu1 %v5522_v53 }
 0x64a   :  { %1278 = vmatpush.msrb.mxu0 %v5525_v54  ;;  %1298 = vmatpush.msrb.mxu1 %v5528_v58 }
 0x64c   :  { %1279 = vmatpush.msrb.mxu0 %v5531_v59  ;;  %1299 = vmatpush.msrb.mxu1 %v5534_v17 }
 0x672   :  { %v968_v0 = vpop.permute.xlu1 %967 }
 0x673   :  { %v970_v5 = vmul.f32 %v968_v0, %v956_v15 }
 0x675   :  { %4166 = vmatmul.msk.f32.vlgmr.msrb.gmra.mxu2 %vm126_vm9, %v970_v5  ;;  %4167 = vmatmul.msk.f32.vlgmr.msrb.gmra.mxu3 %vm126_vm9, %v970_v5 }
 0x676   :  { %4171 = vmatmul.msk.f32.vlgmr.msra.gmra.mxu0 %vm126_vm9, %v970_v5  ;;  %4172 = vmatmul.msk.f32.vlgmr.msra.gmra.mxu1 %vm126_vm9, %v970_v5 }
 0x677   :  { %1364 = vmatpush.msrb.mxu2 %v5404_v23  ;;  %1384 = vmatpush.msrb.mxu3 %v5407_v25 }
 0x678   :  { %1474 = vmatpush.msra.mxu0 %v5543_v3  ;;  %1494 = vmatpush.msra.mxu1 %v5546_v6 }
 0x679   :  { %1365 = vmatpush.msrb.mxu2 %v5412_v30  ;;  %1385 = vmatpush.msrb.mxu3 %v5415_v31 }
 0x67a   :  { %1475 = vmatpush.msra.mxu0 %v5551_v4  ;;  %1495 = vmatpush.msra.mxu1 %v5554_v37 }
 0x67b   :  { %1366 = vmatpush.msrb.mxu2 %v5420_v57  ;;  %1386 = vmatpush.msrb.mxu3 %v5423_v61 }
 0x67c   :  { %1476 = vmatpush.msra.mxu0 %v5559_v9  ;;  %1496 = vmatpush.msra.mxu1 %v5562_v19 }
 0x67d   :  { %1367 = vmatpush.msrb.mxu2 %v5428_v39  ;;  %1387 = vmatpush.msrb.mxu3 %v5431_v40 }
 0x67e   :  { %1477 = vmatpush.msra.mxu0 %v5567_v10  ;;  %1497 = vmatpush.msra.mxu1 %v5570_v8 }
 0x67f   :  { %1368 = vmatpush.msrb.mxu2 %v5436_v41  ;;  %1388 = vmatpush.msrb.mxu3 %v5439_v42 }
 0x680   :  { %1478 = vmatpush.msra.mxu0 %v5575_v11  ;;  %1498 = vmatpush.msra.mxu1 %v5578_v13 }
 0x681   :  { %1369 = vmatpush.msrb.mxu2 %v5444_v43  ;;  %1389 = vmatpush.msrb.mxu3 %v5447_v44 }
 0x682   :  { %1479 = vmatpush.msra.mxu0 %v5583_v29  ;;  %1499 = vmatpush.msra.mxu1 %v5586_v20 }
 0x683   :  { %1370 = vmatpush.msrb.mxu2 %v5452_v45  ;;  %1390 = vmatpush.msrb.mxu3 %v5455_v46 }
 0x684   :  { %1480 = vmatpush.msra.mxu0 %v5591_v27  ;;  %1500 = vmatpush.msra.mxu1 %v5594_v48 }
 0x685   :  { %1371 = vmatpush.msrb.mxu2 %v5460_v47  ;;  %1391 = vmatpush.msrb.mxu3 %v5463_v50 }
 0x686   :  { %1481 = vmatpush.msra.mxu0 %v5599_v18  ;;  %1501 = vmatpush.msra.mxu1 %v5602_v21 }
 0x6ba   :  { %v1013_v22 = vpop.f32.mrf.mxu1  ;;  %v993_v55 = vpop.f32.mrf.mxu0 }
 0x6f3   :  { %v1148_v56 = vpop.f32.mrf.mxu1  ;;  %v1128_v1 = vpop.f32.mrf.mxu0 }
 0x6f4   :  { %v1153_v34 = vrot.slane %v1148_v56, 7 }
 0x6f6   :  { %v1154_v16 = vsel %vm173_vm0, %v1128_v1, %v1153_v34 }
 0x6f7   :  { %v1156_v2 = vadd.f32 %v4170_v12, %v1154_v16 }
 0x6f8   :  { %v1036_v36 = vpop.f32.mrf.mxu2  ;;  %v1056_v20 = vpop.f32.mrf.mxu3 }
 0x6f9   :  { %v1037_v15 = vadd.f32 %v1036_v36, %v993_v55  ;;  %1180 = vrot.lane.b32.xlu2 %v1156_v2, %s4991_s17  ;;  %v4173_v0 = vmul.f32 -1.442695, %v1156_v2  ;;  %v1057_v34 = vadd.f32 %v1056_v20, %v1013_v22  ;;  %v1177_v12 = vrot.slane %v1156_v2, 1 }
 0x6fb   :  { %v1059_v5 = vadd.f32 %v1037_v15, %v6700_v33  ;;  %4395 = vpow2.f32 %v4173_v0  ;;  %v1060_v36 = vadd.f32 %v1057_v34, %v6701_v38 }
 0x6fd   :  { %v4168_v21 = vmul.f32 -1.442695, %v1059_v5 }
 0x6ff   :  { %4397 = vpow2.f32 %v4168_v21 }
 0x701   :  { %v4396_v18 = vpop.eup %4395 }
 0x702   :  { %v1160_v56 = vadd.f32 1.0, %v4396_v18 }
 0x704   :  { %4399 = vrcp.f32 %v1160_v56  ;;  %v1170_v15 = vand.u32 2147483647, %v1160_v56  ;;  %v1172_v0 = vand.u32 2147483648, %v1160_v56  ;;  %vm1166_vm2 = vweird.f32 %v1160_v56 }
 0x705   :  { %v4398_v48 = vpop.eup %4397 }
 0x706   :  { %v1064_v27 = vadd.f32 1.0, %v4398_v48  ;;  %vm1171_vm4 = vcmp.eq.f32.partialorder %v1170_v15, 8.507059e+37  ;;  %v1173_v48 = vor.u32 1.1754944e-38, %v1172_v0 }
 0x708   :  { %4401 = vrcp.f32 %v1064_v27  ;;  %v1076_v20 = vand.u32 2147483648, %v1064_v27  ;;  %vm1070_vm6 = vweird.f32 %v1064_v27 }
 0x709   :  { %4403 = vtanh.f32 %v1177_v12 }
 0x70a   :  { %v4400_v29 = vpop.eup %4399  ;;  %4405 = vtanh.f32 %v1060_v36 }
 0x70b   :  { %v1162_v1 = vmul.f32 %v4400_v29, %v1160_v56  ;;  %vm1167_vm1 = vweird.f32 %v4400_v29 }
 0x70c   :  { %vm1168_vm3 = vmor %vm1166_vm2, %vm1167_vm1 }
 0x70d   :  { %v1163_v55 = vsub.f32 1.0, %v1162_v1  ;;  %v1074_v1 = vand.u32 2147483647, %v1064_v27 }
 0x70e   :  { %v4402_v16 = vpop.eup %4401 }
 0x70f   :  { %v1164_v5 = vmul.f32 %v4400_v29, %v1163_v55  ;;  %v1066_v21 = vmul.f32 %v4402_v16, %v1064_v27  ;;  %vm1071_vm5 = vweird.f32 %v4402_v16  ;;  %v4404_v13 = vpop.eup %4403  ;;  %v1077_v55 = vor.u32 1.1754944e-38, %v1076_v20 }
 0x710   :  { %vm1072_vm7 = vmor %vm1070_vm6, %vm1071_vm5  ;;  %vm1075_vm8 = vcmp.eq.f32.partialorder %v1074_v1, 8.507059e+37 }
 0x711   :  { %v1165_v18 = vadd.f32 %v4400_v29, %v1164_v5  ;;  %v1067_v33 = vsub.f32 1.0, %v1066_v21  ;;  %v4406_v5 = vpop.eup %4405 }
 0x713   :  { %v1169_v22 = vsel %vm1168_vm3, %v4400_v29, %v1165_v18  ;;  %v1068_v2 = vmul.f32 %v4402_v16, %v1067_v33  ;;  %v4169_v29 = vmul.f32 -1.442695, %v1060_v36 }
 0x714   :  { %v1174_v34 = vsel %vm1171_vm4, %v1173_v48, %v1169_v22 }
 0x715   :  { %v1204_v12 = vmul.f32 %v4404_v13, %v1174_v34  ;;  %v1069_v38 = vadd.f32 %v4402_v16, %v1068_v2  ;;  %4407 = vpow2.f32 %v4169_v29  ;;  %v1203_v27 = vmul.f32 %v1174_v34, %v5483_v7 }
 0x717   :  { %1206 = vrot.lane.b32.xlu1 %v1204_v12, %s4991_s17  ;;  %v1073_v56 = vsel %vm1072_vm7, %v4402_v16, %v1069_v38 }
 0x718   :  { %v1078_v21 = vsel %vm1075_vm8, %v1077_v55, %v1073_v56 }
 0x719   :  { %v1101_v15 = vmul.f32 %v4406_v5, %v1078_v21  ;;  %v1100_v16 = vmul.f32 %v1078_v21, %v5478_v28 }
 0x71b   :  { %1103 = vrot.lane.b32.xlu0 %v1101_v15, %s4991_s17  ;;  %v4408_v33 = vpop.eup %4407 }
 0x71c   :  { %v1084_v0 = vadd.f32 1.0, %v4408_v33 }
 0x71e   :  { %4409 = vrcp.f32 %v1084_v0  ;;  %v1096_v12 = vand.u32 2147483648, %v1084_v0  ;;  %vm1090_vm11 = vweird.f32 %v1084_v0  ;;  %v1094_v55 = vand.u32 2147483647, %v1084_v0 }
 0x720   :  { %v1097_v34 = vor.u32 1.1754944e-38, %v1096_v12  ;;  %vm1095_vm13 = vcmp.eq.f32.partialorder %v1094_v55, 8.507059e+37 }
 0x724   :  { %v4410_v18 = vpop.eup %4409 }
 0x725   :  { %v1086_v13 = vmul.f32 %v4410_v18, %v1084_v0  ;;  %vm1091_vm10 = vweird.f32 %v4410_v18 }
 0x726   :  { %vm1092_vm12 = vmor %vm1090_vm11, %vm1091_vm10 }
 0x727   :  { %v1087_v48 = vsub.f32 1.0, %v1086_v13 }
 0x729   :  { %v1088_v38 = vmul.f32 %v4410_v18, %v1087_v48 }
 0x72b   :  { %v1089_v36 = vadd.f32 %v4410_v18, %v1088_v38 }
 0x72d   :  { %v1093_v7 = vsel %vm1092_vm12, %v4410_v18, %v1089_v36 }
 0x72e   :  { %v1098_v15 = vsel %vm1095_vm13, %v1097_v34, %v1093_v7 }
 0x753   :  { %v1181_v21 = vpop.permute.xlu2 %1180 }
 0x754   :  { %v1182_v29 = vrot.slane %v1181_v21, 1  ;;  %v6712_v21 = vld [vmem:[#allocation15_spill] sm:$0xff] }
 0x756   :  { %v4174_v33 = vmul.f32 -1.442695, %v1182_v29  ;;  %v6713_v29 = vld [vmem:[#allocation14_spill] sm:$0xff] }
 0x789   :  { %v1207_v20 = vpop.permute.xlu1 %1206 }
 0x78a   :  { %v5615_v22 = vadd.f32 %v1207_v20, %v1203_v27 }
 0x78c   :  { %4411 = vtanh.f32 %v5615_v22 }
 0x78d   :  { %v1104_v2 = vpop.permute.xlu0 %1103 }
 0x78e   :  { %v5619_v1 = vadd.f32 %v1104_v2, %v1100_v16 }
 0x790   :  { %4413 = vtanh.f32 %v5619_v1 }
 0x791   :  { %4415 = vpow2.f32 %v4174_v33  ;;  %v6714_v33 = vld [vmem:[#allocation18_spill] sm:$0xff] }
 0x792   :  { %v4412_v56 = vpop.eup %4411 }
 0x793   :  { %1212 = vrot.lane.b32.xlu1 %v4412_v56, %s4991_s17 }
 0x796   :  { %v4414_v5 = vpop.eup %4413 }
 0x797   :  { %v1108_v28 = vmul.f32 %v4414_v5, %v1098_v15  ;;  %v4416_v13 = vpop.eup %4415  ;;  %v6709_v5 = vld [vmem:[#allocation13_spill] sm:$0xff]  ;;  %v6710_v15 = vld [vmem:[#allocation16_spill] sm:$0xff] }
 0x798   :  { %v1187_v48 = vadd.f32 1.0, %v4416_v13  ;;  %v6715_v13 = vld [vmem:[#allocation19_spill] sm:$0xff] }
 0x799   :  { %1217 = vrot.lane.b32.xlu0 %v1108_v28, %s4991_s17  ;;  %v6711_v28 = vld [vmem:[#allocation17_spill] sm:$0xff] }
 0x79a   :  { %4417 = vrcp.f32 %v1187_v48  ;;  %v1199_v18 = vand.u32 2147483648, %v1187_v48  ;;  %vm1193_vm15 = vweird.f32 %v1187_v48  ;;  %v1197_v2 = vand.u32 2147483647, %v1187_v48 }
 0x79c   :  { %v1200_v12 = vor.u32 1.1754944e-38, %v1199_v18  ;;  %vm1198_vm2 = vcmp.eq.f32.partialorder %v1197_v2, 8.507059e+37 }
 0x7a0   :  { %v4418_v0 = vpop.eup %4417 }
 0x7a1   :  { %v1189_v27 = vmul.f32 %v4418_v0, %v1187_v48  ;;  %vm1194_vm14 = vweird.f32 %v4418_v0 }
 0x7a2   :  { %vm1195_vm1 = vmor %vm1193_vm15, %vm1194_vm14 }
 0x7a3   :  { %v1190_v20 = vsub.f32 1.0, %v1189_v27 }
 0x7a5   :  { %v1191_v38 = vmul.f32 %v4418_v0, %v1190_v20 }
 0x7a7   :  { %v1192_v16 = vadd.f32 %v4418_v0, %v1191_v38  ;;  %v6716_v38 = vld [vmem:[#allocation20_spill] sm:$0xff] }
 0x7a9   :  { %v1196_v36 = vsel %vm1195_vm1, %v4418_v0, %v1192_v16 }
 0x7aa   :  { %v1201_v55 = vsel %vm1198_vm2, %v1200_v12, %v1196_v36  ;;  %v4181_v12 = vld [vmem:[%s6615_s0 + $0x5] ss:$8 sm:$0x3] }
 0x805   :  { %v1213_v56 = vpop.permute.xlu1 %1212 }
 0x806   :  { %v1215_v7 = vmul.f32 %v1213_v56, %v1201_v55 }
 0x808   :  { %4177 = vmatmul.msk.f32.vlgmr.msrb.gmra.mxu0 %vm126_vm9, %v1215_v7  ;;  %4178 = vmatmul.msk.f32.vlgmr.msrb.gmra.mxu1 %vm126_vm9, %v1215_v7 }
 0x809   :  { %1609 = vmatpush.msrb.mxu0 %v5404_v23  ;;  %1629 = vmatpush.msrb.mxu1 %v5407_v25 }
 0x80b   :  { %v1218_v34 = vpop.permute.xlu0 %1217  ;;  %1610 = vmatpush.msrb.mxu0 %v5412_v30  ;;  %1630 = vmatpush.msrb.mxu1 %v5415_v31 }
 0x80c   :  { %4175 = vmatmul.msk.f32.vlgmr.msra.gmra.mxu2 %vm126_vm9, %v1218_v34  ;;  %4176 = vmatmul.msk.f32.vlgmr.msra.gmra.mxu3 %vm126_vm9, %v1218_v34 }
 0x80d   :  { %1517 = vmatpush.msra.mxu2 %v5489_v35  ;;  %1537 = vmatpush.msra.mxu3 %v5492_v26 }
 0x80e   :  { %1611 = vmatpush.msrb.mxu0 %v5420_v57  ;;  %1631 = vmatpush.msrb.mxu1 %v5423_v61 }
 0x80f   :  { %1518 = vmatpush.msra.mxu2 %v5495_v62  ;;  %1538 = vmatpush.msra.mxu3 %v5498_v14 }
 0x810   :  { %1612 = vmatpush.msrb.mxu0 %v5428_v39  ;;  %1632 = vmatpush.msrb.mxu1 %v5431_v40 }
 0x811   :  { %1519 = vmatpush.msra.mxu2 %v5501_v32  ;;  %1539 = vmatpush.msra.mxu3 %v5504_v63 }
 0x812   :  { %1613 = vmatpush.msrb.mxu0 %v5436_v41  ;;  %1633 = vmatpush.msrb.mxu1 %v5439_v42 }
 0x813   :  { %1520 = vmatpush.msra.mxu2 %v5507_v60  ;;  %1540 = vmatpush.msra.mxu3 %v5510_v24 }
 0x814   :  { %4182 = vmatmul.msk.f32.vlgmr.msrb.gmra.mxu2 %vm126_vm9, %v1215_v7  ;;  %4183 = vmatmul.msk.f32.vlgmr.msrb.gmra.mxu3 %vm126_vm9, %v1215_v7 }
 0x815   :  { %1521 = vmatpush.msra.mxu2 %v5513_v49  ;;  %1541 = vmatpush.msra.mxu3 %v5516_v51 }
 0x816   :  { %1614 = vmatpush.msrb.mxu0 %v5444_v43  ;;  %1634 = vmatpush.msrb.mxu1 %v5447_v44 }
 0x817   :  { %1522 = vmatpush.msra.mxu2 %v5519_v52  ;;  %1542 = vmatpush.msra.mxu3 %v5522_v53 }
 0x818   :  { %1615 = vmatpush.msrb.mxu0 %v5452_v45  ;;  %1635 = vmatpush.msrb.mxu1 %v5455_v46 }
 0x819   :  { %1523 = vmatpush.msra.mxu2 %v5525_v54  ;;  %1543 = vmatpush.msra.mxu3 %v5528_v58 }
 0x81a   :  { %1616 = vmatpush.msrb.mxu0 %v5460_v47  ;;  %1636 = vmatpush.msrb.mxu1 %v5463_v50 }
 0x81b   :  { %1524 = vmatpush.msra.mxu2 %v5531_v59  ;;  %1544 = vmatpush.msra.mxu3 %v5534_v17 }
 0x81d   :  { %1719 = vmatpush.msrb.mxu2 %v5543_v3  ;;  %1739 = vmatpush.msrb.mxu3 %v5546_v6 }
 0x81f   :  { %1720 = vmatpush.msrb.mxu2 %v5551_v4  ;;  %1740 = vmatpush.msrb.mxu3 %v5554_v37 }
 0x821   :  { %1721 = vmatpush.msrb.mxu2 %v5559_v9  ;;  %1741 = vmatpush.msrb.mxu3 %v5562_v19 }
 0x823   :  { %1722 = vmatpush.msrb.mxu2 %v5567_v10  ;;  %1742 = vmatpush.msrb.mxu3 %v5570_v8 }
 0x825   :  { %1723 = vmatpush.msrb.mxu2 %v5575_v11  ;;  %1743 = vmatpush.msrb.mxu3 %v6709_v5 }
 0x827   :  { %1724 = vmatpush.msrb.mxu2 %v6710_v15  ;;  %1744 = vmatpush.msrb.mxu3 %v6711_v28 }
 0x829   :  { %1725 = vmatpush.msrb.mxu2 %v6712_v21  ;;  %1745 = vmatpush.msrb.mxu3 %v6713_v29 }
 0x82b   :  { %1726 = vmatpush.msrb.mxu2 %v6714_v33  ;;  %1746 = vmatpush.msrb.mxu3 %v6715_v13 }
 0x885   :  { %v1281_v48 = vpop.f32.mrf.mxu0 }
 0x88f   :  { %v1238_v0 = vpop.f32.mrf.mxu2  ;;  %v1258_v27 = vpop.f32.mrf.mxu3 }
 0x890   :  { %v1282_v20 = vadd.f32 %v1281_v48, %v1238_v0  ;;  %v1301_v48 = vpop.f32.mrf.mxu1 }
 0x891   :  { %v1302_v0 = vadd.f32 %v1301_v48, %v1258_v27 }
 0x892   :  { %v1304_v16 = vadd.f32 %v1282_v20, %v6716_v38 }
 0x894   :  { %v4179_v18 = vmul.f32 -1.442695, %v1304_v16  ;;  %v6717_v16 = vld [vmem:[#allocation21_spill] sm:$0xff] }
 0x896   :  { %4419 = vpow2.f32 %v4179_v18  ;;  %v1305_v18 = vadd.f32 %v1302_v0, %v6717_v16 }
 0x897   :  { %v1393_v2 = vpop.f32.mrf.mxu3  ;;  %v1373_v55 = vpop.f32.mrf.mxu2 }
 0x898   :  { %v1398_v36 = vrot.slane %v1393_v2, 7 }
 0x89a   :  { %v1399_v56 = vsel %vm173_vm0, %v1373_v55, %v1398_v36 }
 0x89b   :  { %v1401_v7 = vadd.f32 %v4181_v12, %v1399_v56 }
 0x89c   :  { %v4420_v34 = vpop.eup %4419 }
 0x89d   :  { %v1309_v13 = vadd.f32 1.0, %v4420_v34  ;;  %1425 = vrot.lane.b32.xlu1 %v1401_v7, %s4991_s17  ;;  %v4184_v33 = vmul.f32 -1.442695, %v1401_v7  ;;  %v1422_v0 = vrot.slane %v1401_v7, 1  ;;  %v4180_v7 = vmul.f32 -1.442695, %v1305_v18 }
 0x89f   :  { %4421 = vrcp.f32 %v1309_v13  ;;  %v1321_v28 = vand.u32 2147483648, %v1309_v13  ;;  %v1319_v12 = vand.u32 2147483647, %v1309_v13  ;;  %vm1315_vm4 = vweird.f32 %v1309_v13 }
 0x8a0   :  { %4423 = vpow2.f32 %v4184_v33 }
 0x8a1   :  { %4425 = vtanh.f32 %v1305_v18  ;;  %v1322_v56 = vor.u32 1.1754944e-38, %v1321_v28  ;;  %vm1320_vm6 = vcmp.eq.f32.partialorder %v1319_v12, 8.507059e+37 }
 0x8a5   :  { %v4422_v20 = vpop.eup %4421 }
 0x8a6   :  { %v1311_v2 = vmul.f32 %v4422_v20, %v1309_v13  ;;  %v4424_v38 = vpop.eup %4423  ;;  %vm1316_vm3 = vweird.f32 %v4422_v20 }
 0x8a7   :  { %v1405_v29 = vadd.f32 1.0, %v4424_v38  ;;  %vm1317_vm5 = vmor %vm1315_vm4, %vm1316_vm3  ;;  %v4426_v33 = vpop.eup %4425 }
 0x8a8   :  { %v1312_v21 = vsub.f32 1.0, %v1311_v2 }
 0x8a9   :  { %4427 = vrcp.f32 %v1405_v29  ;;  %v1417_v2 = vand.u32 2147483648, %v1405_v29  ;;  %v1415_v5 = vand.u32 2147483647, %v1405_v29  ;;  %vm1411_vm8 = vweird.f32 %v1405_v29 }
 0x8aa   :  { %v1313_v36 = vmul.f32 %v4422_v20, %v1312_v21  ;;  %4429 = vtanh.f32 %v1422_v0 }
 0x8ab   :  { %v1418_v28 = vor.u32 1.1754944e-38, %v1417_v2  ;;  %vm1416_vm11 = vcmp.eq.f32.partialorder %v1415_v5, 8.507059e+37  ;;  %4431 = vpow2.f32 %v4180_v7 }
 0x8ac   :  { %v1314_v55 = vadd.f32 %v4422_v20, %v1313_v36 }
 0x8ae   :  { %v1318_v34 = vsel %vm1317_vm5, %v4422_v20, %v1314_v55 }
 0x8af   :  { %v1323_v27 = vsel %vm1320_vm6, %v1322_v56, %v1318_v34  ;;  %v4428_v48 = vpop.eup %4427 }
 0x8b0   :  { %v1346_v16 = vmul.f32 %v4426_v33, %v1323_v27  ;;  %v1407_v15 = vmul.f32 %v4428_v48, %v1405_v29  ;;  %vm1412_vm7 = vweird.f32 %v4428_v48  ;;  %v4430_v20 = vpop.eup %4429  ;;  %v1345_v18 = vmul.f32 %v1323_v27, %v5619_v1 }
 0x8b1   :  { %vm1413_vm10 = vmor %vm1411_vm8, %vm1412_vm7 }
 0x8b2   :  { %1348 = vrot.lane.b32.xlu0 %v1346_v16, %s4991_s17  ;;  %v1408_v38 = vsub.f32 1.0, %v1407_v15  ;;  %v4432_v16 = vpop.eup %4431 }
 0x8b3   :  { %v1329_v15 = vadd.f32 1.0, %v4432_v16 }
 0x8b4   :  { %v1409_v21 = vmul.f32 %v4428_v48, %v1408_v38 }
 0x8b5   :  { %4433 = vrcp.f32 %v1329_v15  ;;  %vm1335_vm13 = vweird.f32 %v1329_v15 }
 0x8b6   :  { %v1410_v36 = vadd.f32 %v4428_v48, %v1409_v21 }
 0x8b8   :  { %v1414_v13 = vsel %vm1413_vm10, %v4428_v48, %v1410_v36 }
 0x8b9   :  { %v1419_v12 = vsel %vm1416_vm11, %v1418_v28, %v1414_v13  ;;  %v1339_v28 = vand.u32 2147483647, %v1329_v15 }
 0x8ba   :  { %v1449_v55 = vmul.f32 %v4430_v20, %v1419_v12  ;;  %v1448_v56 = vmul.f32 %v1419_v12, %v5615_v22  ;;  %v1341_v22 = vand.u32 2147483648, %v1329_v15 }
 0x8bb   :  { %v4434_v34 = vpop.eup %4433  ;;  %vm1340_vm15 = vcmp.eq.f32.partialorder %v1339_v28, 8.507059e+37 }
 0x8bc   :  { %1451 = vrot.lane.b32.xlu2 %v1449_v55, %s4991_s17  ;;  %v1331_v29 = vmul.f32 %v4434_v34, %v1329_v15  ;;  %vm1336_vm12 = vweird.f32 %v4434_v34  ;;  %v1342_v20 = vor.u32 1.1754944e-38, %v1341_v22 }
 0x8bd   :  { %vm1337_vm14 = vmor %vm1335_vm13, %vm1336_vm12 }
 0x8be   :  { %v1332_v5 = vsub.f32 1.0, %v1331_v29 }
 0x8c0   :  { %v1333_v38 = vmul.f32 %v4434_v34, %v1332_v5 }
 0x8c2   :  { %v1334_v36 = vadd.f32 %v4434_v34, %v1333_v38 }
 0x8c4   :  { %v1338_v13 = vsel %vm1337_vm14, %v4434_v34, %v1334_v36 }
 0x8c5   :  { %v1343_v55 = vsel %vm1340_vm15, %v1342_v20, %v1338_v13 }
 0x90f   :  { %v1426_v1 = vpop.permute.xlu1 %1425 }
 0x910   :  { %v1427_v27 = vrot.slane %v1426_v1, 1 }
 0x912   :  { %v4185_v16 = vmul.f32 -1.442695, %v1427_v27 }
 0x916   :  { %v1452_v33 = vpop.permute.xlu2 %1451 }
 0x917   :  { %v5688_v0 = vadd.f32 %v1452_v33, %v1448_v56 }
 0x919   :  { %4435 = vtanh.f32 %v5688_v0 }
 0x91f   :  { %v4436_v48 = vpop.eup %4435 }
 0x920   :  { %1457 = vrot.lane.b32.xlu2 %v4436_v48, %s4991_s17 }
 0x924   :  { %v1349_v2 = vpop.permute.xlu0 %1348 }
 0x925   :  { %v5693_v21 = vadd.f32 %v1349_v2, %v1345_v18 }
 0x927   :  { %4437 = vtanh.f32 %v5693_v21 }
 0x928   :  { %4439 = vpow2.f32 %v4185_v16 }
 0x92d   :  { %v4438_v12 = vpop.eup %4437 }
 0x92e   :  { %v1353_v7 = vmul.f32 %v4438_v12, %v1343_v55  ;;  %v4440_v56 = vpop.eup %4439 }
 0x92f   :  { %v1432_v33 = vadd.f32 1.0, %v4440_v56 }
 0x930   :  { %1462 = vrot.lane.b32.xlu0 %v1353_v7, %s4991_s17 }
 0x931   :  { %4441 = vrcp.f32 %v1432_v33  ;;  %v1444_v34 = vand.u32 2147483648, %v1432_v33  ;;  %vm1438_vm2 = vweird.f32 %v1432_v33  ;;  %v1442_v18 = vand.u32 2147483647, %v1432_v33 }
 0x933   :  { %v1445_v36 = vor.u32 1.1754944e-38, %v1444_v34  ;;  %vm1443_vm4 = vcmp.eq.f32.partialorder %v1442_v18, 8.507059e+37 }
 0x937   :  { %v4442_v29 = vpop.eup %4441 }
 0x938   :  { %v1434_v5 = vmul.f32 %v4442_v29, %v1432_v33  ;;  %vm1439_vm1 = vweird.f32 %v4442_v29 }
 0x939   :  { %vm1440_vm3 = vmor %vm1438_vm2, %vm1439_vm1 }
 0x93a   :  { %v1435_v48 = vsub.f32 1.0, %v1434_v5 }
 0x93c   :  { %v1436_v15 = vmul.f32 %v4442_v29, %v1435_v48 }
 0x93e   :  { %v1437_v38 = vadd.f32 %v4442_v29, %v1436_v15 }
 0x940   :  { %v1441_v2 = vsel %vm1440_vm3, %v4442_v29, %v1437_v38 }
 0x941   :  { %v1446_v22 = vsel %vm1443_vm4, %v1445_v36, %v1441_v2 }
 0x97a   :  { %v1458_v28 = vpop.permute.xlu2 %1457 }
 0x97b   :  { %v1460_v13 = vmul.f32 %v1458_v28, %v1446_v22 }
 0x97d   :  { %4188 = vmatmul.msk.f32.vlgmr.msra.gmra.mxu2 %vm126_vm9, %v1460_v13  ;;  %4189 = vmatmul.msk.f32.vlgmr.msra.gmra.mxu3 %vm126_vm9, %v1460_v13 }
 0x97e   :  { %1854 = vmatpush.msra.mxu2 %v5404_v23  ;;  %1874 = vmatpush.msra.mxu3 %v5407_v25  ;;  %v6718_v25 = vld [vmem:[#allocation13_spill] sm:$0xff] }
 0x980   :  { %1855 = vmatpush.msra.mxu2 %v5412_v30  ;;  %1875 = vmatpush.msra.mxu3 %v5415_v31  ;;  %v6719_v30 = vld [vmem:[#allocation16_spill] sm:$0xff]  ;;  %v6720_v31 = vld [vmem:[#allocation17_spill] sm:$0xff] }
 0x982   :  { %1856 = vmatpush.msra.mxu2 %v5420_v57  ;;  %1876 = vmatpush.msra.mxu3 %v5423_v61  ;;  %v6721_v57 = vld [vmem:[#allocation15_spill] sm:$0xff]  ;;  %v6722_v61 = vld [vmem:[#allocation14_spill] sm:$0xff] }
 0x984   :  { %1857 = vmatpush.msra.mxu2 %v5428_v39  ;;  %1877 = vmatpush.msra.mxu3 %v5431_v40  ;;  %v6723_v39 = vld [vmem:[#allocation18_spill] sm:$0xff]  ;;  %v6724_v40 = vld [vmem:[#allocation19_spill] sm:$0xff] }
 0x986   :  { %1858 = vmatpush.msra.mxu2 %v5436_v41  ;;  %1878 = vmatpush.msra.mxu3 %v5439_v42 }
 0x988   :  { %1859 = vmatpush.msra.mxu2 %v5444_v43  ;;  %1879 = vmatpush.msra.mxu3 %v5447_v44 }
 0x98a   :  { %1860 = vmatpush.msra.mxu2 %v5452_v45  ;;  %1880 = vmatpush.msra.mxu3 %v5455_v46  ;;  %v6725_v45 = vld [vmem:[#allocation20_spill] sm:$0xff] }
 0x98c   :  { %1861 = vmatpush.msra.mxu2 %v5460_v47  ;;  %1881 = vmatpush.msra.mxu3 %v5463_v50 }
 0x9a2   :  { %v1463_v23 = vpop.permute.xlu0 %1462 }
 0x9a3   :  { %4186 = vmatmul.msk.f32.vlgmr.msra.gmra.mxu0 %vm126_vm9, %v1463_v23  ;;  %4187 = vmatmul.msk.f32.vlgmr.msra.gmra.mxu1 %vm126_vm9, %v1463_v23 }
 0x9a4   :  { %1762 = vmatpush.msra.mxu0 %v5489_v35  ;;  %1782 = vmatpush.msra.mxu1 %v5492_v26  ;;  %v4192_v26 = vld [vmem:[%s6615_s0 + $0x6] ss:$8 sm:$0x3] }
 0x9a6   :  { %1763 = vmatpush.msra.mxu0 %v5495_v62  ;;  %1783 = vmatpush.msra.mxu1 %v5498_v14 }
 0x9a8   :  { %1764 = vmatpush.msra.mxu0 %v5501_v32  ;;  %1784 = vmatpush.msra.mxu1 %v5504_v63 }
 0x9aa   :  { %1765 = vmatpush.msra.mxu0 %v5507_v60  ;;  %1785 = vmatpush.msra.mxu1 %v5510_v24 }
 0x9ab   :  { %4193 = vmatmul.msk.f32.vlgmr.msrb.gmra.mxu0 %vm126_vm9, %v1460_v13  ;;  %4194 = vmatmul.msk.f32.vlgmr.msrb.gmra.mxu1 %vm126_vm9, %v1460_v13 }
 0x9ac   :  { %1766 = vmatpush.msra.mxu0 %v5513_v49  ;;  %1786 = vmatpush.msra.mxu1 %v5516_v51 }
 0x9ae   :  { %1767 = vmatpush.msra.mxu0 %v5519_v52  ;;  %1787 = vmatpush.msra.mxu1 %v5522_v53  ;;  %v6726_v53 = vld [vmem:[#allocation21_spill] sm:$0xff] }
 0x9b0   :  { %1768 = vmatpush.msra.mxu0 %v5525_v54  ;;  %1788 = vmatpush.msra.mxu1 %v5528_v58 }
 0x9b2   :  { %1769 = vmatpush.msra.mxu0 %v5531_v59  ;;  %1789 = vmatpush.msra.mxu1 %v5534_v17 }
 0x9b4   :  { %1964 = vmatpush.msrb.mxu0 %v5543_v3  ;;  %1984 = vmatpush.msrb.mxu1 %v5546_v6 }
 0x9b6   :  { %1965 = vmatpush.msrb.mxu0 %v5551_v4  ;;  %1985 = vmatpush.msrb.mxu1 %v5554_v37 }
 0x9b8   :  { %1966 = vmatpush.msrb.mxu0 %v5559_v9  ;;  %1986 = vmatpush.msrb.mxu1 %v5562_v19 }
 0x9ba   :  { %1967 = vmatpush.msrb.mxu0 %v5567_v10  ;;  %1987 = vmatpush.msrb.mxu1 %v5570_v8 }
 0x9bc   :  { %1968 = vmatpush.msrb.mxu0 %v5575_v11  ;;  %1988 = vmatpush.msrb.mxu1 %v6718_v25 }
 0x9be   :  { %1969 = vmatpush.msrb.mxu0 %v6719_v30  ;;  %1989 = vmatpush.msrb.mxu1 %v6720_v31 }
 0x9c0   :  { %1970 = vmatpush.msrb.mxu0 %v6721_v57  ;;  %1990 = vmatpush.msrb.mxu1 %v6722_v61 }
 0x9c2   :  { %1971 = vmatpush.msrb.mxu0 %v6723_v39  ;;  %1991 = vmatpush.msrb.mxu1 %v6724_v40 }
 0xa00   :  { %v1526_v41 = vpop.f32.mrf.mxu2  ;;  %v1546_v49 = vpop.f32.mrf.mxu3 }
 0xa20   :  { %v1483_v42 = vpop.f32.mrf.mxu0  ;;  %v1503_v43 = vpop.f32.mrf.mxu1 }
 0xa21   :  { %v1527_v44 = vadd.f32 %v1526_v41, %v1483_v42  ;;  %v1547_v51 = vadd.f32 %v1546_v49, %v1503_v43 }
 0xa23   :  { %v1549_v46 = vadd.f32 %v1527_v44, %v6725_v45  ;;  %v1550_v54 = vadd.f32 %v1547_v51, %v6726_v53 }
 0xa25   :  { %v4190_v47 = vmul.f32 -1.442695, %v1549_v46  ;;  %v4191_v34 = vmul.f32 -1.442695, %v1550_v54 }
 0xa27   :  { %4443 = vpow2.f32 %v4190_v47 }
 0xa28   :  { %v1638_v50 = vpop.f32.mrf.mxu1  ;;  %v1618_v62 = vpop.f32.mrf.mxu0 }
 0xa29   :  { %v1643_v35 = vrot.slane %v1638_v50, 7 }
 0xa2b   :  { %v1644_v14 = vsel %vm173_vm0, %v1618_v62, %v1643_v35 }
 0xa2c   :  { %v1646_v32 = vadd.f32 %v4192_v26, %v1644_v14 }
 0xa2d   :  { %v4444_v63 = vpop.eup %4443 }
 0xa2e   :  { %v1554_v60 = vadd.f32 1.0, %v4444_v63  ;;  %1670 = vrot.lane.b32.xlu0 %v1646_v32, %s4991_s17  ;;  %v4195_v24 = vmul.f32 -1.442695, %v1646_v32  ;;  %v1667_v12 = vrot.slane %v1646_v32, 1 }
 0xa30   :  { %4445 = vrcp.f32 %v1554_v60  ;;  %v1566_v6 = vand.u32 2147483648, %v1554_v60  ;;  %v1564_v37 = vand.u32 2147483647, %v1554_v60  ;;  %vm1560_vm6 = vweird.f32 %v1554_v60 }
 0xa31   :  { %4447 = vpow2.f32 %v4195_v24 }
 0xa32   :  { %4449 = vtanh.f32 %v1550_v54  ;;  %v1567_v19 = vor.u32 1.1754944e-38, %v1566_v6  ;;  %vm1565_vm8 = vcmp.eq.f32.partialorder %v1564_v37, 8.507059e+37  ;;  %v5775_v6 = vld [vmem:[#allocation3 + $0x78] sm:$0xff]  ;;  %v5781_v37 = vld [vmem:[#allocation3 + $0x68] sm:$0xff] }
 0xa36   :  { %v4446_v52 = vpop.eup %4445 }
 0xa37   :  { %v1556_v58 = vmul.f32 %v4446_v52, %v1554_v60  ;;  %v4448_v59 = vpop.eup %4447  ;;  %vm1561_vm5 = vweird.f32 %v4446_v52 }
 0xa38   :  { %v1650_v17 = vadd.f32 1.0, %v4448_v59  ;;  %vm1562_vm7 = vmor %vm1560_vm6, %vm1561_vm5  ;;  %v4450_v8 = vpop.eup %4449 }
 0xa39   :  { %v1557_v3 = vsub.f32 1.0, %v1556_v58 }
 0xa3a   :  { %4451 = vrcp.f32 %v1650_v17  ;;  %v1662_v27 = vand.u32 2147483648, %v1650_v17  ;;  %v1660_v56 = vand.u32 2147483647, %v1650_v17  ;;  %vm1656_vm11 = vweird.f32 %v1650_v17 }
 0xa3b   :  { %v1558_v4 = vmul.f32 %v4446_v52, %v1557_v3  ;;  %4453 = vtanh.f32 %v1667_v12  ;;  %v5772_v3 = vld [vmem:[#allocation3 + $0x70] sm:$0xff]  ;;  %v5802_v12 = vld [vmem:[#allocation3 + $0x20] sm:$0xff] }
 0xa3c   :  { %v1663_v29 = vor.u32 1.1754944e-38, %v1662_v27  ;;  %vm1661_vm13 = vcmp.eq.f32.partialorder %v1660_v56, 8.507059e+37  ;;  %4455 = vpow2.f32 %v4191_v34  ;;  %v5814_v27 = vld [vmem:[#allocation3] sm:$0xff] }
 0xa3d   :  { %v1559_v9 = vadd.f32 %v4446_v52, %v1558_v4  ;;  %v5778_v4 = vld [vmem:[#allocation3 + $0x60] sm:$0xff]  ;;  %6728 = vst [vmem:[#allocation16_spill] sm:$0xff] %v5814_v27 }
 0xa3e   :  { %v5840_v34 = vld [vmem:[#allocation6 + $0x40] sm:$0xff] }
 0xa3f   :  { %v1563_v10 = vsel %vm1562_vm7, %v4446_v52, %v1559_v9  ;;  %v5784_v9 = vld [vmem:[#allocation3 + $0x50] sm:$0xff] }
 0xa40   :  { %v1568_v11 = vsel %vm1565_vm8, %v1567_v19, %v1563_v10  ;;  %v4452_v20 = vpop.eup %4451  ;;  %v5787_v19 = vld [vmem:[#allocation3 + $0x58] sm:$0xff]  ;;  %v5790_v10 = vld [vmem:[#allocation3 + $0x40] sm:$0xff] }
 0xa41   :  { %v1591_v55 = vmul.f32 %v4450_v8, %v1568_v11  ;;  %v1652_v7 = vmul.f32 %v4452_v20, %v1650_v17  ;;  %vm1657_vm10 = vweird.f32 %v4452_v20  ;;  %v4454_v48 = vpop.eup %4453  ;;  %v1590_v57 = vmul.f32 %v1568_v11, %v5693_v21  ;;  %v5793_v8 = vld [vmem:[#allocation3 + $0x48] sm:$0xff]  ;;  %v5796_v11 = vld [vmem:[#allocation3 + $0x30] sm:$0xff] }
 0xa42   :  { %vm1658_vm12 = vmor %vm1656_vm11, %vm1657_vm10  ;;  %v4456_v18 = vpop.eup %4455 }
 0xa43   :  { %1593 = vrot.lane.b32.xlu1 %v1591_v55, %s4991_s17  ;;  %v1653_v1 = vsub.f32 1.0, %v1652_v7  ;;  %v1574_v2 = vadd.f32 1.0, %v4456_v18  ;;  %v5805_v55 = vld [vmem:[#allocation3 + $0x28] sm:$0xff]  ;;  %v5808_v7 = vld [vmem:[#allocation3 + $0x10] sm:$0xff] }
 0xa44   :  { %v5843_v18 = vld [vmem:[#allocation6 + $0x48] sm:$0xff] }
 0xa45   :  { %v1654_v16 = vmul.f32 %v4452_v20, %v1653_v1  ;;  %4457 = vrcp.f32 %v1574_v2  ;;  %vm1580_vm15 = vweird.f32 %v1574_v2  ;;  %v1584_v41 = vand.u32 2147483647, %v1574_v2  ;;  %v5811_v1 = vld [vmem:[#allocation3 + $0x18] sm:$0xff] }
 0xa46   :  { %6727 = vst [vmem:[#allocation13_spill] sm:$0xff] %v5811_v1 }
 0xa47   :  { %v1655_v33 = vadd.f32 %v4452_v20, %v1654_v16  ;;  %vm1585_vm2 = vcmp.eq.f32.partialorder %v1584_v41, 8.507059e+37  ;;  %v5817_v16 = vld [vmem:[#allocation3 + $0x8] sm:$0xff]  ;;  %v5884_v41 = vld [vmem:[#allocation8 + $0x50] sm:$0xff] }
 0xa48   :  { %6729 = vst [vmem:[#allocation17_spill] sm:$0xff] %v5817_v16 }
 0xa49   :  { %v1659_v5 = vsel %vm1658_vm12, %v4452_v20, %v1655_v33  ;;  %v5799_v20 = vld [vmem:[#allocation3 + $0x38] sm:$0xff]  ;;  %v5822_v33 = vld [vmem:[#allocation6 + $0x70] sm:$0xff] }
 0xa4a   :  { %v1664_v15 = vsel %vm1661_vm13, %v1663_v29, %v1659_v5  ;;  %v5825_v29 = vld [vmem:[#allocation6 + $0x78] sm:$0xff]  ;;  %v5828_v5 = vld [vmem:[#allocation6 + $0x60] sm:$0xff] }
 0xa4b   :  { %v1694_v38 = vmul.f32 %v4454_v48, %v1664_v15  ;;  %v1693_v36 = vmul.f32 %v1664_v15, %v5688_v0  ;;  %v4458_v22 = vpop.eup %4457  ;;  %v1586_v0 = vand.u32 2147483648, %v1574_v2  ;;  %v5831_v48 = vld [vmem:[#allocation6 + $0x68] sm:$0xff]  ;;  %v5834_v15 = vld [vmem:[#allocation6 + $0x50] sm:$0xff] }
 0xa4c   :  { %v1576_v23 = vmul.f32 %v4458_v22, %v1574_v2  ;;  %vm1581_vm14 = vweird.f32 %v4458_v22  ;;  %v5848_v2 = vld [vmem:[#allocation6 + $0x30] sm:$0xff] }
 0xa4d   :  { %1696 = vrot.lane.b32.xlu2 %v1694_v38, %s4991_s17  ;;  %vm1582_vm1 = vmor %vm1580_vm15, %vm1581_vm14  ;;  %v1587_v43 = vor.u32 1.1754944e-38, %v1586_v0  ;;  %v5837_v38 = vld [vmem:[#allocation6 + $0x58] sm:$0xff]  ;;  %v5881_v0 = vld [vmem:[#allocation8 + $0x68] sm:$0xff] }
 0xa4e   :  { %v1577_v25 = vsub.f32 1.0, %v1576_v23  ;;  %v5860_v23 = vld [vmem:[#allocation6 + $0x10] sm:$0xff] }
 0xa50   :  { %v1578_v31 = vmul.f32 %v4458_v22, %v1577_v25  ;;  %v5863_v25 = vld [vmem:[#allocation6 + $0x18] sm:$0xff] }
 0xa52   :  { %v1579_v40 = vadd.f32 %v4458_v22, %v1578_v31  ;;  %v5869_v31 = vld [vmem:[#allocation6 + $0x8] sm:$0xff] }
 0xa54   :  { %v1583_v42 = vsel %vm1582_vm1, %v4458_v22, %v1579_v40  ;;  %v5854_v22 = vld [vmem:[#allocation6 + $0x20] sm:$0xff] }
 0xa55   :  { %v1588_v46 = vsel %vm1585_vm2, %v1587_v43, %v1583_v42  ;;  %v5878_v40 = vld [vmem:[#allocation8 + $0x60] sm:$0xff]  ;;  %v5887_v42 = vld [vmem:[#allocation8 + $0x58] sm:$0xff] }
 0xa56   :  { %v5890_v43 = vld [vmem:[#allocation8 + $0x40] sm:$0xff] }
 0xaa0   :  { %v1671_v21 = vpop.permute.xlu0 %1670 }
 0xaa1   :  { %v1672_v50 = vrot.slane %v1671_v21, 1  ;;  %v5902_v21 = vld [vmem:[#allocation8 + $0x20] sm:$0xff] }
 0xaa2   :  { %6731 = vst [vmem:[#allocation14_spill] sm:$0xff] %v5902_v21 }
 0xaa3   :  { %v4196_v35 = vmul.f32 -1.442695, %v1672_v50  ;;  %v5905_v50 = vld [vmem:[#allocation8 + $0x28] sm:$0xff] }
 0xaa4   :  { %6732 = vst [vmem:[#allocation18_spill] sm:$0xff] %v5905_v50 }
 0xaa7   :  { %v1697_v28 = vpop.permute.xlu2 %1696 }
 0xaa8   :  { %v5761_v13 = vadd.f32 %v1697_v28, %v1693_v36  ;;  %v5851_v36 = vld [vmem:[#allocation6 + $0x38] sm:$0xff]  ;;  %v5857_v28 = vld [vmem:[#allocation6 + $0x28] sm:$0xff] }
 0xaaa   :  { %4459 = vtanh.f32 %v5761_v13 }
 0xab0   :  { %v4460_v30 = vpop.eup %4459 }
 0xab1   :  { %1702 = vrot.lane.b32.xlu2 %v4460_v30, %s4991_s17  ;;  %v5866_v30 = vld [vmem:[#allocation6] sm:$0xff] }
 0xab5   :  { %v1594_v61 = vpop.permute.xlu1 %1593 }
 0xab6   :  { %v5766_v39 = vadd.f32 %v1594_v61, %v1590_v57  ;;  %v5872_v57 = vld [vmem:[#allocation8 + $0x70] sm:$0xff]  ;;  %v5875_v61 = vld [vmem:[#allocation8 + $0x78] sm:$0xff] }
 0xab8   :  { %4461 = vtanh.f32 %v5766_v39 }
 0xab9   :  { %4463 = vpow2.f32 %v4196_v35  ;;  %v5908_v35 = vld [vmem:[#allocation8 + $0x10] sm:$0xff] }
 0xaba   :  { %6733 = vst [vmem:[#allocation19_spill] sm:$0xff] %v5908_v35 }
 0xabe   :  { %v4462_v44 = vpop.eup %4461 }
 0xabf   :  { %v1598_v47 = vmul.f32 %v4462_v44, %v1588_v46  ;;  %v4464_v26 = vpop.eup %4463  ;;  %v5893_v44 = vld [vmem:[#allocation8 + $0x48] sm:$0xff]  ;;  %v5896_v46 = vld [vmem:[#allocation8 + $0x30] sm:$0xff] }
 0xac0   :  { %v1677_v62 = vadd.f32 1.0, %v4464_v26  ;;  %v5911_v26 = vld [vmem:[#allocation8 + $0x18] sm:$0xff] }
 0xac1   :  { %1707 = vrot.lane.b32.xlu1 %v1598_v47, %s4991_s17  ;;  %v5899_v47 = vld [vmem:[#allocation8 + $0x38] sm:$0xff]  ;;  %6734 = vst [vmem:[#allocation22_spill] sm:$0xff] %v5911_v26 }
 0xac2   :  { %4465 = vrcp.f32 %v1677_v62  ;;  %v1689_v49 = vand.u32 2147483648, %v1677_v62  ;;  %vm1683_vm4 = vweird.f32 %v1677_v62  ;;  %v1687_v51 = vand.u32 2147483647, %v1677_v62  ;;  %6730 = vst [vmem:[#allocation15_spill] sm:$0xff] %v5899_v47 }
 0xac4   :  { %v1690_v54 = vor.u32 1.1754944e-38, %v1689_v49  ;;  %vm1688_vm6 = vcmp.eq.f32.partialorder %v1687_v51, 8.507059e+37 }
 0xac8   :  { %v4466_v14 = vpop.eup %4465 }
 0xac9   :  { %v1679_v32 = vmul.f32 %v4466_v14, %v1677_v62  ;;  %vm1684_vm3 = vweird.f32 %v4466_v14  ;;  %v5914_v62 = vld [vmem:[#allocation8] sm:$0xff] }
 0xaca   :  { %vm1685_vm5 = vmor %vm1683_vm4, %vm1684_vm3  ;;  %6735 = vst [vmem:[#allocation23_spill] sm:$0xff] %v5914_v62 }
 0xacb   :  { %v1680_v63 = vsub.f32 1.0, %v1679_v32 }
 0xacd   :  { %v1681_v60 = vmul.f32 %v4466_v14, %v1680_v63 }
 0xacf   :  { %v1682_v24 = vadd.f32 %v4466_v14, %v1681_v60 }
 0xad1   :  { %v1686_v52 = vsel %vm1685_vm5, %v4466_v14, %v1682_v24  ;;  %v5917_v14 = vld [vmem:[#allocation8 + $0x8] sm:$0xff] }
 0xad2   :  { %v1691_v58 = vsel %vm1688_vm6, %v1690_v54, %v1686_v52  ;;  %6736 = vst [vmem:[#allocation24_spill] sm:$0xff] %v5917_v14 }
 0xb0b   :  { %v1703_v59 = vpop.permute.xlu2 %1702 }
 0xb0c   :  { %v1705_v17 = vmul.f32 %v1703_v59, %v1691_v58  ;;  %v4203_v58 = vld [vmem:[%s6615_s0 + $0x7] ss:$8 sm:$0x3] }
 0xb0e   :  { %4199 = vmatmul.msk.f32.vlgmr.msra.gmra.mxu0 %vm126_vm9, %v1705_v17  ;;  %4200 = vmatmul.msk.f32.vlgmr.msra.gmra.mxu1 %vm126_vm9, %v1705_v17 }
 0xb0f   :  { %2099 = vmatpush.msra.mxu0 %v5772_v3  ;;  %2119 = vmatpush.msra.mxu1 %v5775_v6 }
 0xb11   :  { %2100 = vmatpush.msra.mxu0 %v5778_v4  ;;  %2120 = vmatpush.msra.mxu1 %v5781_v37 }
 0xb13   :  { %2101 = vmatpush.msra.mxu0 %v5784_v9  ;;  %2121 = vmatpush.msra.mxu1 %v5787_v19 }
 0xb15   :  { %2102 = vmatpush.msra.mxu0 %v5790_v10  ;;  %2122 = vmatpush.msra.mxu1 %v5793_v8 }
 0xb17   :  { %2103 = vmatpush.msra.mxu0 %v5796_v11  ;;  %2123 = vmatpush.msra.mxu1 %v5799_v20 }
 0xb19   :  { %2104 = vmatpush.msra.mxu0 %v5802_v12  ;;  %2124 = vmatpush.msra.mxu1 %v5805_v55 }
 0xb1b   :  { %2105 = vmatpush.msra.mxu0 %v5808_v7  ;;  %2125 = vmatpush.msra.mxu1 %v5811_v1 }
 0xb1d   :  { %2106 = vmatpush.msra.mxu0 %v5814_v27  ;;  %2126 = vmatpush.msra.mxu1 %v5817_v16 }
 0xb33   :  { %v1708_v56 = vpop.permute.xlu1 %1707 }
 0xb34   :  { %4197 = vmatmul.msk.f32.vlgmr.msrb.gmra.mxu2 %vm126_vm9, %v1708_v56  ;;  %4198 = vmatmul.msk.f32.vlgmr.msrb.gmra.mxu3 %vm126_vm9, %v1708_v56 }
 0xb35   :  { %2007 = vmatpush.msrb.mxu2 %v5822_v33  ;;  %2027 = vmatpush.msrb.mxu3 %v5825_v29 }
 0xb37   :  { %2008 = vmatpush.msrb.mxu2 %v5828_v5  ;;  %2028 = vmatpush.msrb.mxu3 %v5831_v48 }
 0xb39   :  { %2009 = vmatpush.msrb.mxu2 %v5834_v15  ;;  %2029 = vmatpush.msrb.mxu3 %v5837_v38 }
 0xb3b   :  { %2010 = vmatpush.msrb.mxu2 %v5840_v34  ;;  %2030 = vmatpush.msrb.mxu3 %v5843_v18 }
 0xb3c   :  { %4204 = vmatmul.msk.f32.vlgmr.msra.gmra.mxu2 %vm126_vm9, %v1705_v17  ;;  %4205 = vmatmul.msk.f32.vlgmr.msra.gmra.mxu3 %vm126_vm9, %v1705_v17 }
 0xb3d   :  { %2011 = vmatpush.msrb.mxu2 %v5848_v2  ;;  %2031 = vmatpush.msrb.mxu3 %v5851_v36 }
 0xb3f   :  { %2012 = vmatpush.msrb.mxu2 %v5854_v22  ;;  %2032 = vmatpush.msrb.mxu3 %v5857_v28 }
 0xb41   :  { %2013 = vmatpush.msrb.mxu2 %v5860_v23  ;;  %2033 = vmatpush.msrb.mxu3 %v5863_v25 }
 0xb43   :  { %2014 = vmatpush.msrb.mxu2 %v5866_v30  ;;  %2034 = vmatpush.msrb.mxu3 %v5869_v31 }
 0xb45   :  { %2209 = vmatpush.msra.mxu2 %v5872_v57  ;;  %2229 = vmatpush.msra.mxu3 %v5875_v61 }
 0xb47   :  { %2210 = vmatpush.msra.mxu2 %v5878_v40  ;;  %2230 = vmatpush.msra.mxu3 %v5881_v0 }
 0xb49   :  { %2211 = vmatpush.msra.mxu2 %v5884_v41  ;;  %2231 = vmatpush.msra.mxu3 %v5887_v42 }
 0xb4b   :  { %2212 = vmatpush.msra.mxu2 %v5890_v43  ;;  %2232 = vmatpush.msra.mxu3 %v5893_v44 }
 0xb4d   :  { %2213 = vmatpush.msra.mxu2 %v5896_v46  ;;  %2233 = vmatpush.msra.mxu3 %v5899_v47 }
 0xb4f   :  { %2214 = vmatpush.msra.mxu2 %v5902_v21  ;;  %2234 = vmatpush.msra.mxu3 %v5905_v50 }
 0xb51   :  { %2215 = vmatpush.msra.mxu2 %v5908_v35  ;;  %2235 = vmatpush.msra.mxu3 %v5911_v26 }
 0xb53   :  { %2216 = vmatpush.msra.mxu2 %v5914_v62  ;;  %2236 = vmatpush.msra.mxu3 %v5917_v14 }
 0xb8b   :  { %v1771_v32 = vpop.f32.mrf.mxu0 }
 0xbb7   :  { %v1728_v63 = vpop.f32.mrf.mxu2  ;;  %v1748_v60 = vpop.f32.mrf.mxu3 }
 0xbb8   :  { %v1772_v24 = vadd.f32 %v1771_v32, %v1728_v63  ;;  %v1791_v32 = vpop.f32.mrf.mxu1 }
 0xbb9   :  { %v1792_v63 = vadd.f32 %v1791_v32, %v1748_v60 }
 0xbba   :  { %v1794_v49 = vadd.f32 %v1772_v24, %v6725_v45 }
 0xbbc   :  { %v4201_v51 = vmul.f32 -1.442695, %v1794_v49  ;;  %v1795_v49 = vadd.f32 %v1792_v63, %v6726_v53 }
 0xbbe   :  { %4467 = vpow2.f32 %v4201_v51 }
 0xbbf   :  { %v1883_v52 = vpop.f32.mrf.mxu3  ;;  %v1863_v59 = vpop.f32.mrf.mxu2 }
 0xbc0   :  { %v1888_v54 = vrot.slane %v1883_v52, 7 }
 0xbc2   :  { %v1889_v17 = vsel %vm173_vm0, %v1863_v59, %v1888_v54 }
 0xbc3   :  { %v1891_v56 = vadd.f32 %v4203_v58, %v1889_v17 }
 0xbc4   :  { %v4468_v62 = vpop.eup %4467 }
 0xbc5   :  { %v1799_v14 = vadd.f32 1.0, %v4468_v62  ;;  %1915 = vrot.lane.b32.xlu2 %v1891_v56, %s4991_s17  ;;  %v4206_v26 = vmul.f32 -1.442695, %v1891_v56  ;;  %v1912_v63 = vrot.slane %v1891_v56, 1  ;;  %v4202_v56 = vmul.f32 -1.442695, %v1795_v49 }
 0xbc7   :  { %4469 = vrcp.f32 %v1799_v14  ;;  %v1811_v50 = vand.u32 2147483648, %v1799_v14  ;;  %v1809_v62 = vand.u32 2147483647, %v1799_v14  ;;  %vm1805_vm8 = vweird.f32 %v1799_v14 }
 0xbc8   :  { %4471 = vpow2.f32 %v4206_v26 }
 0xbc9   :  { %4473 = vtanh.f32 %v1795_v49  ;;  %v1812_v59 = vor.u32 1.1754944e-38, %v1811_v50  ;;  %vm1810_vm11 = vcmp.eq.f32.partialorder %v1809_v62, 8.507059e+37 }
 0xbcd   :  { %v4470_v24 = vpop.eup %4469 }
 0xbce   :  { %v1801_v51 = vmul.f32 %v4470_v24, %v1799_v14  ;;  %v4472_v52 = vpop.eup %4471  ;;  %vm1806_vm7 = vweird.f32 %v4470_v24 }
 0xbcf   :  { %v1895_v45 = vadd.f32 1.0, %v4472_v52  ;;  %vm1807_vm10 = vmor %vm1805_vm8, %vm1806_vm7  ;;  %v4474_v26 = vpop.eup %4473 }
 0xbd0   :  { %v1802_v35 = vsub.f32 1.0, %v1801_v51 }
 0xbd1   :  { %4475 = vrcp.f32 %v1895_v45  ;;  %v1907_v52 = vand.u32 2147483648, %v1895_v45  ;;  %v1905_v47 = vand.u32 2147483647, %v1895_v45  ;;  %vm1901_vm13 = vweird.f32 %v1895_v45 }
 0xbd2   :  { %v1803_v54 = vmul.f32 %v4470_v24, %v1802_v35  ;;  %4477 = vtanh.f32 %v1912_v63 }
 0xbd3   :  { %v1908_v50 = vor.u32 1.1754944e-38, %v1907_v52  ;;  %vm1906_vm15 = vcmp.eq.f32.partialorder %v1905_v47, 8.507059e+37  ;;  %4479 = vpow2.f32 %v4202_v56 }
 0xbd4   :  { %v1804_v58 = vadd.f32 %v4470_v24, %v1803_v54 }
 0xbd6   :  { %v1808_v17 = vsel %vm1807_vm10, %v4470_v24, %v1804_v58 }
 0xbd7   :  { %v1813_v60 = vsel %vm1810_vm11, %v1812_v59, %v1808_v17  ;;  %v4476_v32 = vpop.eup %4475 }
 0xbd8   :  { %v1836_v53 = vmul.f32 %v4474_v26, %v1813_v60  ;;  %v1897_v21 = vmul.f32 %v4476_v32, %v1895_v45  ;;  %vm1902_vm12 = vweird.f32 %v4476_v32  ;;  %v4478_v24 = vpop.eup %4477  ;;  %v1835_v45 = vmul.f32 %v1813_v60, %v5766_v39 }
 0xbd9   :  { %vm1903_vm14 = vmor %vm1901_vm13, %vm1902_vm12 }
 0xbda   :  { %1838 = vrot.lane.b32.xlu1 %v1836_v53, %s4991_s17  ;;  %v1898_v51 = vsub.f32 1.0, %v1897_v21  ;;  %v4480_v53 = vpop.eup %4479 }
 0xbdb   :  { %v1819_v21 = vadd.f32 1.0, %v4480_v53 }
 0xbdc   :  { %v1899_v35 = vmul.f32 %v4476_v32, %v1898_v51 }
 0xbdd   :  { %4481 = vrcp.f32 %v1819_v21  ;;  %vm1825_vm2 = vweird.f32 %v1819_v21  ;;  %v1829_v49 = vand.u32 2147483647, %v1819_v21 }
 0xbde   :  { %v1900_v54 = vadd.f32 %v4476_v32, %v1899_v35 }
 0xbdf   :  { %vm1830_vm4 = vcmp.eq.f32.partialorder %v1829_v49, 8.507059e+37 }
 0xbe0   :  { %v1904_v14 = vsel %vm1903_vm14, %v4476_v32, %v1900_v54  ;;  %v1831_v32 = vand.u32 2147483648, %v1819_v21 }
 0xbe1   :  { %v1909_v62 = vsel %vm1906_vm15, %v1908_v50, %v1904_v14 }
 0xbe2   :  { %v1939_v58 = vmul.f32 %v4478_v24, %v1909_v62  ;;  %v1832_v54 = vor.u32 1.1754944e-38, %v1831_v32  ;;  %v1938_v24 = vmul.f32 %v1909_v62, %v5761_v13 }
 0xbe3   :  { %v4482_v59 = vpop.eup %4481 }
 0xbe4   :  { %1941 = vrot.lane.b32.xlu0 %v1939_v58, %s4991_s17  ;;  %v1821_v17 = vmul.f32 %v4482_v59, %v1819_v21  ;;  %vm1826_vm1 = vweird.f32 %v4482_v59 }
 0xbe5   :  { %vm1827_vm3 = vmor %vm1825_vm2, %vm1826_vm1 }
 0xbe6   :  { %v1822_v26 = vsub.f32 1.0, %v1821_v17 }
 0xbe8   :  { %v1823_v63 = vmul.f32 %v4482_v59, %v1822_v26 }
 0xbea   :  { %v1824_v47 = vadd.f32 %v4482_v59, %v1823_v63 }
 0xbec   :  { %v1828_v35 = vsel %vm1827_vm3, %v4482_v59, %v1824_v47 }
 0xbed   :  { %v1833_v14 = vsel %vm1830_vm4, %v1832_v54, %v1828_v35 }
 0xc1f   :  { %v1916_v53 = vpop.permute.xlu2 %1915 }
 0xc20   :  { %v1917_v21 = vrot.slane %v1916_v53, 1  ;;  %v6740_v53 = vld [vmem:[#allocation19_spill] sm:$0xff] }
 0xc22   :  { %v4207_v59 = vmul.f32 -1.442695, %v1917_v21  ;;  %v6741_v21 = vld [vmem:[#allocation22_spill] sm:$0xff] }
 0xc4c   :  { %v1839_v51 = vpop.permute.xlu1 %1838 }
 0xc4d   :  { %v5930_v52 = vadd.f32 %v1839_v51, %v1835_v45 }
 0xc4f   :  { %4483 = vtanh.f32 %v5930_v52 }
 0xc55   :  { %v4484_v50 = vpop.eup %4483 }
 0xc56   :  { %v1843_v58 = vmul.f32 %v4484_v50, %v1833_v14  ;;  %v1942_v39 = vpop.permute.xlu0 %1941 }
 0xc57   :  { %v5934_v60 = vadd.f32 %v1942_v39, %v1938_v24  ;;  %v6738_v39 = vld [vmem:[#allocation14_spill] sm:$0xff] }
 0xc58   :  { %1952 = vrot.lane.b32.xlu1 %v1843_v58, %s4991_s17  ;;  %v6737_v58 = vld [vmem:[#allocation15_spill] sm:$0xff] }
 0xc59   :  { %4485 = vtanh.f32 %v5934_v60 }
 0xc5a   :  { %4487 = vpow2.f32 %v4207_v59  ;;  %v6742_v59 = vld [vmem:[#allocation23_spill] sm:$0xff] }
 0xc5f   :  { %v4486_v56 = vpop.eup %4485 }
 0xc60   :  { %1947 = vrot.lane.b32.xlu0 %v4486_v56, %s4991_s17  ;;  %v4488_v17 = vpop.eup %4487  ;;  %v6739_v56 = vld [vmem:[#allocation18_spill] sm:$0xff] }
 0xc61   :  { %v1922_v26 = vadd.f32 1.0, %v4488_v17  ;;  %v6743_v17 = vld [vmem:[#allocation24_spill] sm:$0xff] }
 0xc63   :  { %4489 = vrcp.f32 %v1922_v26  ;;  %v1934_v32 = vand.u32 2147483648, %v1922_v26  ;;  %vm1928_vm6 = vweird.f32 %v1922_v26  ;;  %v1932_v49 = vand.u32 2147483647, %v1922_v26 }
 0xc65   :  { %v1935_v54 = vor.u32 1.1754944e-38, %v1934_v32  ;;  %vm1933_vm8 = vcmp.eq.f32.partialorder %v1932_v49, 8.507059e+37 }
 0xc69   :  { %v4490_v63 = vpop.eup %4489 }
 0xc6a   :  { %v1924_v13 = vmul.f32 %v4490_v63, %v1922_v26  ;;  %vm1929_vm5 = vweird.f32 %v4490_v63 }
 0xc6b   :  { %vm1930_vm7 = vmor %vm1928_vm6, %vm1929_vm5 }
 0xc6c   :  { %v1925_v62 = vsub.f32 1.0, %v1924_v13 }
 0xc6e   :  { %v1926_v45 = vmul.f32 %v4490_v63, %v1925_v62 }
 0xc70   :  { %v1927_v47 = vadd.f32 %v4490_v63, %v1926_v45  ;;  %v4214_v45 = vld [vmem:[%s6615_s0 + $0x10] ss:$8 sm:$0x3] }
 0xc72   :  { %v1931_v35 = vsel %vm1930_vm7, %v4490_v63, %v1927_v47 }
 0xc73   :  { %v1936_v50 = vsel %vm1933_vm8, %v1935_v54, %v1931_v35 }
 0xcca   :  { %v1953_v51 = vpop.permute.xlu1 %1952 }
 0xccb   :  { %4208 = vmatmul.msk.f32.vlgmr.msrb.gmra.mxu0 %vm126_vm9, %v1953_v51  ;;  %4209 = vmatmul.msk.f32.vlgmr.msrb.gmra.mxu1 %vm126_vm9, %v1953_v51 }
 0xccc   :  { %2252 = vmatpush.msrb.mxu0 %v5822_v33  ;;  %2272 = vmatpush.msrb.mxu1 %v5825_v29 }
 0xcce   :  { %2253 = vmatpush.msrb.mxu0 %v5828_v5  ;;  %2273 = vmatpush.msrb.mxu1 %v5831_v48 }
 0xcd0   :  { %2254 = vmatpush.msrb.mxu0 %v5834_v15  ;;  %2274 = vmatpush.msrb.mxu1 %v5837_v38 }
 0xcd2   :  { %2255 = vmatpush.msrb.mxu0 %v5840_v34  ;;  %2275 = vmatpush.msrb.mxu1 %v5843_v18  ;;  %v1948_v14 = vpop.permute.xlu0 %1947 }
 0xcd3   :  { %v1950_v24 = vmul.f32 %v1948_v14, %v1936_v50  ;;  %v6744_v50 = vld [vmem:[#allocation20_spill] sm:$0xff] }
 0xcd4   :  { %2256 = vmatpush.msrb.mxu0 %v5848_v2  ;;  %2276 = vmatpush.msrb.mxu1 %v5851_v36 }
 0xcd5   :  { %4210 = vmatmul.msk.f32.vlgmr.msrb.gmra.mxu2 %vm126_vm9, %v1950_v24  ;;  %4211 = vmatmul.msk.f32.vlgmr.msrb.gmra.mxu3 %vm126_vm9, %v1950_v24 }
 0xcd6   :  { %4215 = vmatmul.msk.f32.vlgmr.msra.gmra.mxu0 %vm126_vm9, %v1950_v24  ;;  %4216 = vmatmul.msk.f32.vlgmr.msra.gmra.mxu1 %vm126_vm9, %v1950_v24 }
 0xcd7   :  { %2344 = vmatpush.msrb.mxu2 %v5772_v3  ;;  %2364 = vmatpush.msrb.mxu3 %v5775_v6 }
 0xcd8   :  { %2257 = vmatpush.msrb.mxu0 %v5854_v22  ;;  %2277 = vmatpush.msrb.mxu1 %v5857_v28 }
 0xcd9   :  { %2345 = vmatpush.msrb.mxu2 %v5778_v4  ;;  %2365 = vmatpush.msrb.mxu3 %v5781_v37 }
 0xcda   :  { %2258 = vmatpush.msrb.mxu0 %v5860_v23  ;;  %2278 = vmatpush.msrb.mxu1 %v5863_v25 }
 0xcdb   :  { %2346 = vmatpush.msrb.mxu2 %v5784_v9  ;;  %2366 = vmatpush.msrb.mxu3 %v5787_v19 }
 0xcdc   :  { %2259 = vmatpush.msrb.mxu0 %v5866_v30  ;;  %2279 = vmatpush.msrb.mxu1 %v5869_v31 }
 0xcdd   :  { %2347 = vmatpush.msrb.mxu2 %v5790_v10  ;;  %2367 = vmatpush.msrb.mxu3 %v5793_v8 }
 0xcde   :  { %2454 = vmatpush.msra.mxu0 %v5872_v57  ;;  %2474 = vmatpush.msra.mxu1 %v5875_v61 }
 0xcdf   :  { %2348 = vmatpush.msrb.mxu2 %v5796_v11  ;;  %2368 = vmatpush.msrb.mxu3 %v5799_v20 }
 0xce0   :  { %2455 = vmatpush.msra.mxu0 %v5878_v40  ;;  %2475 = vmatpush.msra.mxu1 %v5881_v0 }
 0xce1   :  { %2349 = vmatpush.msrb.mxu2 %v5802_v12  ;;  %2369 = vmatpush.msrb.mxu3 %v5805_v55 }
 0xce2   :  { %2456 = vmatpush.msra.mxu0 %v5884_v41  ;;  %2476 = vmatpush.msra.mxu1 %v5887_v42 }
 0xce3   :  { %2350 = vmatpush.msrb.mxu2 %v5808_v7  ;;  %2370 = vmatpush.msrb.mxu3 %v5811_v1 }
 0xce4   :  { %2457 = vmatpush.msra.mxu0 %v5890_v43  ;;  %2477 = vmatpush.msra.mxu1 %v5893_v44 }
 0xce5   :  { %2351 = vmatpush.msrb.mxu2 %v5814_v27  ;;  %2371 = vmatpush.msrb.mxu3 %v5817_v16 }
 0xce6   :  { %2458 = vmatpush.msra.mxu0 %v5896_v46  ;;  %2478 = vmatpush.msra.mxu1 %v6737_v58 }
 0xce8   :  { %2459 = vmatpush.msra.mxu0 %v6738_v39  ;;  %2479 = vmatpush.msra.mxu1 %v6739_v56 }
 0xcea   :  { %2460 = vmatpush.msra.mxu0 %v6740_v53  ;;  %2480 = vmatpush.msra.mxu1 %v6741_v21 }
 0xcec   :  { %2461 = vmatpush.msra.mxu0 %v6742_v59  ;;  %2481 = vmatpush.msra.mxu1 %v6743_v17 }
 0xd48   :  { %v1993_v26 = vpop.f32.mrf.mxu1  ;;  %v1973_v63 = vpop.f32.mrf.mxu0 }
 0xd53   :  { %v2128_v13 = vpop.f32.mrf.mxu1  ;;  %v2108_v51 = vpop.f32.mrf.mxu0 }
 0xd54   :  { %v2133_v62 = vrot.slane %v2128_v13, 7 }
 0xd56   :  { %v2134_v47 = vsel %vm173_vm0, %v2108_v51, %v2133_v62 }
 0xd57   :  { %v2136_v32 = vadd.f32 %v4214_v45, %v2134_v47 }
 0xd58   :  { %v2016_v49 = vpop.f32.mrf.mxu2  ;;  %v2036_v27 = vpop.f32.mrf.mxu3 }
 0xd59   :  { %v2017_v35 = vadd.f32 %v2016_v49, %v1973_v63  ;;  %2160 = vrot.lane.b32.xlu1 %v2136_v32, %s4991_s17  ;;  %v4217_v54 = vmul.f32 -1.442695, %v2136_v32  ;;  %v2037_v62 = vadd.f32 %v2036_v27, %v1993_v26  ;;  %v2157_v45 = vrot.slane %v2136_v32, 1  ;;  %v6745_v49 = vld [vmem:[#allocation21_spill] sm:$0xff] }
 0xd5b   :  { %v2039_v14 = vadd.f32 %v2017_v35, %v6744_v50  ;;  %4491 = vpow2.f32 %v4217_v54  ;;  %v2040_v53 = vadd.f32 %v2037_v62, %v6745_v49 }
 0xd5d   :  { %v4212_v24 = vmul.f32 -1.442695, %v2039_v14 }
 0xd5f   :  { %4493 = vpow2.f32 %v4212_v24 }
 0xd61   :  { %v4492_v17 = vpop.eup %4491 }
 0xd62   :  { %v2140_v13 = vadd.f32 1.0, %v4492_v17 }
 0xd64   :  { %4495 = vrcp.f32 %v2140_v13  ;;  %v2150_v35 = vand.u32 2147483647, %v2140_v13  ;;  %v2152_v54 = vand.u32 2147483648, %v2140_v13  ;;  %vm2146_vm11 = vweird.f32 %v2140_v13 }
 0xd65   :  { %v4494_v59 = vpop.eup %4493 }
 0xd66   :  { %v2044_v16 = vadd.f32 1.0, %v4494_v59  ;;  %vm2151_vm13 = vcmp.eq.f32.partialorder %v2150_v35, 8.507059e+37  ;;  %v2153_v59 = vor.u32 1.1754944e-38, %v2152_v54 }
 0xd68   :  { %4497 = vrcp.f32 %v2044_v16  ;;  %v2056_v27 = vand.u32 2147483648, %v2044_v16  ;;  %vm2050_vm15 = vweird.f32 %v2044_v16 }
 0xd69   :  { %4499 = vtanh.f32 %v2157_v45 }
 0xd6a   :  { %v4496_v21 = vpop.eup %4495  ;;  %4501 = vtanh.f32 %v2040_v53 }
 0xd6b   :  { %v2142_v51 = vmul.f32 %v4496_v21, %v2140_v13  ;;  %vm2147_vm10 = vweird.f32 %v4496_v21 }
 0xd6c   :  { %vm2148_vm12 = vmor %vm2146_vm11, %vm2147_vm10 }
 0xd6d   :  { %v2143_v63 = vsub.f32 1.0, %v2142_v51  ;;  %v2054_v51 = vand.u32 2147483647, %v2044_v16 }
 0xd6e   :  { %v4498_v47 = vpop.eup %4497 }
 0xd6f   :  { %v2144_v14 = vmul.f32 %v4496_v21, %v2143_v63  ;;  %v2046_v24 = vmul.f32 %v4498_v47, %v2044_v16  ;;  %vm2051_vm14 = vweird.f32 %v4498_v47  ;;  %v4500_v1 = vpop.eup %4499  ;;  %v2057_v63 = vor.u32 1.1754944e-38, %v2056_v27 }
 0xd70   :  { %vm2052_vm1 = vmor %vm2050_vm15, %vm2051_vm14  ;;  %vm2055_vm2 = vcmp.eq.f32.partialorder %v2054_v51, 8.507059e+37 }
 0xd71   :  { %v2145_v17 = vadd.f32 %v4496_v21, %v2144_v14  ;;  %v2047_v50 = vsub.f32 1.0, %v2046_v24  ;;  %v4502_v14 = vpop.eup %4501 }
 0xd73   :  { %v2149_v26 = vsel %vm2148_vm12, %v4496_v21, %v2145_v17  ;;  %v2048_v32 = vmul.f32 %v4498_v47, %v2047_v50  ;;  %v4213_v21 = vmul.f32 -1.442695, %v2040_v53 }
 0xd74   :  { %v2154_v62 = vsel %vm2151_vm13, %v2153_v59, %v2149_v26 }
 0xd75   :  { %v2184_v45 = vmul.f32 %v4500_v1, %v2154_v62  ;;  %v2049_v49 = vadd.f32 %v4498_v47, %v2048_v32  ;;  %4503 = vpow2.f32 %v4213_v21 }
 0xd77   :  { %2186 = vrot.lane.b32.xlu0 %v2184_v45, %s4991_s17  ;;  %v2053_v13 = vsel %vm2052_vm1, %v4498_v47, %v2049_v49 }
 0xd78   :  { %v2058_v24 = vsel %vm2055_vm2, %v2057_v63, %v2053_v13 }
 0xd79   :  { %v2081_v35 = vmul.f32 %v4502_v14, %v2058_v24  ;;  %v2080_v27 = vmul.f32 %v2058_v24, %v5930_v52  ;;  %v2183_v52 = vmul.f32 %v2154_v62, %v5934_v60 }
 0xd7b   :  { %2083 = vrot.lane.b32.xlu2 %v2081_v35, %s4991_s17  ;;  %v4504_v50 = vpop.eup %4503 }
 0xd7c   :  { %v2064_v54 = vadd.f32 1.0, %v4504_v50 }
 0xd7e   :  { %4505 = vrcp.f32 %v2064_v54  ;;  %v2076_v49 = vand.u32 2147483648, %v2064_v54  ;;  %vm2070_vm4 = vweird.f32 %v2064_v54  ;;  %v2074_v53 = vand.u32 2147483647, %v2064_v54 }
 0xd80   :  { %v2077_v45 = vor.u32 1.1754944e-38, %v2076_v49  ;;  %vm2075_vm6 = vcmp.eq.f32.partialorder %v2074_v53, 8.507059e+37 }
 0xd84   :  { %v4506_v17 = vpop.eup %4505 }
 0xd85   :  { %v2066_v1 = vmul.f32 %v4506_v17, %v2064_v54  ;;  %vm2071_vm3 = vweird.f32 %v4506_v17 }
 0xd86   :  { %vm2072_vm5 = vmor %vm2070_vm4, %vm2071_vm3 }
 0xd87   :  { %v2067_v59 = vsub.f32 1.0, %v2066_v1 }
 0xd89   :  { %v2068_v16 = vmul.f32 %v4506_v17, %v2067_v59 }
 0xd8b   :  { %v2069_v47 = vadd.f32 %v4506_v17, %v2068_v16 }
 0xd8d   :  { %v2073_v51 = vsel %vm2072_vm5, %v4506_v17, %v2069_v47 }
 0xd8e   :  { %v2078_v13 = vsel %vm2075_vm6, %v2077_v45, %v2073_v51 }
 0xdcb   :  { %v2161_v50 = vpop.permute.xlu1 %2160 }
 0xdcc   :  { %v2162_v54 = vrot.slane %v2161_v50, 1 }
 0xdce   :  { %v4218_v17 = vmul.f32 -1.442695, %v2162_v54 }
 0xdd5   :  { %v2084_v26 = vpop.permute.xlu2 %2083 }
 0xdd6   :  { %v6003_v32 = vadd.f32 %v2084_v26, %v2080_v27 }
 0xdd8   :  { %4507 = vtanh.f32 %v6003_v32 }
 0xdde   :  { %v4508_v63 = vpop.eup %4507 }
 0xddf   :  { %v2088_v14 = vmul.f32 %v4508_v63, %v2078_v13 }
 0xde1   :  { %2197 = vrot.lane.b32.xlu2 %v2088_v14, %s4991_s17 }
 0xde9   :  { %v2187_v24 = vpop.permute.xlu0 %2186 }
 0xdea   :  { %v6008_v35 = vadd.f32 %v2187_v24, %v2183_v52  ;;  %v4225_v24 = vld [vmem:[%s6615_s0 + $0x11] ss:$8 sm:$0x3] }
 0xdec   :  { %4509 = vtanh.f32 %v6008_v35 }
 0xded   :  { %4511 = vpow2.f32 %v4218_v17 }
 0xdf2   :  { %v4510_v21 = vpop.eup %4509 }
 0xdf3   :  { %2192 = vrot.lane.b32.xlu0 %v4510_v21, %s4991_s17  ;;  %v4512_v60 = vpop.eup %4511 }
 0xdf4   :  { %v2167_v62 = vadd.f32 1.0, %v4512_v60 }
 0xdf6   :  { %4513 = vrcp.f32 %v2167_v62  ;;  %v2179_v49 = vand.u32 2147483648, %v2167_v62  ;;  %vm2173_vm8 = vweird.f32 %v2167_v62  ;;  %v2177_v53 = vand.u32 2147483647, %v2167_v62 }
 0xdf8   :  { %v2180_v45 = vor.u32 1.1754944e-38, %v2179_v49  ;;  %vm2178_vm11 = vcmp.eq.f32.partialorder %v2177_v53, 8.507059e+37 }
 0xdfc   :  { %v4514_v59 = vpop.eup %4513 }
 0xdfd   :  { %v2169_v16 = vmul.f32 %v4514_v59, %v2167_v62  ;;  %vm2174_vm7 = vweird.f32 %v4514_v59 }
 0xdfe   :  { %vm2175_vm10 = vmor %vm2173_vm8, %vm2174_vm7 }
 0xdff   :  { %v2170_v27 = vsub.f32 1.0, %v2169_v16 }
 0xe01   :  { %v2171_v26 = vmul.f32 %v4514_v59, %v2170_v27 }
 0xe03   :  { %v2172_v47 = vadd.f32 %v4514_v59, %v2171_v26  ;;  %v6754_v26 = vld [vmem:[#allocation21_spill] sm:$0xff] }
 0xe05   :  { %v2176_v51 = vsel %vm2175_vm10, %v4514_v59, %v2172_v47 }
 0xe06   :  { %v2181_v63 = vsel %vm2178_vm11, %v2180_v45, %v2176_v51 }
 0xe3b   :  { %v2198_v1 = vpop.permute.xlu2 %2197 }
 0xe3c   :  { %4219 = vmatmul.msk.f32.vlgmr.msra.gmra.mxu2 %vm126_vm9, %v2198_v1  ;;  %4220 = vmatmul.msk.f32.vlgmr.msra.gmra.mxu3 %vm126_vm9, %v2198_v1 }
 0xe3d   :  { %2497 = vmatpush.msra.mxu2 %v5822_v33  ;;  %2517 = vmatpush.msra.mxu3 %v5825_v29 }
 0xe3f   :  { %2498 = vmatpush.msra.mxu2 %v5828_v5  ;;  %2518 = vmatpush.msra.mxu3 %v5831_v48 }
 0xe41   :  { %2499 = vmatpush.msra.mxu2 %v5834_v15  ;;  %2519 = vmatpush.msra.mxu3 %v5837_v38 }
 0xe43   :  { %2500 = vmatpush.msra.mxu2 %v5840_v34  ;;  %2520 = vmatpush.msra.mxu3 %v5843_v18 }
 0xe45   :  { %2501 = vmatpush.msra.mxu2 %v5848_v2  ;;  %2521 = vmatpush.msra.mxu3 %v5851_v36 }
 0xe47   :  { %2502 = vmatpush.msra.mxu2 %v5854_v22  ;;  %2522 = vmatpush.msra.mxu3 %v5857_v28 }
 0xe49   :  { %2503 = vmatpush.msra.mxu2 %v5860_v23  ;;  %2523 = vmatpush.msra.mxu3 %v5863_v25 }
 0xe4b   :  { %2504 = vmatpush.msra.mxu2 %v5866_v30  ;;  %2524 = vmatpush.msra.mxu3 %v5869_v31 }
 0xe65   :  { %v2193_v13 = vpop.permute.xlu0 %2192 }
 0xe66   :  { %v2195_v14 = vmul.f32 %v2193_v13, %v2181_v63 }
 0xe68   :  { %4221 = vmatmul.msk.f32.vlgmr.msrb.gmra.mxu0 %vm126_vm9, %v2195_v14  ;;  %4222 = vmatmul.msk.f32.vlgmr.msrb.gmra.mxu1 %vm126_vm9, %v2195_v14 }
 0xe69   :  { %4226 = vmatmul.msk.f32.vlgmr.msrb.gmra.mxu2 %vm126_vm9, %v2195_v14  ;;  %4227 = vmatmul.msk.f32.vlgmr.msrb.gmra.mxu3 %vm126_vm9, %v2195_v14 }
 0xe6a   :  { %2589 = vmatpush.msrb.mxu0 %v5772_v3  ;;  %2609 = vmatpush.msrb.mxu1 %v5775_v6  ;;  %v6746_v3 = vld [vmem:[#allocation13_spill] sm:$0xff]  ;;  %v6747_v6 = vld [vmem:[#allocation19_spill] sm:$0xff] }
 0xe6b   :  { %2699 = vmatpush.msrb.mxu2 %v5872_v57  ;;  %2719 = vmatpush.msrb.mxu3 %v5875_v61 }
 0xe6c   :  { %2590 = vmatpush.msrb.mxu0 %v5778_v4  ;;  %2610 = vmatpush.msrb.mxu1 %v5781_v37  ;;  %v6748_v4 = vld [vmem:[#allocation22_spill] sm:$0xff]  ;;  %v6749_v37 = vld [vmem:[#allocation16_spill] sm:$0xff] }
 0xe6d   :  { %2700 = vmatpush.msrb.mxu2 %v5878_v40  ;;  %2720 = vmatpush.msrb.mxu3 %v5881_v0 }
 0xe6e   :  { %2591 = vmatpush.msrb.mxu0 %v5784_v9  ;;  %2611 = vmatpush.msrb.mxu1 %v5787_v19  ;;  %v6750_v9 = vld [vmem:[#allocation17_spill] sm:$0xff]  ;;  %v6751_v19 = vld [vmem:[#allocation23_spill] sm:$0xff] }
 0xe6f   :  { %2701 = vmatpush.msrb.mxu2 %v5884_v41  ;;  %2721 = vmatpush.msrb.mxu3 %v5887_v42 }
 0xe70   :  { %2592 = vmatpush.msrb.mxu0 %v5790_v10  ;;  %2612 = vmatpush.msrb.mxu1 %v5793_v8  ;;  %v6752_v10 = vld [vmem:[#allocation24_spill] sm:$0xff] }
 0xe71   :  { %2702 = vmatpush.msrb.mxu2 %v5890_v43  ;;  %2722 = vmatpush.msrb.mxu3 %v5893_v44 }
 0xe72   :  { %2593 = vmatpush.msrb.mxu0 %v5796_v11  ;;  %2613 = vmatpush.msrb.mxu1 %v5799_v20 }
 0xe73   :  { %2703 = vmatpush.msrb.mxu2 %v5896_v46  ;;  %2723 = vmatpush.msrb.mxu3 %v6737_v58 }
 0xe74   :  { %2594 = vmatpush.msrb.mxu0 %v5802_v12  ;;  %2614 = vmatpush.msrb.mxu1 %v5805_v55  ;;  %v6753_v55 = vld [vmem:[#allocation20_spill] sm:$0xff] }
 0xe75   :  { %2704 = vmatpush.msrb.mxu2 %v6738_v39  ;;  %2724 = vmatpush.msrb.mxu3 %v6739_v56 }
 0xe76   :  { %2595 = vmatpush.msrb.mxu0 %v5808_v7  ;;  %2615 = vmatpush.msrb.mxu1 %v6746_v3 }
 0xe77   :  { %2705 = vmatpush.msrb.mxu2 %v6747_v6  ;;  %2725 = vmatpush.msrb.mxu3 %v6748_v4 }
 0xe78   :  { %2596 = vmatpush.msrb.mxu0 %v6749_v37  ;;  %2616 = vmatpush.msrb.mxu1 %v6750_v9 }
 0xe79   :  { %2706 = vmatpush.msrb.mxu2 %v6751_v19  ;;  %2726 = vmatpush.msrb.mxu3 %v6752_v10 }
 0xebf   :  { %v2238_v8 = vpop.f32.mrf.mxu3  ;;  %v2218_v11 = vpop.f32.mrf.mxu2 }
 0xee5   :  { %v2261_v20 = vpop.f32.mrf.mxu0  ;;  %v2281_v62 = vpop.f32.mrf.mxu1 }
 0xee6   :  { %v2262_v12 = vadd.f32 %v2261_v20, %v2218_v11  ;;  %v2282_v59 = vadd.f32 %v2281_v62, %v2238_v8 }
 0xee8   :  { %v2284_v7 = vadd.f32 %v2262_v12, %v6753_v55  ;;  %v2285_v47 = vadd.f32 %v2282_v59, %v6754_v26 }
 0xeea   :  { %v4223_v39 = vmul.f32 -1.442695, %v2284_v7 }
 0xeec   :  { %4515 = vpow2.f32 %v4223_v39  ;;  %v2373_v56 = vpop.f32.mrf.mxu3  ;;  %v2353_v21 = vpop.f32.mrf.mxu2 }
 0xeed   :  { %v2378_v52 = vrot.slane %v2373_v56, 7 }
 0xeef   :  { %v2379_v50 = vsel %vm173_vm0, %v2353_v21, %v2378_v52 }
 0xef0   :  { %v2381_v54 = vadd.f32 %v4225_v24, %v2379_v50 }
 0xef2   :  { %v4516_v17 = vpop.eup %4515  ;;  %2405 = vrot.lane.b32.xlu0 %v2381_v54, %s4991_s17  ;;  %v4228_v1 = vmul.f32 -1.442695, %v2381_v54  ;;  %v2402_v6 = vrot.slane %v2381_v54, 1  ;;  %v4224_v54 = vmul.f32 -1.442695, %v2285_v47 }
 0xef3   :  { %v2289_v60 = vadd.f32 1.0, %v4516_v17 }
 0xef4   :  { %4517 = vpow2.f32 %v4228_v1 }
 0xef5   :  { %4519 = vrcp.f32 %v2289_v60  ;;  %v2301_v45 = vand.u32 2147483648, %v2289_v60  ;;  %v2299_v13 = vand.u32 2147483647, %v2289_v60  ;;  %vm2295_vm13 = vweird.f32 %v2289_v60 }
 0xef7   :  { %v2302_v4 = vor.u32 1.1754944e-38, %v2301_v45  ;;  %vm2300_vm15 = vcmp.eq.f32.partialorder %v2299_v13, 8.507059e+37 }
 0xefa   :  { %v4518_v16 = vpop.eup %4517 }
 0xefb   :  { %v4520_v27 = vpop.eup %4519  ;;  %v2385_v49 = vadd.f32 1.0, %v4518_v16 }
 0xefc   :  { %v2291_v53 = vmul.f32 %v4520_v27, %v2289_v60  ;;  %vm2296_vm12 = vweird.f32 %v4520_v27 }
 0xefd   :  { %4521 = vrcp.f32 %v2385_v49  ;;  %vm2297_vm14 = vmor %vm2295_vm13, %vm2296_vm12  ;;  %v2397_v20 = vand.u32 2147483648, %v2385_v49  ;;  %v2395_v7 = vand.u32 2147483647, %v2385_v49  ;;  %vm2391_vm2 = vweird.f32 %v2385_v49 }
 0xefe   :  { %v2292_v51 = vsub.f32 1.0, %v2291_v53  ;;  %4523 = vtanh.f32 %v2285_v47 }
 0xeff   :  { %4525 = vtanh.f32 %v2402_v6  ;;  %v2398_v56 = vor.u32 1.1754944e-38, %v2397_v20  ;;  %vm2396_vm4 = vcmp.eq.f32.partialorder %v2395_v7, 8.507059e+37  ;;  %v6118_v20 = vld [vmem:[#allocation3 + $0x68] sm:$0xff]  ;;  %v6126_v7 = vld [vmem:[#allocation3 + $0x58] sm:$0xff] }
 0xf00   :  { %v2293_v63 = vmul.f32 %v4520_v27, %v2292_v51  ;;  %4527 = vpow2.f32 %v4224_v54 }
 0xf02   :  { %v2294_v14 = vadd.f32 %v4520_v27, %v2293_v63 }
 0xf03   :  { %v4522_v3 = vpop.eup %4521 }
 0xf04   :  { %v2298_v37 = vsel %vm2297_vm14, %v4520_v27, %v2294_v14  ;;  %v2387_v9 = vmul.f32 %v4522_v3, %v2385_v49  ;;  %v4524_v19 = vpop.eup %4523  ;;  %vm2392_vm1 = vweird.f32 %v4522_v3 }
 0xf05   :  { %v2303_v10 = vsel %vm2300_vm15, %v2302_v4, %v2298_v37  ;;  %vm2393_vm3 = vmor %vm2391_vm2, %vm2392_vm1  ;;  %v4526_v24 = vpop.eup %4525 }
 0xf06   :  { %v2326_v8 = vmul.f32 %v4524_v19, %v2303_v10  ;;  %v2388_v11 = vsub.f32 1.0, %v2387_v9  ;;  %v4528_v17 = vpop.eup %4527  ;;  %v2325_v27 = vmul.f32 %v2303_v10, %v6003_v32 }
 0xf07   :  { %v2309_v1 = vadd.f32 1.0, %v4528_v17 }
 0xf08   :  { %2328 = vrot.lane.b32.xlu2 %v2326_v8, %s4991_s17  ;;  %v2389_v12 = vmul.f32 %v4522_v3, %v2388_v11  ;;  %v6115_v11 = vld [vmem:[#allocation3 + $0x60] sm:$0xff] }
 0xf09   :  { %4529 = vrcp.f32 %v2309_v1  ;;  %v2321_v45 = vand.u32 2147483648, %v2309_v1  ;;  %vm2315_vm6 = vweird.f32 %v2309_v1  ;;  %v2319_v47 = vand.u32 2147483647, %v2309_v1 }
 0xf0a   :  { %v2390_v39 = vadd.f32 %v4522_v3, %v2389_v12  ;;  %v6123_v12 = vld [vmem:[#allocation3 + $0x50] sm:$0xff] }
 0xf0b   :  { %v2322_v13 = vor.u32 1.1754944e-38, %v2321_v45  ;;  %vm2320_vm8 = vcmp.eq.f32.partialorder %v2319_v47, 8.507059e+37 }
 0xf0c   :  { %v2394_v52 = vsel %vm2393_vm3, %v4522_v3, %v2390_v39  ;;  %v6159_v39 = vld [vmem:[#allocation3 + $0x10] sm:$0xff] }
 0xf0d   :  { %v2399_v21 = vsel %vm2396_vm4, %v2398_v56, %v2394_v52  ;;  %v6168_v56 = vld [vmem:[#allocation8 + $0x18] sm:$0xff]  ;;  %v6171_v52 = vld [vmem:[#allocation3] sm:$0xff] }
 0xf0e   :  { %v2429_v50 = vmul.f32 %v4526_v24, %v2399_v21  ;;  %v2428_v32 = vmul.f32 %v2399_v21, %v6008_v35  ;;  %6758 = vst [vmem:[#allocation13_spill] sm:$0xff] %v6168_v56  ;;  %v6174_v24 = vld [vmem:[#allocation3 + $0x8] sm:$0xff]  ;;  %v6177_v21 = vld [vmem:[#allocation8] sm:$0xff] }
 0xf0f   :  { %v4530_v60 = vpop.eup %4529  ;;  %6759 = vst [vmem:[#allocation19_spill] sm:$0xff] %v6177_v21 }
 0xf10   :  { %2431 = vrot.lane.b32.xlu1 %v2429_v50, %s4991_s17  ;;  %v2311_v62 = vmul.f32 %v4530_v60, %v2309_v1  ;;  %vm2316_vm5 = vweird.f32 %v4530_v60  ;;  %v6180_v50 = vld [vmem:[#allocation8 + $0x8] sm:$0xff] }
 0xf11   :  { %vm2317_vm7 = vmor %vm2315_vm6, %vm2316_vm5  ;;  %6760 = vst [vmem:[#allocation22_spill] sm:$0xff] %v6180_v50 }
 0xf12   :  { %v2312_v59 = vsub.f32 1.0, %v2311_v62  ;;  %v4236_v62 = vld [vmem:[%s6615_s0 + $0x12] ss:$8 sm:$0x3] }
 0xf14   :  { %v2313_v16 = vmul.f32 %v4530_v60, %v2312_v59 }
 0xf16   :  { %v2314_v51 = vadd.f32 %v4530_v60, %v2313_v16 }
 0xf18   :  { %v2318_v63 = vsel %vm2317_vm7, %v4530_v60, %v2314_v51 }
 0xf19   :  { %v2323_v3 = vsel %vm2320_vm8, %v2322_v13, %v2318_v63 }
 0xf62   :  { %v2329_v49 = vpop.permute.xlu2 %2328 }
 0xf63   :  { %v6076_v53 = vadd.f32 %v2329_v49, %v2325_v27 }
 0xf64   :  { %v2406_v10 = vpop.permute.xlu0 %2405 }
 0xf65   :  { %4531 = vtanh.f32 %v6076_v53  ;;  %v2407_v35 = vrot.slane %v2406_v10, 1 }
 0xf67   :  { %v4229_v8 = vmul.f32 -1.442695, %v2407_v35 }
 0xf6b   :  { %v4532_v14 = vpop.eup %4531 }
 0xf6c   :  { %v2333_v6 = vmul.f32 %v4532_v14, %v2323_v3 }
 0xf6e   :  { %2442 = vrot.lane.b32.xlu2 %v2333_v6, %s4991_s17 }
 0xf82   :  { %v2432_v4 = vpop.permute.xlu1 %2431 }
 0xf83   :  { %v6081_v37 = vadd.f32 %v2432_v4, %v2428_v32 }
 0xf85   :  { %4533 = vtanh.f32 %v6081_v37 }
 0xf86   :  { %4535 = vpow2.f32 %v4229_v8 }
 0xf8b   :  { %v4534_v9 = vpop.eup %4533 }
 0xf8c   :  { %2437 = vrot.lane.b32.xlu1 %v4534_v9, %s4991_s17 }
 0xfc8   :  { %v2443_v19 = vpop.permute.xlu2 %2442 }
 0xfc9   :  { %4230 = vmatmul.msk.f32.vlgmr.msra.gmra.mxu0 %vm126_vm9, %v2443_v19  ;;  %4231 = vmatmul.msk.f32.vlgmr.msra.gmra.mxu1 %vm126_vm9, %v2443_v19 }
 0xfca   :  { %2742 = vmatpush.msra.mxu0 %v5822_v33  ;;  %2762 = vmatpush.msra.mxu1 %v5825_v29  ;;  %v4536_v33 = vpop.eup %4535 }
 0xfcb   :  { %v2412_v29 = vadd.f32 1.0, %v4536_v33 }
 0xfcc   :  { %2743 = vmatpush.msra.mxu0 %v5828_v5  ;;  %2763 = vmatpush.msra.mxu1 %v5831_v48 }
 0xfcd   :  { %4537 = vrcp.f32 %v2412_v29  ;;  %vm2418_vm11 = vweird.f32 %v2412_v29 }
 0xfce   :  { %2744 = vmatpush.msra.mxu0 %v5834_v15  ;;  %2764 = vmatpush.msra.mxu1 %v5837_v38 }
 0xfd0   :  { %2745 = vmatpush.msra.mxu0 %v5840_v34  ;;  %2765 = vmatpush.msra.mxu1 %v5843_v18  ;;  %v2424_v18 = vand.u32 2147483648, %v2412_v29 }
 0xfd2   :  { %2746 = vmatpush.msra.mxu0 %v5848_v2  ;;  %2766 = vmatpush.msra.mxu1 %v5851_v36  ;;  %v2422_v2 = vand.u32 2147483647, %v2412_v29 }
 0xfd3   :  { %v4538_v5 = vpop.eup %4537 }
 0xfd4   :  { %2747 = vmatpush.msra.mxu0 %v5854_v22  ;;  %2767 = vmatpush.msra.mxu1 %v5857_v28  ;;  %v2414_v48 = vmul.f32 %v4538_v5, %v2412_v29  ;;  %vm2419_vm10 = vweird.f32 %v4538_v5  ;;  %v2425_v22 = vor.u32 1.1754944e-38, %v2424_v18  ;;  %vm2423_vm13 = vcmp.eq.f32.partialorder %v2422_v2, 8.507059e+37 }
 0xfd5   :  { %vm2420_vm12 = vmor %vm2418_vm11, %vm2419_vm10 }
 0xfd6   :  { %2748 = vmatpush.msra.mxu0 %v5860_v23  ;;  %2768 = vmatpush.msra.mxu1 %v5863_v25  ;;  %v2415_v15 = vsub.f32 1.0, %v2414_v48 }
 0xfd8   :  { %2749 = vmatpush.msra.mxu0 %v5866_v30  ;;  %2769 = vmatpush.msra.mxu1 %v5869_v31  ;;  %v2416_v38 = vmul.f32 %v4538_v5, %v2415_v15  ;;  %v6107_v30 = vld [vmem:[#allocation3 + $0x70] sm:$0xff]  ;;  %v6110_v31 = vld [vmem:[#allocation3 + $0x78] sm:$0xff] }
 0xfda   :  { %v2417_v34 = vadd.f32 %v4538_v5, %v2416_v38 }
 0xfdc   :  { %v2421_v36 = vsel %vm2420_vm12, %v4538_v5, %v2417_v34 }
 0xfdd   :  { %v2426_v28 = vsel %vm2423_vm13, %v2425_v22, %v2421_v36 }
 0xffe   :  { %v2438_v23 = vpop.permute.xlu1 %2437 }
 0xfff   :  { %v2440_v25 = vmul.f32 %v2438_v23, %v2426_v28 }
0x1001   :  { %4232 = vmatmul.msk.f32.vlgmr.msra.gmra.mxu2 %vm126_vm9, %v2440_v25  ;;  %4233 = vmatmul.msk.f32.vlgmr.msra.gmra.mxu3 %vm126_vm9, %v2440_v25 }
0x1002   :  { %4237 = vmatmul.msk.f32.vlgmr.msrb.gmra.mxu0 %vm126_vm9, %v2440_v25  ;;  %4238 = vmatmul.msk.f32.vlgmr.msrb.gmra.mxu1 %vm126_vm9, %v2440_v25 }
0x1003   :  { %2848 = vmatpush.msra.mxu2 %v6107_v30  ;;  %2868 = vmatpush.msra.mxu3 %v6110_v31 }
0x1004   :  { %2958 = vmatpush.msrb.mxu0 %v5872_v57  ;;  %2978 = vmatpush.msrb.mxu1 %v5875_v61  ;;  %v6131_v57 = vld [vmem:[#allocation3 + $0x40] sm:$0xff]  ;;  %v6134_v61 = vld [vmem:[#allocation3 + $0x48] sm:$0xff] }
0x1005   :  { %2849 = vmatpush.msra.mxu2 %v6115_v11  ;;  %2869 = vmatpush.msra.mxu3 %v6118_v20 }
0x1006   :  { %2959 = vmatpush.msrb.mxu0 %v5878_v40  ;;  %2979 = vmatpush.msrb.mxu1 %v5881_v0  ;;  %v6139_v40 = vld [vmem:[#allocation3 + $0x30] sm:$0xff]  ;;  %v6142_v0 = vld [vmem:[#allocation3 + $0x38] sm:$0xff] }
0x1007   :  { %2850 = vmatpush.msra.mxu2 %v6123_v12  ;;  %2870 = vmatpush.msra.mxu3 %v6126_v7 }
0x1008   :  { %2960 = vmatpush.msrb.mxu0 %v5884_v41  ;;  %2980 = vmatpush.msrb.mxu1 %v5887_v42  ;;  %v6147_v41 = vld [vmem:[#allocation3 + $0x20] sm:$0xff]  ;;  %v6150_v42 = vld [vmem:[#allocation3 + $0x28] sm:$0xff] }
0x1009   :  { %2851 = vmatpush.msra.mxu2 %v6131_v57  ;;  %2871 = vmatpush.msra.mxu3 %v6134_v61 }
0x100a   :  { %2961 = vmatpush.msrb.mxu0 %v5890_v43  ;;  %2981 = vmatpush.msrb.mxu1 %v5893_v44  ;;  %v6153_v43 = vld [vmem:[#allocation8 + $0x20] sm:$0xff]  ;;  %v6156_v44 = vld [vmem:[#allocation8 + $0x28] sm:$0xff] }
0x100b   :  { %2852 = vmatpush.msra.mxu2 %v6139_v40  ;;  %2872 = vmatpush.msra.mxu3 %v6142_v0  ;;  %6755 = vst [vmem:[#allocation15_spill] sm:$0xff] %v6153_v43 }
0x100c   :  { %2962 = vmatpush.msrb.mxu0 %v5896_v46  ;;  %2982 = vmatpush.msrb.mxu1 %v6737_v58  ;;  %6756 = vst [vmem:[#allocation14_spill] sm:$0xff] %v6156_v44  ;;  %v6162_v46 = vld [vmem:[#allocation3 + $0x18] sm:$0xff]  ;;  %v6165_v58 = vld [vmem:[#allocation8 + $0x10] sm:$0xff] }
0x100d   :  { %2853 = vmatpush.msra.mxu2 %v6147_v41  ;;  %2873 = vmatpush.msra.mxu3 %v6150_v42  ;;  %6757 = vst [vmem:[#allocation18_spill] sm:$0xff] %v6165_v58 }
0x100e   :  { %2963 = vmatpush.msrb.mxu0 %v6153_v43  ;;  %2983 = vmatpush.msrb.mxu1 %v6156_v44 }
0x100f   :  { %2854 = vmatpush.msra.mxu2 %v6159_v39  ;;  %2874 = vmatpush.msra.mxu3 %v6162_v46 }
0x1010   :  { %2964 = vmatpush.msrb.mxu0 %v6165_v58  ;;  %2984 = vmatpush.msrb.mxu1 %v6168_v56 }
0x1011   :  { %2855 = vmatpush.msra.mxu2 %v6171_v52  ;;  %2875 = vmatpush.msra.mxu3 %v6174_v24 }
0x1012   :  { %2965 = vmatpush.msrb.mxu0 %v6177_v21  ;;  %2985 = vmatpush.msrb.mxu1 %v6180_v50 }
0x1046   :  { %v2483_v54 = vpop.f32.mrf.mxu1  ;;  %v2463_v17 = vpop.f32.mrf.mxu0 }
0x107f   :  { %v2618_v1 = vpop.f32.mrf.mxu1  ;;  %v2598_v59 = vpop.f32.mrf.mxu0 }
0x1080   :  { %v2623_v60 = vrot.slane %v2618_v1, 7 }
0x1082   :  { %v2624_v16 = vsel %vm173_vm0, %v2598_v59, %v2623_v60 }
0x1083   :  { %v2626_v27 = vadd.f32 %v4236_v62, %v2624_v16 }
0x1084   :  { %v2506_v49 = vpop.f32.mrf.mxu2  ;;  %v2526_v32 = vpop.f32.mrf.mxu3 }
0x1085   :  { %v2507_v51 = vadd.f32 %v2506_v49, %v2463_v17  ;;  %2650 = vrot.lane.b32.xlu2 %v2626_v27, %s4991_s17  ;;  %v4239_v45 = vmul.f32 -1.442695, %v2626_v27  ;;  %v2527_v9 = vadd.f32 %v2526_v32, %v2483_v54  ;;  %v2647_v19 = vrot.slane %v2626_v27, 1 }
0x1087   :  { %v2529_v47 = vadd.f32 %v2507_v51, %v6753_v55  ;;  %4539 = vpow2.f32 %v4239_v45  ;;  %v2530_v33 = vadd.f32 %v2527_v9, %v6754_v26 }
0x1089   :  { %v4234_v63 = vmul.f32 -1.442695, %v2529_v47  ;;  %v4235_v27 = vmul.f32 -1.442695, %v2530_v33 }
0x108b   :  { %4541 = vpow2.f32 %v4234_v63 }
0x108d   :  { %v4540_v13 = vpop.eup %4539 }
0x108e   :  { %v2630_v14 = vadd.f32 1.0, %v4540_v13 }
0x1090   :  { %4543 = vrcp.f32 %v2630_v14  ;;  %v2640_v29 = vand.u32 2147483647, %v2630_v14  ;;  %v2642_v5 = vand.u32 2147483648, %v2630_v14  ;;  %vm2636_vm15 = vweird.f32 %v2630_v14 }
0x1091   :  { %v4542_v3 = vpop.eup %4541 }
0x1092   :  { %v2534_v6 = vadd.f32 1.0, %v4542_v3  ;;  %vm2641_vm2 = vcmp.eq.f32.partialorder %v2640_v29, 8.507059e+37  ;;  %v2643_v18 = vor.u32 1.1754944e-38, %v2642_v5 }
0x1094   :  { %4545 = vrcp.f32 %v2534_v6  ;;  %v2546_v2 = vand.u32 2147483648, %v2534_v6  ;;  %v2544_v28 = vand.u32 2147483647, %v2534_v6  ;;  %vm2540_vm4 = vweird.f32 %v2534_v6 }
0x1095   :  { %4547 = vtanh.f32 %v2647_v19 }
0x1096   :  { %v4544_v4 = vpop.eup %4543  ;;  %4549 = vtanh.f32 %v2530_v33  ;;  %v2547_v1 = vor.u32 1.1754944e-38, %v2546_v2  ;;  %vm2545_vm6 = vcmp.eq.f32.partialorder %v2544_v28, 8.507059e+37 }
0x1097   :  { %v2632_v10 = vmul.f32 %v4544_v4, %v2630_v14  ;;  %vm2637_vm14 = vweird.f32 %v4544_v4  ;;  %4551 = vpow2.f32 %v4235_v27  ;;  %v6210_v27 = vld [vmem:[#allocation6 + $0x70] sm:$0xff] }
0x1098   :  { %vm2638_vm1 = vmor %vm2636_vm15, %vm2637_vm14 }
0x1099   :  { %v2633_v35 = vsub.f32 1.0, %v2632_v10 }
0x109a   :  { %v4546_v8 = vpop.eup %4545 }
0x109b   :  { %v2634_v48 = vmul.f32 %v4544_v4, %v2633_v35  ;;  %v2536_v15 = vmul.f32 %v4546_v8, %v2534_v6  ;;  %vm2541_vm3 = vweird.f32 %v4546_v8  ;;  %v4548_v23 = vpop.eup %4547 }
0x109c   :  { %vm2542_vm5 = vmor %vm2540_vm4, %vm2541_vm3  ;;  %v4550_v62 = vpop.eup %4549 }
0x109d   :  { %v2635_v38 = vadd.f32 %v4544_v4, %v2634_v48  ;;  %v2537_v34 = vsub.f32 1.0, %v2536_v15  ;;  %v4552_v49 = vpop.eup %4551 }
0x109e   :  { %v2554_v51 = vadd.f32 1.0, %v4552_v49  ;;  %v6213_v49 = vld [vmem:[#allocation6 + $0x78] sm:$0xff] }
0x109f   :  { %v2639_v36 = vsel %vm2638_vm1, %v4544_v4, %v2635_v38  ;;  %v2538_v22 = vmul.f32 %v4546_v8, %v2537_v34 }
0x10a0   :  { %v2644_v25 = vsel %vm2641_vm2, %v2643_v18, %v2639_v36  ;;  %4553 = vrcp.f32 %v2554_v51  ;;  %v2566_v10 = vand.u32 2147483648, %v2554_v51  ;;  %vm2560_vm8 = vweird.f32 %v2554_v51 }
0x10a1   :  { %v2674_v54 = vmul.f32 %v4548_v23, %v2644_v25  ;;  %v2539_v17 = vadd.f32 %v4546_v8, %v2538_v22  ;;  %v2673_v13 = vmul.f32 %v2644_v25, %v6081_v37  ;;  %v2564_v35 = vand.u32 2147483647, %v2554_v51 }
0x10a2   :  { %v2567_v33 = vor.u32 1.1754944e-38, %v2566_v10  ;;  %v6258_v10 = vld [vmem:[#allocation6 + $0x10] sm:$0xff] }
0x10a3   :  { %2676 = vrot.lane.b32.xlu1 %v2674_v54, %s4991_s17  ;;  %v2543_v60 = vsel %vm2542_vm5, %v4546_v8, %v2539_v17  ;;  %vm2565_vm11 = vcmp.eq.f32.partialorder %v2564_v35, 8.507059e+37  ;;  %v6261_v35 = vld [vmem:[#allocation6 + $0x18] sm:$0xff] }
0x10a4   :  { %v2548_v59 = vsel %vm2545_vm6, %v2547_v1, %v2543_v60 }
0x10a5   :  { %v2571_v16 = vmul.f32 %v4550_v62, %v2548_v59  ;;  %v2570_v32 = vmul.f32 %v2548_v59, %v6076_v53 }
0x10a6   :  { %v4554_v45 = vpop.eup %4553 }
0x10a7   :  { %2573 = vrot.lane.b32.xlu0 %v2571_v16, %s4991_s17  ;;  %v2556_v47 = vmul.f32 %v4554_v45, %v2554_v51  ;;  %vm2561_vm7 = vweird.f32 %v4554_v45  ;;  %v6218_v51 = vld [vmem:[#allocation6 + $0x60] sm:$0xff] }
0x10a8   :  { %vm2562_vm10 = vmor %vm2560_vm8, %vm2561_vm7 }
0x10a9   :  { %v2557_v63 = vsub.f32 1.0, %v2556_v47  ;;  %v6226_v47 = vld [vmem:[#allocation6 + $0x50] sm:$0xff] }
0x10ab   :  { %v2558_v6 = vmul.f32 %v4554_v45, %v2557_v63  ;;  %v6229_v63 = vld [vmem:[#allocation6 + $0x58] sm:$0xff] }
0x10ad   :  { %v2559_v19 = vadd.f32 %v4554_v45, %v2558_v6  ;;  %v6242_v6 = vld [vmem:[#allocation6 + $0x30] sm:$0xff] }
0x10af   :  { %v2563_v37 = vsel %vm2562_vm10, %v4554_v45, %v2559_v19  ;;  %v6221_v45 = vld [vmem:[#allocation6 + $0x68] sm:$0xff] }
0x10b0   :  { %v2568_v5 = vsel %vm2565_vm11, %v2567_v33, %v2563_v37  ;;  %v6253_v19 = vld [vmem:[#allocation6 + $0x28] sm:$0xff]  ;;  %v6272_v33 = vld [vmem:[#allocation8 + $0x70] sm:$0xff] }
0x10b1   :  { %v6269_v37 = vld [vmem:[#allocation6 + $0x8] sm:$0xff] }
0x10df   :  { %v2651_v48 = vpop.permute.xlu2 %2650 }
0x10e0   :  { %v2652_v15 = vrot.slane %v2651_v48, 1  ;;  %v6284_v48 = vld [vmem:[#allocation8 + $0x50] sm:$0xff] }
0x10e2   :  { %v4240_v38 = vmul.f32 -1.442695, %v2652_v15  ;;  %v6287_v15 = vld [vmem:[#allocation8 + $0x58] sm:$0xff] }
0x1115   :  { %v2677_v14 = vpop.permute.xlu1 %2676 }
0x1116   :  { %v6193_v3 = vadd.f32 %v2677_v14, %v2673_v13  ;;  %v6234_v13 = vld [vmem:[#allocation6 + $0x40] sm:$0xff]  ;;  %v6237_v14 = vld [vmem:[#allocation6 + $0x48] sm:$0xff] }
0x1118   :  { %4555 = vtanh.f32 %v6193_v3 }
0x1119   :  { %v2574_v4 = vpop.permute.xlu0 %2573 }
0x111a   :  { %v6197_v9 = vadd.f32 %v2574_v4, %v2570_v32  ;;  %v6245_v32 = vld [vmem:[#allocation6 + $0x38] sm:$0xff]  ;;  %v6250_v4 = vld [vmem:[#allocation6 + $0x20] sm:$0xff] }
0x111c   :  { %4557 = vtanh.f32 %v6197_v9 }
0x111d   :  { %4559 = vpow2.f32 %v4240_v38  ;;  %v6290_v38 = vld [vmem:[#allocation8 + $0x40] sm:$0xff] }
0x111e   :  { %v4556_v8 = vpop.eup %4555 }
0x111f   :  { %2682 = vrot.lane.b32.xlu1 %v4556_v8, %s4991_s17  ;;  %v6266_v8 = vld [vmem:[#allocation6] sm:$0xff] }
0x1122   :  { %v4558_v29 = vpop.eup %4557 }
0x1123   :  { %v2578_v53 = vmul.f32 %v4558_v29, %v2568_v5  ;;  %v4560_v34 = vpop.eup %4559  ;;  %v6275_v29 = vld [vmem:[#allocation8 + $0x78] sm:$0xff]  ;;  %v6278_v5 = vld [vmem:[#allocation8 + $0x60] sm:$0xff] }
0x1124   :  { %v2657_v18 = vadd.f32 1.0, %v4560_v34  ;;  %v6293_v34 = vld [vmem:[#allocation8 + $0x48] sm:$0xff] }
0x1125   :  { %2687 = vrot.lane.b32.xlu0 %v2578_v53, %s4991_s17  ;;  %v6281_v53 = vld [vmem:[#allocation8 + $0x68] sm:$0xff] }
0x1126   :  { %4561 = vrcp.f32 %v2657_v18  ;;  %v2669_v25 = vand.u32 2147483648, %v2657_v18  ;;  %vm2663_vm13 = vweird.f32 %v2657_v18  ;;  %v2667_v54 = vand.u32 2147483647, %v2657_v18 }
0x1128   :  { %v2670_v1 = vor.u32 1.1754944e-38, %v2669_v25  ;;  %vm2668_vm15 = vcmp.eq.f32.partialorder %v2667_v54, 8.507059e+37 }
0x112c   :  { %v4562_v2 = vpop.eup %4561 }
0x112d   :  { %v2659_v36 = vmul.f32 %v4562_v2, %v2657_v18  ;;  %vm2664_vm12 = vweird.f32 %v4562_v2  ;;  %v6296_v18 = vld [vmem:[#allocation8 + $0x30] sm:$0xff] }
0x112e   :  { %vm2665_vm14 = vmor %vm2663_vm13, %vm2664_vm12 }
0x112f   :  { %v2660_v22 = vsub.f32 1.0, %v2659_v36 }
0x1131   :  { %v2661_v28 = vmul.f32 %v4562_v2, %v2660_v22 }
0x1133   :  { %v2662_v23 = vadd.f32 %v4562_v2, %v2661_v28 }
0x1135   :  { %v2666_v17 = vsel %vm2665_vm14, %v4562_v2, %v2662_v23  ;;  %v6299_v2 = vld [vmem:[#allocation8 + $0x38] sm:$0xff] }
0x1136   :  { %v2671_v60 = vsel %vm2668_vm15, %v2670_v1, %v2666_v17  ;;  %6761 = vst [vmem:[#allocation16_spill] sm:$0xff] %v6299_v2 }
0x1191   :  { %v2683_v62 = vpop.permute.xlu1 %2682 }
0x1192   :  { %v2685_v59 = vmul.f32 %v2683_v62, %v2671_v60  ;;  %v4247_v60 = vld [vmem:[%s6615_s0 + $0x13] ss:$8 sm:$0x3] }
0x1194   :  { %4243 = vmatmul.msk.f32.vlgmr.msra.gmra.mxu0 %vm126_vm9, %v2685_v59  ;;  %4244 = vmatmul.msk.f32.vlgmr.msra.gmra.mxu1 %vm126_vm9, %v2685_v59 }
0x1195   :  { %3102 = vmatpush.msra.mxu0 %v6107_v30  ;;  %3122 = vmatpush.msra.mxu1 %v6110_v31 }
0x1197   :  { %v2688_v16 = vpop.permute.xlu0 %2687  ;;  %3103 = vmatpush.msra.mxu0 %v6115_v11  ;;  %3123 = vmatpush.msra.mxu1 %v6118_v20 }
0x1198   :  { %4241 = vmatmul.msk.f32.vlgmr.msrb.gmra.mxu2 %vm126_vm9, %v2688_v16  ;;  %4242 = vmatmul.msk.f32.vlgmr.msrb.gmra.mxu3 %vm126_vm9, %v2688_v16 }
0x1199   :  { %3001 = vmatpush.msrb.mxu2 %v6210_v27  ;;  %3021 = vmatpush.msrb.mxu3 %v6213_v49 }
0x119a   :  { %3104 = vmatpush.msra.mxu0 %v6123_v12  ;;  %3124 = vmatpush.msra.mxu1 %v6126_v7 }
0x119b   :  { %3002 = vmatpush.msrb.mxu2 %v6218_v51  ;;  %3022 = vmatpush.msrb.mxu3 %v6221_v45 }
0x119c   :  { %3105 = vmatpush.msra.mxu0 %v6131_v57  ;;  %3125 = vmatpush.msra.mxu1 %v6134_v61 }
0x119d   :  { %3003 = vmatpush.msrb.mxu2 %v6226_v47  ;;  %3023 = vmatpush.msrb.mxu3 %v6229_v63 }
0x119e   :  { %3106 = vmatpush.msra.mxu0 %v6139_v40  ;;  %3126 = vmatpush.msra.mxu1 %v6142_v0 }
0x119f   :  { %3004 = vmatpush.msrb.mxu2 %v6234_v13  ;;  %3024 = vmatpush.msrb.mxu3 %v6237_v14 }
0x11a0   :  { %4248 = vmatmul.msk.f32.vlgmr.msra.gmra.mxu2 %vm126_vm9, %v2685_v59  ;;  %4249 = vmatmul.msk.f32.vlgmr.msra.gmra.mxu3 %vm126_vm9, %v2685_v59 }
0x11a1   :  { %3005 = vmatpush.msrb.mxu2 %v6242_v6  ;;  %3025 = vmatpush.msrb.mxu3 %v6245_v32 }
0x11a2   :  { %3107 = vmatpush.msra.mxu0 %v6147_v41  ;;  %3127 = vmatpush.msra.mxu1 %v6150_v42 }
0x11a3   :  { %3006 = vmatpush.msrb.mxu2 %v6250_v4  ;;  %3026 = vmatpush.msrb.mxu3 %v6253_v19 }
0x11a4   :  { %3108 = vmatpush.msra.mxu0 %v6159_v39  ;;  %3128 = vmatpush.msra.mxu1 %v6162_v46 }
0x11a5   :  { %3007 = vmatpush.msrb.mxu2 %v6258_v10  ;;  %3027 = vmatpush.msrb.mxu3 %v6261_v35 }
0x11a6   :  { %3109 = vmatpush.msra.mxu0 %v6171_v52  ;;  %3129 = vmatpush.msra.mxu1 %v6174_v24 }
0x11a7   :  { %3008 = vmatpush.msrb.mxu2 %v6266_v8  ;;  %3028 = vmatpush.msrb.mxu3 %v6269_v37 }
0x11a9   :  { %3212 = vmatpush.msra.mxu2 %v6272_v33  ;;  %3232 = vmatpush.msra.mxu3 %v6275_v29 }
0x11ab   :  { %3213 = vmatpush.msra.mxu2 %v6278_v5  ;;  %3233 = vmatpush.msra.mxu3 %v6281_v53 }
0x11ad   :  { %3214 = vmatpush.msra.mxu2 %v6284_v48  ;;  %3234 = vmatpush.msra.mxu3 %v6287_v15 }
0x11af   :  { %3215 = vmatpush.msra.mxu2 %v6290_v38  ;;  %3235 = vmatpush.msra.mxu3 %v6293_v34 }
0x11b1   :  { %3216 = vmatpush.msra.mxu2 %v6296_v18  ;;  %3236 = vmatpush.msra.mxu3 %v6299_v2 }
0x11b3   :  { %3217 = vmatpush.msra.mxu2 %v6153_v43  ;;  %3237 = vmatpush.msra.mxu3 %v6156_v44 }
0x11b5   :  { %3218 = vmatpush.msra.mxu2 %v6165_v58  ;;  %3238 = vmatpush.msra.mxu3 %v6168_v56 }
0x11b7   :  { %3219 = vmatpush.msra.mxu2 %v6177_v21  ;;  %3239 = vmatpush.msra.mxu3 %v6180_v50 }
0x1211   :  { %v2751_v36 = vpop.f32.mrf.mxu0 }
0x121b   :  { %v2708_v22 = vpop.f32.mrf.mxu2  ;;  %v2728_v28 = vpop.f32.mrf.mxu3 }
0x121c   :  { %v2752_v23 = vadd.f32 %v2751_v36, %v2708_v22  ;;  %v2771_v36 = vpop.f32.mrf.mxu1 }
0x121d   :  { %v2772_v22 = vadd.f32 %v2771_v36, %v2728_v28 }
0x121e   :  { %v2774_v25 = vadd.f32 %v2752_v23, %v6753_v55 }
0x1220   :  { %v4245_v54 = vmul.f32 -1.442695, %v2774_v25  ;;  %v2775_v25 = vadd.f32 %v2772_v22, %v6754_v26 }
0x1222   :  { %4563 = vpow2.f32 %v4245_v54 }
0x1223   :  { %v2877_v17 = vpop.f32.mrf.mxu3  ;;  %v2857_v62 = vpop.f32.mrf.mxu2 }
0x1224   :  { %v2882_v1 = vrot.slane %v2877_v17, 7 }
0x1226   :  { %v2883_v59 = vsel %vm173_vm0, %v2857_v62, %v2882_v1 }
0x1227   :  { %v2885_v16 = vadd.f32 %v4247_v60, %v2883_v59 }
0x1228   :  { %v4564_v21 = vpop.eup %4563 }
0x1229   :  { %v2779_v50 = vadd.f32 1.0, %v4564_v21  ;;  %2909 = vrot.lane.b32.xlu1 %v2885_v16, %s4991_s17  ;;  %v4250_v56 = vmul.f32 -1.442695, %v2885_v16  ;;  %v2906_v22 = vrot.slane %v2885_v16, 1  ;;  %v4246_v16 = vmul.f32 -1.442695, %v2775_v25 }
0x122b   :  { %4565 = vrcp.f32 %v2779_v50  ;;  %v2791_v44 = vand.u32 2147483648, %v2779_v50  ;;  %v2789_v21 = vand.u32 2147483647, %v2779_v50  ;;  %vm2785_vm2 = vweird.f32 %v2779_v50 }
0x122c   :  { %4567 = vpow2.f32 %v4250_v56 }
0x122d   :  { %4569 = vtanh.f32 %v2775_v25  ;;  %v2792_v62 = vor.u32 1.1754944e-38, %v2791_v44  ;;  %vm2790_vm4 = vcmp.eq.f32.partialorder %v2789_v21, 8.507059e+37 }
0x1231   :  { %v4566_v23 = vpop.eup %4565 }
0x1232   :  { %v2781_v54 = vmul.f32 %v4566_v23, %v2779_v50  ;;  %v4568_v17 = vpop.eup %4567  ;;  %vm2786_vm1 = vweird.f32 %v4566_v23 }
0x1233   :  { %v2889_v55 = vadd.f32 1.0, %v4568_v17  ;;  %vm2787_vm3 = vmor %vm2785_vm2, %vm2786_vm1  ;;  %v4570_v56 = vpop.eup %4569 }
0x1234   :  { %v2782_v58 = vsub.f32 1.0, %v2781_v54 }
0x1235   :  { %4571 = vrcp.f32 %v2889_v55  ;;  %v2901_v17 = vand.u32 2147483648, %v2889_v55  ;;  %v2899_v2 = vand.u32 2147483647, %v2889_v55  ;;  %vm2895_vm6 = vweird.f32 %v2889_v55 }
0x1236   :  { %v2783_v1 = vmul.f32 %v4566_v23, %v2782_v58  ;;  %4573 = vtanh.f32 %v2906_v22 }
0x1237   :  { %v2902_v44 = vor.u32 1.1754944e-38, %v2901_v17  ;;  %vm2900_vm8 = vcmp.eq.f32.partialorder %v2899_v2, 8.507059e+37  ;;  %4575 = vpow2.f32 %v4246_v16 }
0x1238   :  { %v2784_v60 = vadd.f32 %v4566_v23, %v2783_v1 }
0x123a   :  { %v2788_v59 = vsel %vm2787_vm3, %v4566_v23, %v2784_v60 }
0x123b   :  { %v2793_v28 = vsel %vm2790_vm4, %v2792_v62, %v2788_v59  ;;  %v4572_v36 = vpop.eup %4571 }
0x123c   :  { %v2816_v26 = vmul.f32 %v4570_v56, %v2793_v28  ;;  %v2891_v43 = vmul.f32 %v4572_v36, %v2889_v55  ;;  %vm2896_vm5 = vweird.f32 %v4572_v36  ;;  %v4574_v23 = vpop.eup %4573  ;;  %v2815_v25 = vmul.f32 %v2793_v28, %v6197_v9 }
0x123d   :  { %vm2897_vm7 = vmor %vm2895_vm6, %vm2896_vm5 }
0x123e   :  { %2818 = vrot.lane.b32.xlu0 %v2816_v26, %s4991_s17  ;;  %v2892_v54 = vsub.f32 1.0, %v2891_v43  ;;  %v4576_v26 = vpop.eup %4575 }
0x123f   :  { %v2799_v43 = vadd.f32 1.0, %v4576_v26 }
0x1240   :  { %v2893_v58 = vmul.f32 %v4572_v36, %v2892_v54 }
0x1241   :  { %4577 = vrcp.f32 %v2799_v43  ;;  %vm2805_vm11 = vweird.f32 %v2799_v43 }
0x1242   :  { %v2894_v1 = vadd.f32 %v4572_v36, %v2893_v58 }
0x1244   :  { %v2898_v50 = vsel %vm2897_vm7, %v4572_v36, %v2894_v1 }
0x1245   :  { %v2903_v21 = vsel %vm2900_vm8, %v2902_v44, %v2898_v50  ;;  %v2809_v44 = vand.u32 2147483647, %v2799_v43 }
0x1246   :  { %v2933_v60 = vmul.f32 %v4574_v23, %v2903_v21  ;;  %v2932_v62 = vmul.f32 %v2903_v21, %v6193_v3  ;;  %v2811_v3 = vand.u32 2147483648, %v2799_v43 }
0x1247   :  { %v4578_v59 = vpop.eup %4577  ;;  %vm2810_vm13 = vcmp.eq.f32.partialorder %v2809_v44, 8.507059e+37 }
0x1248   :  { %2935 = vrot.lane.b32.xlu2 %v2933_v60, %s4991_s17  ;;  %v2801_v55 = vmul.f32 %v4578_v59, %v2799_v43  ;;  %vm2806_vm10 = vweird.f32 %v4578_v59  ;;  %v2812_v23 = vor.u32 1.1754944e-38, %v2811_v3 }
0x1249   :  { %vm2807_vm12 = vmor %vm2805_vm11, %vm2806_vm10 }
0x124a   :  { %v2802_v2 = vsub.f32 1.0, %v2801_v55 }
0x124c   :  { %v2803_v54 = vmul.f32 %v4578_v59, %v2802_v2 }
0x124e   :  { %v2804_v1 = vadd.f32 %v4578_v59, %v2803_v54 }
0x1250   :  { %v2808_v50 = vsel %vm2807_vm12, %v4578_v59, %v2804_v1 }
0x1251   :  { %v2813_v60 = vsel %vm2810_vm13, %v2812_v23, %v2808_v50 }
0x129b   :  { %v2910_v9 = vpop.permute.xlu1 %2909 }
0x129c   :  { %v2911_v28 = vrot.slane %v2910_v9, 1  ;;  %v6765_v9 = vld [vmem:[#allocation14_spill] sm:$0xff] }
0x129e   :  { %v4251_v26 = vmul.f32 -1.442695, %v2911_v28  ;;  %v6766_v28 = vld [vmem:[#allocation18_spill] sm:$0xff] }
0x12a2   :  { %v2936_v56 = vpop.permute.xlu2 %2935 }
0x12a3   :  { %v6318_v22 = vadd.f32 %v2936_v56, %v2932_v62 }
0x12a5   :  { %4579 = vtanh.f32 %v6318_v22 }
0x12ab   :  { %v4580_v36 = vpop.eup %4579 }
0x12ac   :  { %2941 = vrot.lane.b32.xlu2 %v4580_v36, %s4991_s17 }
0x12b0   :  { %v2819_v17 = vpop.permute.xlu0 %2818 }
0x12b1   :  { %v6323_v58 = vadd.f32 %v2819_v17, %v2815_v25 }
0x12b3   :  { %4581 = vtanh.f32 %v6323_v58 }
0x12b4   :  { %4583 = vpow2.f32 %v4251_v26  ;;  %v6767_v26 = vld [vmem:[#allocation13_spill] sm:$0xff] }
0x12b9   :  { %v4582_v21 = vpop.eup %4581 }
0x12ba   :  { %v6326_v16 = vmul.f32 %v4582_v21, %v2813_v60  ;;  %v4584_v62 = vpop.eup %4583  ;;  %v6763_v21 = vld [vmem:[#allocation16_spill] sm:$0xff]  ;;  %v6764_v60 = vld [vmem:[#allocation15_spill] sm:$0xff] }
0x12bb   :  { %v2916_v56 = vadd.f32 1.0, %v4584_v62  ;;  %v6768_v62 = vld [vmem:[#allocation19_spill] sm:$0xff] }
0x12bc   :  { %6762 = vst [vmem:[#allocation17_spill] sm:$0xff] %v6326_v16  ;;  %2946 = vrot.lane.b32.xlu0 %v6326_v16, %s4991_s17 }
0x12bd   :  { %4585 = vrcp.f32 %v2916_v56  ;;  %v2928_v54 = vand.u32 2147483648, %v2916_v56  ;;  %vm2922_vm15 = vweird.f32 %v2916_v56  ;;  %v2926_v25 = vand.u32 2147483647, %v2916_v56 }
0x12bf   :  { %v2929_v1 = vor.u32 1.1754944e-38, %v2928_v54  ;;  %vm2927_vm2 = vcmp.eq.f32.partialorder %v2926_v25, 8.507059e+37 }
0x12c3   :  { %v4586_v55 = vpop.eup %4585 }
0x12c4   :  { %v2918_v43 = vmul.f32 %v4586_v55, %v2916_v56  ;;  %vm2923_vm14 = vweird.f32 %v4586_v55  ;;  %v6769_v56 = vld [vmem:[#allocation22_spill] sm:$0xff] }
0x12c5   :  { %vm2924_vm1 = vmor %vm2922_vm15, %vm2923_vm14 }
0x12c6   :  { %v2919_v2 = vsub.f32 1.0, %v2918_v43 }
0x12c8   :  { %v2920_v59 = vmul.f32 %v4586_v55, %v2919_v2 }
0x12ca   :  { %v2921_v36 = vadd.f32 %v4586_v55, %v2920_v59 }
0x12cc   :  { %v2925_v17 = vsel %vm2924_vm1, %v4586_v55, %v2921_v36  ;;  %v6770_v36 = vld [vmem:[#allocation20_spill] sm:$0xff] }
0x12cd   :  { %v2930_v3 = vsel %vm2927_vm2, %v2929_v1, %v2925_v17 }
0x1306   :  { %v2942_v44 = vpop.permute.xlu2 %2941 }
0x1307   :  { %v2944_v50 = vmul.f32 %v2942_v44, %v2930_v3  ;;  %v4258_v3 = vld [vmem:[%s6615_s0 + $0x14] ss:$8 sm:$0x3] }
0x1309   :  { %4254 = vmatmul.msk.f32.vlgmr.msrb.gmra.mxu2 %vm126_vm9, %v2944_v50  ;;  %4255 = vmatmul.msk.f32.vlgmr.msrb.gmra.mxu3 %vm126_vm9, %v2944_v50 }
0x130a   :  { %3356 = vmatpush.msrb.mxu2 %v6107_v30  ;;  %3376 = vmatpush.msrb.mxu3 %v6110_v31 }
0x130c   :  { %3357 = vmatpush.msrb.mxu2 %v6115_v11  ;;  %3377 = vmatpush.msrb.mxu3 %v6118_v20 }
0x130e   :  { %3358 = vmatpush.msrb.mxu2 %v6123_v12  ;;  %3378 = vmatpush.msrb.mxu3 %v6126_v7 }
0x1310   :  { %3359 = vmatpush.msrb.mxu2 %v6131_v57  ;;  %3379 = vmatpush.msrb.mxu3 %v6134_v61 }
0x1312   :  { %3360 = vmatpush.msrb.mxu2 %v6139_v40  ;;  %3380 = vmatpush.msrb.mxu3 %v6142_v0 }
0x1314   :  { %3361 = vmatpush.msrb.mxu2 %v6147_v41  ;;  %3381 = vmatpush.msrb.mxu3 %v6150_v42 }
0x1316   :  { %3362 = vmatpush.msrb.mxu2 %v6159_v39  ;;  %3382 = vmatpush.msrb.mxu3 %v6162_v46 }
0x1318   :  { %3363 = vmatpush.msrb.mxu2 %v6171_v52  ;;  %3383 = vmatpush.msrb.mxu3 %v6174_v24 }
0x132e   :  { %v2947_v23 = vpop.permute.xlu0 %2946 }
0x132f   :  { %4252 = vmatmul.msk.f32.vlgmr.msrb.gmra.mxu0 %vm126_vm9, %v2947_v23  ;;  %4253 = vmatmul.msk.f32.vlgmr.msrb.gmra.mxu1 %vm126_vm9, %v2947_v23 }
0x1330   :  { %3255 = vmatpush.msrb.mxu0 %v6210_v27  ;;  %3275 = vmatpush.msrb.mxu1 %v6213_v49 }
0x1332   :  { %3256 = vmatpush.msrb.mxu0 %v6218_v51  ;;  %3276 = vmatpush.msrb.mxu1 %v6221_v45 }
0x1334   :  { %3257 = vmatpush.msrb.mxu0 %v6226_v47  ;;  %3277 = vmatpush.msrb.mxu1 %v6229_v63 }
0x1336   :  { %3258 = vmatpush.msrb.mxu0 %v6234_v13  ;;  %3278 = vmatpush.msrb.mxu1 %v6237_v14 }
0x1337   :  { %4259 = vmatmul.msk.f32.vlgmr.msra.gmra.mxu0 %vm126_vm9, %v2944_v50  ;;  %4260 = vmatmul.msk.f32.vlgmr.msra.gmra.mxu1 %vm126_vm9, %v2944_v50 }
0x1338   :  { %3259 = vmatpush.msrb.mxu0 %v6242_v6  ;;  %3279 = vmatpush.msrb.mxu1 %v6245_v32 }
0x133a   :  { %3260 = vmatpush.msrb.mxu0 %v6250_v4  ;;  %3280 = vmatpush.msrb.mxu1 %v6253_v19 }
0x133c   :  { %3261 = vmatpush.msrb.mxu0 %v6258_v10  ;;  %3281 = vmatpush.msrb.mxu1 %v6261_v35 }
0x133e   :  { %3262 = vmatpush.msrb.mxu0 %v6266_v8  ;;  %3282 = vmatpush.msrb.mxu1 %v6269_v37 }
0x1340   :  { %3466 = vmatpush.msra.mxu0 %v6272_v33  ;;  %3486 = vmatpush.msra.mxu1 %v6275_v29 }
0x1342   :  { %3467 = vmatpush.msra.mxu0 %v6278_v5  ;;  %3487 = vmatpush.msra.mxu1 %v6281_v53 }
0x1344   :  { %3468 = vmatpush.msra.mxu0 %v6284_v48  ;;  %3488 = vmatpush.msra.mxu1 %v6287_v15 }
0x1346   :  { %3469 = vmatpush.msra.mxu0 %v6290_v38  ;;  %3489 = vmatpush.msra.mxu1 %v6293_v34 }
0x1348   :  { %3470 = vmatpush.msra.mxu0 %v6296_v18  ;;  %3490 = vmatpush.msra.mxu1 %v6763_v21 }
0x134a   :  { %3471 = vmatpush.msra.mxu0 %v6764_v60  ;;  %3491 = vmatpush.msra.mxu1 %v6765_v9 }
0x134c   :  { %3472 = vmatpush.msra.mxu0 %v6766_v28  ;;  %3492 = vmatpush.msra.mxu1 %v6767_v26 }
0x134e   :  { %3473 = vmatpush.msra.mxu0 %v6768_v62  ;;  %3493 = vmatpush.msra.mxu1 %v6769_v56 }
0x138c   :  { %v3010_v55 = vpop.f32.mrf.mxu2  ;;  %v3030_v26 = vpop.f32.mrf.mxu3 }
0x13ac   :  { %v2967_v43 = vpop.f32.mrf.mxu0  ;;  %v2987_v2 = vpop.f32.mrf.mxu1 }
0x13ad   :  { %v3011_v59 = vadd.f32 %v3010_v55, %v2967_v43  ;;  %v3031_v62 = vadd.f32 %v3030_v26, %v2987_v2  ;;  %v6771_v55 = vld [vmem:[#allocation21_spill] sm:$0xff] }
0x13af   :  { %v3033_v54 = vadd.f32 %v3011_v59, %v6770_v36  ;;  %v3034_v43 = vadd.f32 %v3031_v62, %v6771_v55 }
0x13b1   :  { %v4256_v25 = vmul.f32 -1.442695, %v3033_v54 }
0x13b3   :  { %4587 = vpow2.f32 %v4256_v25 }
0x13b4   :  { %v3131_v17 = vpop.f32.mrf.mxu1  ;;  %v3111_v44 = vpop.f32.mrf.mxu0 }
0x13b5   :  { %v3136_v1 = vrot.slane %v3131_v17, 7 }
0x13b7   :  { %v3137_v50 = vsel %vm173_vm0, %v3111_v44, %v3136_v1 }
0x13b8   :  { %v3139_v23 = vadd.f32 %v4258_v3, %v3137_v50 }
0x13b9   :  { %v4588_v60 = vpop.eup %4587 }
0x13ba   :  { %v3038_v9 = vadd.f32 1.0, %v4588_v60  ;;  %3163 = vrot.lane.b32.xlu0 %v3139_v23, %s4991_s17  ;;  %v4261_v28 = vmul.f32 -1.442695, %v3139_v23  ;;  %v3160_v62 = vrot.slane %v3139_v23, 1  ;;  %v4257_v23 = vmul.f32 -1.442695, %v3034_v43 }
0x13bc   :  { %4589 = vrcp.f32 %v3038_v9  ;;  %v3050_v16 = vand.u32 2147483648, %v3038_v9  ;;  %v3048_v3 = vand.u32 2147483647, %v3038_v9  ;;  %vm3044_vm4 = vweird.f32 %v3038_v9 }
0x13bd   :  { %4591 = vpow2.f32 %v4261_v28 }
0x13be   :  { %4593 = vtanh.f32 %v3034_v43  ;;  %v3051_v50 = vor.u32 1.1754944e-38, %v3050_v16  ;;  %vm3049_vm6 = vcmp.eq.f32.partialorder %v3048_v3, 8.507059e+37 }
0x13c2   :  { %v4590_v56 = vpop.eup %4589 }
0x13c3   :  { %v3040_v59 = vmul.f32 %v4590_v56, %v3038_v9  ;;  %v4592_v54 = vpop.eup %4591  ;;  %vm3045_vm3 = vweird.f32 %v4590_v56 }
0x13c4   :  { %v3143_v25 = vadd.f32 1.0, %v4592_v54  ;;  %vm3046_vm5 = vmor %vm3044_vm4, %vm3045_vm3  ;;  %v4594_v2 = vpop.eup %4593 }
0x13c5   :  { %v3041_v17 = vsub.f32 1.0, %v3040_v59 }
0x13c6   :  { %4595 = vrcp.f32 %v3143_v25  ;;  %v3155_v54 = vand.u32 2147483648, %v3143_v25  ;;  %v3153_v21 = vand.u32 2147483647, %v3143_v25  ;;  %vm3149_vm8 = vweird.f32 %v3143_v25 }
0x13c7   :  { %v3042_v1 = vmul.f32 %v4590_v56, %v3041_v17  ;;  %4597 = vtanh.f32 %v3160_v62 }
0x13c8   :  { %v3156_v16 = vor.u32 1.1754944e-38, %v3155_v54  ;;  %vm3154_vm11 = vcmp.eq.f32.partialorder %v3153_v21, 8.507059e+37  ;;  %4599 = vpow2.f32 %v4257_v23 }
0x13c9   :  { %v3043_v44 = vadd.f32 %v4590_v56, %v3042_v1 }
0x13cb   :  { %v3047_v60 = vsel %vm3046_vm5, %v4590_v56, %v3043_v44 }
0x13cc   :  { %v3052_v28 = vsel %vm3049_vm6, %v3051_v50, %v3047_v60  ;;  %v4596_v26 = vpop.eup %4595 }
0x13cd   :  { %v3075_v55 = vmul.f32 %v4594_v2, %v3052_v28  ;;  %v3145_v36 = vmul.f32 %v4596_v26, %v3143_v25  ;;  %vm3150_vm7 = vweird.f32 %v4596_v26  ;;  %v4598_v56 = vpop.eup %4597  ;;  %v3074_v43 = vmul.f32 %v3052_v28, %v6323_v58 }
0x13ce   :  { %vm3151_vm10 = vmor %vm3149_vm8, %vm3150_vm7 }
0x13cf   :  { %3077 = vrot.lane.b32.xlu1 %v3075_v55, %s4991_s17  ;;  %v3146_v59 = vsub.f32 1.0, %v3145_v36  ;;  %v4600_v55 = vpop.eup %4599 }
0x13d0   :  { %v3058_v36 = vadd.f32 1.0, %v4600_v55 }
0x13d1   :  { %v3147_v17 = vmul.f32 %v4596_v26, %v3146_v59 }
0x13d2   :  { %4601 = vrcp.f32 %v3058_v36  ;;  %vm3064_vm13 = vweird.f32 %v3058_v36 }
0x13d3   :  { %v3148_v1 = vadd.f32 %v4596_v26, %v3147_v17 }
0x13d5   :  { %v3152_v9 = vsel %vm3151_vm10, %v4596_v26, %v3148_v1 }
0x13d6   :  { %v3157_v3 = vsel %vm3154_vm11, %v3156_v16, %v3152_v9  ;;  %v3068_v16 = vand.u32 2147483647, %v3058_v36 }
0x13d7   :  { %v3187_v44 = vmul.f32 %v4598_v56, %v3157_v3  ;;  %v3186_v50 = vmul.f32 %v3157_v3, %v6318_v22  ;;  %v3070_v22 = vand.u32 2147483648, %v3058_v36 }
0x13d8   :  { %v4602_v60 = vpop.eup %4601  ;;  %vm3069_vm15 = vcmp.eq.f32.partialorder %v3068_v16, 8.507059e+37 }
0x13d9   :  { %3189 = vrot.lane.b32.xlu2 %v3187_v44, %s4991_s17  ;;  %v3060_v25 = vmul.f32 %v4602_v60, %v3058_v36  ;;  %vm3065_vm12 = vweird.f32 %v4602_v60  ;;  %v3071_v56 = vor.u32 1.1754944e-38, %v3070_v22 }
0x13da   :  { %vm3066_vm14 = vmor %vm3064_vm13, %vm3065_vm12 }
0x13db   :  { %v3061_v21 = vsub.f32 1.0, %v3060_v25 }
0x13dd   :  { %v3062_v59 = vmul.f32 %v4602_v60, %v3061_v21 }
0x13df   :  { %v3063_v1 = vadd.f32 %v4602_v60, %v3062_v59 }
0x13e1   :  { %v3067_v9 = vsel %vm3066_vm14, %v4602_v60, %v3063_v1 }
0x13e2   :  { %v3072_v44 = vsel %vm3069_vm15, %v3071_v56, %v3067_v9 }
0x142c   :  { %v3164_v58 = vpop.permute.xlu0 %3163 }
0x142d   :  { %v3165_v28 = vrot.slane %v3164_v58, 1 }
0x142f   :  { %v4262_v55 = vmul.f32 -1.442695, %v3165_v28 }
0x1433   :  { %v3190_v2 = vpop.permute.xlu2 %3189 }
0x1434   :  { %v6394_v62 = vadd.f32 %v3190_v2, %v3186_v50 }
0x1436   :  { %4603 = vtanh.f32 %v6394_v62 }
0x143c   :  { %v4604_v26 = vpop.eup %4603 }
0x143d   :  { %3195 = vrot.lane.b32.xlu2 %v4604_v26, %s4991_s17 }
0x1441   :  { %v3078_v54 = vpop.permute.xlu1 %3077 }
0x1442   :  { %v6399_v17 = vadd.f32 %v3078_v54, %v3074_v43 }
0x1444   :  { %4605 = vtanh.f32 %v6399_v17 }
0x1445   :  { %4607 = vpow2.f32 %v4262_v55 }
0x144a   :  { %v4606_v3 = vpop.eup %4605 }
0x144b   :  { %v6402_v23 = vmul.f32 %v4606_v3, %v3072_v44  ;;  %v4608_v50 = vpop.eup %4607 }
0x144c   :  { %v3170_v2 = vadd.f32 1.0, %v4608_v50  ;;  %v6774_v50 = vld [vmem:[#allocation21_spill] sm:$0xff] }
0x144d   :  { %3200 = vrot.lane.b32.xlu1 %v6402_v23, %s4991_s17 }
0x144e   :  { %4609 = vrcp.f32 %v3170_v2  ;;  %v3182_v59 = vand.u32 2147483648, %v3170_v2  ;;  %vm3176_vm2 = vweird.f32 %v3170_v2  ;;  %v3180_v43 = vand.u32 2147483647, %v3170_v2 }
0x1450   :  { %v3183_v1 = vor.u32 1.1754944e-38, %v3182_v59  ;;  %vm3181_vm4 = vcmp.eq.f32.partialorder %v3180_v43, 8.507059e+37 }
0x1454   :  { %v4610_v25 = vpop.eup %4609 }
0x1455   :  { %v3172_v36 = vmul.f32 %v4610_v25, %v3170_v2  ;;  %vm3177_vm1 = vweird.f32 %v4610_v25 }
0x1456   :  { %vm3178_vm3 = vmor %vm3176_vm2, %vm3177_vm1 }
0x1457   :  { %v3173_v21 = vsub.f32 1.0, %v3172_v36 }
0x1459   :  { %v3174_v60 = vmul.f32 %v4610_v25, %v3173_v21 }
0x145b   :  { %v3175_v26 = vadd.f32 %v4610_v25, %v3174_v60 }
0x145d   :  { %v3179_v54 = vsel %vm3178_vm3, %v4610_v25, %v3175_v26 }
0x145e   :  { %v3184_v22 = vsel %vm3181_vm4, %v3183_v1, %v3179_v54 }
0x1497   :  { %v3196_v16 = vpop.permute.xlu2 %3195 }
0x1498   :  { %v3198_v9 = vmul.f32 %v3196_v16, %v3184_v22 }
0x149a   :  { %4265 = vmatmul.msk.f32.vlgmr.msrb.gmra.mxu0 %vm126_vm9, %v3198_v9  ;;  %4266 = vmatmul.msk.f32.vlgmr.msrb.gmra.mxu1 %vm126_vm9, %v3198_v9 }
0x149b   :  { %3610 = vmatpush.msrb.mxu0 %v6107_v30  ;;  %3630 = vmatpush.msrb.mxu1 %v6110_v31  ;;  %v6772_v31 = vld [vmem:[#allocation16_spill] sm:$0xff] }
0x149d   :  { %3611 = vmatpush.msrb.mxu0 %v6115_v11  ;;  %3631 = vmatpush.msrb.mxu1 %v6118_v20  ;;  %v6454_v11 = vld [vmem:[#allocation8 + $0x20] sm:$0xff]  ;;  %v6457_v20 = vld [vmem:[#allocation8 + $0x28] sm:$0xff] }
0x149f   :  { %3612 = vmatpush.msrb.mxu0 %v6123_v12  ;;  %3632 = vmatpush.msrb.mxu1 %v6126_v7  ;;  %v6460_v12 = vld [vmem:[#allocation8 + $0x10] sm:$0xff]  ;;  %v6463_v7 = vld [vmem:[#allocation8 + $0x18] sm:$0xff] }
0x14a1   :  { %3613 = vmatpush.msrb.mxu0 %v6131_v57  ;;  %3633 = vmatpush.msrb.mxu1 %v6134_v61  ;;  %v6466_v57 = vld [vmem:[#allocation8] sm:$0xff]  ;;  %v6469_v61 = vld [vmem:[#allocation8 + $0x8] sm:$0xff] }
0x14a3   :  { %3614 = vmatpush.msrb.mxu0 %v6139_v40  ;;  %3634 = vmatpush.msrb.mxu1 %v6142_v0 }
0x14a5   :  { %3615 = vmatpush.msrb.mxu0 %v6147_v41  ;;  %3635 = vmatpush.msrb.mxu1 %v6150_v42 }
0x14a7   :  { %3616 = vmatpush.msrb.mxu0 %v6159_v39  ;;  %3636 = vmatpush.msrb.mxu1 %v6162_v46  ;;  %v6773_v39 = vld [vmem:[#allocation20_spill] sm:$0xff] }
0x14a9   :  { %3617 = vmatpush.msrb.mxu0 %v6171_v52  ;;  %3637 = vmatpush.msrb.mxu1 %v6174_v24 }
0x14bf   :  { %v3201_v30 = vpop.permute.xlu1 %3200 }
0x14c0   :  { %4263 = vmatmul.msk.f32.vlgmr.msra.gmra.mxu2 %vm126_vm9, %v3201_v30  ;;  %4264 = vmatmul.msk.f32.vlgmr.msra.gmra.mxu3 %vm126_vm9, %v3201_v30 }
0x14c1   :  { %3509 = vmatpush.msra.mxu2 %v6210_v27  ;;  %3529 = vmatpush.msra.mxu3 %v6213_v49 }
0x14c3   :  { %3510 = vmatpush.msra.mxu2 %v6218_v51  ;;  %3530 = vmatpush.msra.mxu3 %v6221_v45 }
0x14c5   :  { %3511 = vmatpush.msra.mxu2 %v6226_v47  ;;  %3531 = vmatpush.msra.mxu3 %v6229_v63 }
0x14c7   :  { %3512 = vmatpush.msra.mxu2 %v6234_v13  ;;  %3532 = vmatpush.msra.mxu3 %v6237_v14 }
0x14c8   :  { %4270 = vmatmul.msk.f32.vlgmr.msrb.gmra.mxu2 %vm126_vm9, %v3198_v9  ;;  %4271 = vmatmul.msk.f32.vlgmr.msrb.gmra.mxu3 %vm126_vm9, %v3198_v9 }
0x14c9   :  { %3513 = vmatpush.msra.mxu2 %v6242_v6  ;;  %3533 = vmatpush.msra.mxu3 %v6245_v32 }
0x14cb   :  { %3514 = vmatpush.msra.mxu2 %v6250_v4  ;;  %3534 = vmatpush.msra.mxu3 %v6253_v19 }
0x14cd   :  { %3515 = vmatpush.msra.mxu2 %v6258_v10  ;;  %3535 = vmatpush.msra.mxu3 %v6261_v35 }
0x14cf   :  { %3516 = vmatpush.msra.mxu2 %v6266_v8  ;;  %3536 = vmatpush.msra.mxu3 %v6269_v37 }
0x14d1   :  { %3720 = vmatpush.msrb.mxu2 %v6272_v33  ;;  %3740 = vmatpush.msrb.mxu3 %v6275_v29 }
0x14d3   :  { %3721 = vmatpush.msrb.mxu2 %v6278_v5  ;;  %3741 = vmatpush.msrb.mxu3 %v6281_v53 }
0x14d5   :  { %3722 = vmatpush.msrb.mxu2 %v6284_v48  ;;  %3742 = vmatpush.msrb.mxu3 %v6287_v15  ;;  %v4269_v15 = vld [vmem:[%s6615_s0 + $0x15] ss:$8 sm:$0x3] }
0x14d7   :  { %3723 = vmatpush.msrb.mxu2 %v6290_v38  ;;  %3743 = vmatpush.msrb.mxu3 %v6293_v34 }
0x14d9   :  { %3724 = vmatpush.msrb.mxu2 %v6296_v18  ;;  %3744 = vmatpush.msrb.mxu3 %v6772_v31 }
0x14db   :  { %3725 = vmatpush.msrb.mxu2 %v6454_v11  ;;  %3745 = vmatpush.msrb.mxu3 %v6457_v20 }
0x14dd   :  { %3726 = vmatpush.msrb.mxu2 %v6460_v12  ;;  %3746 = vmatpush.msrb.mxu3 %v6463_v7 }
0x14df   :  { %3727 = vmatpush.msrb.mxu2 %v6466_v57  ;;  %3747 = vmatpush.msrb.mxu3 %v6469_v61 }
0x1517   :  { %v3264_v40 = vpop.f32.mrf.mxu0  ;;  %v3284_v58 = vpop.f32.mrf.mxu1 }
0x1543   :  { %v3221_v0 = vpop.f32.mrf.mxu2  ;;  %v3241_v41 = vpop.f32.mrf.mxu3 }
0x1544   :  { %v3265_v42 = vadd.f32 %v3264_v40, %v3221_v0  ;;  %v3285_v28 = vadd.f32 %v3284_v58, %v3241_v41 }
0x1546   :  { %v3287_v46 = vadd.f32 %v3265_v42, %v6773_v39  ;;  %v3288_v2 = vadd.f32 %v3285_v28, %v6774_v50 }
0x1548   :  { %v4267_v52 = vmul.f32 -1.442695, %v3287_v46 }
0x154a   :  { %4611 = vpow2.f32 %v4267_v52 }
0x154b   :  { %v3385_v24 = vpop.f32.mrf.mxu3  ;;  %v3365_v38 = vpop.f32.mrf.mxu2 }
0x154c   :  { %v3390_v48 = vrot.slane %v3385_v24, 7 }
0x154e   :  { %v3391_v34 = vsel %vm173_vm0, %v3365_v38, %v3390_v48 }
0x154f   :  { %v3393_v18 = vadd.f32 %v4269_v15, %v3391_v34 }
0x1550   :  { %v4612_v56 = vpop.eup %4611 }
0x1551   :  { %v3292_v3 = vadd.f32 1.0, %v4612_v56  ;;  %3417 = vrot.lane.b32.xlu2 %v3393_v18, %s4991_s17  ;;  %v4272_v44 = vmul.f32 -1.442695, %v3393_v18  ;;  %v3414_v31 = vrot.slane %v3393_v18, 1  ;;  %v4268_v18 = vmul.f32 -1.442695, %v3288_v2 }
0x1553   :  { %4613 = vrcp.f32 %v3292_v3  ;;  %v3304_v26 = vand.u32 2147483648, %v3292_v3  ;;  %v3302_v43 = vand.u32 2147483647, %v3292_v3  ;;  %vm3298_vm6 = vweird.f32 %v3292_v3 }
0x1554   :  { %4615 = vpow2.f32 %v4272_v44 }
0x1555   :  { %4617 = vtanh.f32 %v3288_v2  ;;  %v3305_v1 = vor.u32 1.1754944e-38, %v3304_v26  ;;  %vm3303_vm8 = vcmp.eq.f32.partialorder %v3302_v43, 8.507059e+37 }
0x1559   :  { %v4614_v55 = vpop.eup %4613 }
0x155a   :  { %v3294_v25 = vmul.f32 %v4614_v55, %v3292_v3  ;;  %v4616_v36 = vpop.eup %4615  ;;  %vm3299_vm5 = vweird.f32 %v4614_v55 }
0x155b   :  { %v3397_v21 = vadd.f32 1.0, %v4616_v36  ;;  %vm3300_vm7 = vmor %vm3298_vm6, %vm3299_vm5  ;;  %v4618_v16 = vpop.eup %4617 }
0x155c   :  { %v3295_v60 = vsub.f32 1.0, %v3294_v25 }
0x155d   :  { %4619 = vrcp.f32 %v3397_v21  ;;  %v3409_v42 = vand.u32 2147483648, %v3397_v21  ;;  %v3407_v52 = vand.u32 2147483647, %v3397_v21  ;;  %vm3403_vm11 = vweird.f32 %v3397_v21 }
0x155e   :  { %v3296_v59 = vmul.f32 %v4614_v55, %v3295_v60  ;;  %4621 = vtanh.f32 %v3414_v31 }
0x155f   :  { %v3410_v48 = vor.u32 1.1754944e-38, %v3409_v42  ;;  %vm3408_vm13 = vcmp.eq.f32.partialorder %v3407_v52, 8.507059e+37  ;;  %4623 = vpow2.f32 %v4268_v18 }
0x1560   :  { %v3297_v54 = vadd.f32 %v4614_v55, %v3296_v59 }
0x1562   :  { %v3301_v22 = vsel %vm3300_vm7, %v4614_v55, %v3297_v54 }
0x1563   :  { %v3306_v9 = vsel %vm3303_vm8, %v3305_v1, %v3301_v22  ;;  %v4620_v30 = vpop.eup %4619 }
0x1564   :  { %v3329_v40 = vmul.f32 %v4618_v16, %v3306_v9  ;;  %v3399_v0 = vmul.f32 %v4620_v30, %v3397_v21  ;;  %vm3404_vm10 = vweird.f32 %v4620_v30  ;;  %v4622_v38 = vpop.eup %4621  ;;  %v3328_v36 = vmul.f32 %v3306_v9, %v6399_v17 }
0x1565   :  { %vm3405_vm12 = vmor %vm3403_vm11, %vm3404_vm10  ;;  %v4624_v3 = vpop.eup %4623 }
0x1566   :  { %3331 = vrot.lane.b32.xlu1 %v3329_v40, %s4991_s17  ;;  %v3400_v41 = vsub.f32 1.0, %v3399_v0  ;;  %v3312_v44 = vadd.f32 1.0, %v4624_v3 }
0x1568   :  { %v3401_v46 = vmul.f32 %v4620_v30, %v3400_v41  ;;  %4625 = vrcp.f32 %v3312_v44  ;;  %v3324_v59 = vand.u32 2147483648, %v3312_v44  ;;  %vm3318_vm15 = vweird.f32 %v3312_v44 }
0x1569   :  { %v3322_v2 = vand.u32 2147483647, %v3312_v44 }
0x156a   :  { %v3402_v24 = vadd.f32 %v4620_v30, %v3401_v46  ;;  %v3325_v54 = vor.u32 1.1754944e-38, %v3324_v59 }
0x156b   :  { %vm3323_vm2 = vcmp.eq.f32.partialorder %v3322_v2, 8.507059e+37  ;;  %v4280_v2 = vld [vmem:[%s6615_s0 + $0x16] ss:$8 sm:$0x3] }
0x156c   :  { %v3406_v15 = vsel %vm3405_vm12, %v4620_v30, %v3402_v24 }
0x156d   :  { %v3411_v34 = vsel %vm3408_vm13, %v3410_v48, %v3406_v15 }
0x156e   :  { %v3441_v56 = vmul.f32 %v4622_v38, %v3411_v34  ;;  %v4626_v58 = vpop.eup %4625  ;;  %v3440_v16 = vmul.f32 %v3411_v34, %v6394_v62 }
0x156f   :  { %v3314_v28 = vmul.f32 %v4626_v58, %v3312_v44  ;;  %vm3319_vm14 = vweird.f32 %v4626_v58 }
0x1570   :  { %3443 = vrot.lane.b32.xlu0 %v3441_v56, %s4991_s17  ;;  %vm3320_vm1 = vmor %vm3318_vm15, %vm3319_vm14 }
0x1571   :  { %v3315_v55 = vsub.f32 1.0, %v3314_v28  ;;  %v4862_v28 = vld [vmem:[#allocation8 + $0x48] sm:$0xff] }
0x1573   :  { %v3316_v25 = vmul.f32 %v4626_v58, %v3315_v55  ;;  %v4863_v55 = vld [vmem:[#allocation3] sm:$0xff] }
0x1575   :  { %v3317_v26 = vadd.f32 %v4626_v58, %v3316_v25  ;;  %v4866_v25 = vld [vmem:[#allocation8 + $0x38] sm:$0xff] }
0x1577   :  { %v3321_v43 = vsel %vm3320_vm1, %v4626_v58, %v3317_v26  ;;  %v4859_v58 = vld [vmem:[#allocation3 + $0x10] sm:$0xff] }
0x1578   :  { %v3326_v22 = vsel %vm3323_vm2, %v3325_v54, %v3321_v43 }
0x15ab   :  { %v3418_v40 = vpop.permute.xlu2 %3417 }
0x15ac   :  { %v3419_v0 = vrot.slane %v3418_v40, 1 }
0x15ae   :  { %v4273_v41 = vmul.f32 -1.442695, %v3419_v0 }
0x15d8   :  { %v3332_v21 = vpop.permute.xlu1 %3331 }
0x15d9   :  { %v6482_v60 = vadd.f32 %v3332_v21, %v3328_v36 }
0x15db   :  { %4627 = vtanh.f32 %v6482_v60 }
0x15e1   :  { %v4628_v1 = vpop.eup %4627 }
0x15e2   :  { %v6486_v30 = vmul.f32 %v4628_v1, %v3326_v22  ;;  %v3444_v17 = vpop.permute.xlu0 %3443 }
0x15e3   :  { %v6488_v9 = vadd.f32 %v3444_v17, %v3440_v16 }
0x15e4   :  { %3454 = vrot.lane.b32.xlu1 %v6486_v30, %s4991_s17 }
0x15e5   :  { %4629 = vtanh.f32 %v6488_v9 }
0x15e6   :  { %4631 = vpow2.f32 %v4273_v41 }
0x15eb   :  { %v4630_v31 = vpop.eup %4629 }
0x15ec   :  { %3449 = vrot.lane.b32.xlu0 %v4630_v31, %s4991_s17  ;;  %v4632_v42 = vpop.eup %4631 }
0x15ed   :  { %v3424_v46 = vadd.f32 1.0, %v4632_v42 }
0x15ef   :  { %4633 = vrcp.f32 %v3424_v46  ;;  %v3436_v34 = vand.u32 2147483648, %v3424_v46  ;;  %vm3430_vm4 = vweird.f32 %v3424_v46  ;;  %v3434_v56 = vand.u32 2147483647, %v3424_v46 }
0x15f1   :  { %v3437_v3 = vor.u32 1.1754944e-38, %v3436_v34  ;;  %vm3435_vm6 = vcmp.eq.f32.partialorder %v3434_v56, 8.507059e+37 }
0x15f5   :  { %v4634_v62 = vpop.eup %4633 }
0x15f6   :  { %v3426_v52 = vmul.f32 %v4634_v62, %v3424_v46  ;;  %vm3431_vm3 = vweird.f32 %v4634_v62 }
0x15f7   :  { %vm3432_vm5 = vmor %vm3430_vm4, %vm3431_vm3 }
0x15f8   :  { %v3427_v24 = vsub.f32 1.0, %v3426_v52 }
0x15fa   :  { %v3428_v48 = vmul.f32 %v4634_v62, %v3427_v24 }
0x15fc   :  { %v3429_v38 = vadd.f32 %v4634_v62, %v3428_v48 }
0x15fe   :  { %v3433_v18 = vsel %vm3432_vm5, %v4634_v62, %v3429_v38 }
0x1656   :  { %v3455_v15 = vpop.permute.xlu1 %3454 }
0x1657   :  { %4274 = vmatmul.msk.f32.vlgmr.msra.gmra.mxu0 %vm126_vm9, %v3455_v15  ;;  %4275 = vmatmul.msk.f32.vlgmr.msra.gmra.mxu1 %vm126_vm9, %v3455_v15 }
0x1658   :  { %3763 = vmatpush.msra.mxu0 %v6210_v27  ;;  %3783 = vmatpush.msra.mxu1 %v6213_v49  ;;  %v3438_v27 = vsel %vm3435_vm6, %v3437_v3, %v3433_v18 }
0x165a   :  { %3764 = vmatpush.msra.mxu0 %v6218_v51  ;;  %3784 = vmatpush.msra.mxu1 %v6221_v45  ;;  %v4845_v51 = vld [vmem:[#allocation3 + $0x70] sm:$0xff]  ;;  %v4846_v45 = vld [vmem:[#allocation3 + $0x78] sm:$0xff] }
0x165c   :  { %3765 = vmatpush.msra.mxu0 %v6226_v47  ;;  %3785 = vmatpush.msra.mxu1 %v6229_v63  ;;  %v4847_v47 = vld [vmem:[#allocation3 + $0x60] sm:$0xff]  ;;  %v4848_v63 = vld [vmem:[#allocation3 + $0x68] sm:$0xff] }
0x165e   :  { %3766 = vmatpush.msra.mxu0 %v6234_v13  ;;  %3786 = vmatpush.msra.mxu1 %v6237_v14  ;;  %v3450_v49 = vpop.permute.xlu0 %3449  ;;  %v4849_v13 = vld [vmem:[#allocation3 + $0x50] sm:$0xff]  ;;  %v4850_v14 = vld [vmem:[#allocation3 + $0x58] sm:$0xff] }
0x165f   :  { %v3452_v44 = vmul.f32 %v3450_v49, %v3438_v27 }
0x1660   :  { %3767 = vmatpush.msra.mxu0 %v6242_v6  ;;  %3787 = vmatpush.msra.mxu1 %v6245_v32  ;;  %v4851_v6 = vld [vmem:[#allocation3 + $0x40] sm:$0xff]  ;;  %v4852_v32 = vld [vmem:[#allocation3 + $0x48] sm:$0xff] }
0x1661   :  { %4276 = vmatmul.msk.f32.vlgmr.msra.gmra.mxu2 %vm126_vm9, %v3452_v44  ;;  %4277 = vmatmul.msk.f32.vlgmr.msra.gmra.mxu3 %vm126_vm9, %v3452_v44 }
0x1662   :  { %4281 = vmatmul.msk.f32.vlgmr.msrb.gmra.mxu0 %vm126_vm9, %v3452_v44  ;;  %4282 = vmatmul.msk.f32.vlgmr.msrb.gmra.mxu1 %vm126_vm9, %v3452_v44 }
0x1663   :  { %3864 = vmatpush.msra.mxu2 %v4845_v51  ;;  %3884 = vmatpush.msra.mxu3 %v4846_v45 }
0x1664   :  { %3768 = vmatpush.msra.mxu0 %v6250_v4  ;;  %3788 = vmatpush.msra.mxu1 %v6253_v19  ;;  %v4853_v4 = vld [vmem:[#allocation3 + $0x30] sm:$0xff]  ;;  %v4854_v19 = vld [vmem:[#allocation3 + $0x38] sm:$0xff] }
0x1665   :  { %3865 = vmatpush.msra.mxu2 %v4847_v47  ;;  %3885 = vmatpush.msra.mxu3 %v4848_v63 }
0x1666   :  { %3769 = vmatpush.msra.mxu0 %v6258_v10  ;;  %3789 = vmatpush.msra.mxu1 %v6261_v35  ;;  %v4855_v10 = vld [vmem:[#allocation3 + $0x20] sm:$0xff]  ;;  %v4856_v35 = vld [vmem:[#allocation3 + $0x28] sm:$0xff] }
0x1667   :  { %3866 = vmatpush.msra.mxu2 %v4849_v13  ;;  %3886 = vmatpush.msra.mxu3 %v4850_v14 }
0x1668   :  { %3770 = vmatpush.msra.mxu0 %v6266_v8  ;;  %3790 = vmatpush.msra.mxu1 %v6269_v37  ;;  %v4857_v8 = vld [vmem:[#allocation8 + $0x50] sm:$0xff]  ;;  %v4858_v37 = vld [vmem:[#allocation8 + $0x58] sm:$0xff] }
0x1669   :  { %3867 = vmatpush.msra.mxu2 %v4851_v6  ;;  %3887 = vmatpush.msra.mxu3 %v4852_v32 }
0x166a   :  { %3974 = vmatpush.msrb.mxu0 %v6272_v33  ;;  %3994 = vmatpush.msrb.mxu1 %v6275_v29  ;;  %v4860_v33 = vld [vmem:[#allocation3 + $0x18] sm:$0xff]  ;;  %v4861_v29 = vld [vmem:[#allocation8 + $0x40] sm:$0xff] }
0x166b   :  { %3868 = vmatpush.msra.mxu2 %v4853_v4  ;;  %3888 = vmatpush.msra.mxu3 %v4854_v19 }
0x166c   :  { %3975 = vmatpush.msrb.mxu0 %v6278_v5  ;;  %3995 = vmatpush.msrb.mxu1 %v6281_v53  ;;  %v4864_v5 = vld [vmem:[#allocation3 + $0x8] sm:$0xff]  ;;  %v4865_v53 = vld [vmem:[#allocation8 + $0x30] sm:$0xff] }
0x166d   :  { %3869 = vmatpush.msra.mxu2 %v4855_v10  ;;  %3889 = vmatpush.msra.mxu3 %v4856_v35 }
0x166e   :  { %3976 = vmatpush.msrb.mxu0 %v4857_v8  ;;  %3996 = vmatpush.msrb.mxu1 %v4858_v37 }
0x166f   :  { %3870 = vmatpush.msra.mxu2 %v4859_v58  ;;  %3890 = vmatpush.msra.mxu3 %v4860_v33 }
0x1670   :  { %3977 = vmatpush.msrb.mxu0 %v4861_v29  ;;  %3997 = vmatpush.msrb.mxu1 %v4862_v28 }
0x1671   :  { %3871 = vmatpush.msra.mxu2 %v4863_v55  ;;  %3891 = vmatpush.msra.mxu3 %v4864_v5 }
0x1672   :  { %3978 = vmatpush.msrb.mxu0 %v4865_v53  ;;  %3998 = vmatpush.msrb.mxu1 %v4866_v25 }
0x1674   :  { %3979 = vmatpush.msrb.mxu0 %v6454_v11  ;;  %3999 = vmatpush.msrb.mxu1 %v6457_v20 }
0x1676   :  { %3980 = vmatpush.msrb.mxu0 %v6460_v12  ;;  %4000 = vmatpush.msrb.mxu1 %v6463_v7 }
0x1678   :  { %3981 = vmatpush.msrb.mxu0 %v6466_v57  ;;  %4001 = vmatpush.msrb.mxu1 %v6469_v61 }
0x16d4   :  { %v3495_v36 = vpop.f32.mrf.mxu1  ;;  %v3475_v21 = vpop.f32.mrf.mxu0 }
0x16df   :  { %v3639_v26 = vpop.f32.mrf.mxu1  ;;  %v3619_v43 = vpop.f32.mrf.mxu0 }
0x16e0   :  { %v3644_v59 = vrot.slane %v3639_v26, 7 }
0x16e2   :  { %v3645_v11 = vsel %vm173_vm0, %v3619_v43, %v3644_v59 }
0x16e3   :  { %v3647_v20 = vadd.f32 %v4280_v2, %v3645_v11 }
0x16e4   :  { %v3518_v54 = vpop.f32.mrf.mxu2  ;;  %v3538_v31 = vpop.f32.mrf.mxu3 }
0x16e5   :  { %v3519_v12 = vadd.f32 %v3518_v54, %v3475_v21  ;;  %3671 = vrot.lane.b32.xlu1 %v3647_v20, %s4991_s17  ;;  %v4283_v7 = vmul.f32 -1.442695, %v3647_v20  ;;  %v3539_v0 = vadd.f32 %v3538_v31, %v3495_v36  ;;  %v3668_v41 = vrot.slane %v3647_v20, 1 }
0x16e7   :  { %v3541_v57 = vadd.f32 %v3519_v12, %v6773_v39  ;;  %4635 = vpow2.f32 %v4283_v7  ;;  %v3542_v52 = vadd.f32 %v3539_v0, %v6774_v50  ;;  %v4874_v0 = vld [vmem:[#allocation6 + $0x48] sm:$0xff] }
0x16e9   :  { %v4278_v61 = vmul.f32 -1.442695, %v3541_v57  ;;  %v4279_v19 = vmul.f32 -1.442695, %v3542_v52 }
0x16eb   :  { %4637 = vpow2.f32 %v4278_v61  ;;  %v4867_v61 = vld [vmem:[#allocation6 + $0x70] sm:$0xff] }
0x16ed   :  { %v4636_v1 = vpop.eup %4635 }
0x16ee   :  { %v3651_v22 = vadd.f32 1.0, %v4636_v1  ;;  %v4869_v1 = vld [vmem:[#allocation6 + $0x60] sm:$0xff] }
0x16f0   :  { %4639 = vrcp.f32 %v3651_v22  ;;  %v3661_v24 = vand.u32 2147483647, %v3651_v22  ;;  %v3663_v48 = vand.u32 2147483648, %v3651_v22  ;;  %vm3657_vm8 = vweird.f32 %v3651_v22 }
0x16f1   :  { %v4638_v16 = vpop.eup %4637 }
0x16f2   :  { %v3546_v17 = vadd.f32 1.0, %v4638_v16  ;;  %vm3662_vm11 = vcmp.eq.f32.partialorder %v3661_v24, 8.507059e+37  ;;  %v3664_v18 = vor.u32 1.1754944e-38, %v3663_v48  ;;  %v4871_v16 = vld [vmem:[#allocation6 + $0x50] sm:$0xff]  ;;  %v4880_v48 = vld [vmem:[#allocation6 + $0x18] sm:$0xff] }
0x16f3   :  { %v4879_v24 = vld [vmem:[#allocation6 + $0x10] sm:$0xff] }
0x16f4   :  { %4641 = vrcp.f32 %v3546_v17  ;;  %v3558_v3 = vand.u32 2147483648, %v3546_v17  ;;  %v3556_v44 = vand.u32 2147483647, %v3546_v17  ;;  %vm3552_vm13 = vweird.f32 %v3546_v17 }
0x16f5   :  { %4643 = vtanh.f32 %v3668_v41 }
0x16f6   :  { %v4640_v40 = vpop.eup %4639  ;;  %4645 = vtanh.f32 %v3542_v52  ;;  %v3559_v13 = vor.u32 1.1754944e-38, %v3558_v3  ;;  %vm3557_vm15 = vcmp.eq.f32.partialorder %v3556_v44, 8.507059e+37  ;;  %v4878_v52 = vld [vmem:[#allocation6 + $0x28] sm:$0xff] }
0x16f7   :  { %v3653_v42 = vmul.f32 %v4640_v40, %v3651_v22  ;;  %vm3658_vm7 = vweird.f32 %v4640_v40  ;;  %4647 = vpow2.f32 %v4279_v19  ;;  %v4870_v22 = vld [vmem:[#allocation6 + $0x68] sm:$0xff] }
0x16f8   :  { %vm3659_vm10 = vmor %vm3657_vm8, %vm3658_vm7 }
0x16f9   :  { %v3654_v46 = vsub.f32 1.0, %v3653_v42  ;;  %v4875_v42 = vld [vmem:[#allocation6 + $0x30] sm:$0xff] }
0x16fa   :  { %v4642_v62 = vpop.eup %4641 }
0x16fb   :  { %v3655_v15 = vmul.f32 %v4640_v40, %v3654_v46  ;;  %v3548_v38 = vmul.f32 %v4642_v62, %v3546_v17  ;;  %vm3553_vm12 = vweird.f32 %v4642_v62  ;;  %v4644_v51 = vpop.eup %4643  ;;  %v4872_v17 = vld [vmem:[#allocation6 + $0x58] sm:$0xff] }
0x16fc   :  { %vm3554_vm14 = vmor %vm3552_vm13, %vm3553_vm12  ;;  %v4646_v6 = vpop.eup %4645  ;;  %v4876_v46 = vld [vmem:[#allocation6 + $0x38] sm:$0xff] }
0x16fd   :  { %v3656_v34 = vadd.f32 %v4640_v40, %v3655_v15  ;;  %v3549_v56 = vsub.f32 1.0, %v3548_v38  ;;  %v4648_v10 = vpop.eup %4647  ;;  %v4881_v15 = vld [vmem:[#allocation6] sm:$0xff]  ;;  %v4882_v38 = vld [vmem:[#allocation6 + $0x8] sm:$0xff] }
0x16fe   :  { %v3566_v35 = vadd.f32 1.0, %v4648_v10 }
0x16ff   :  { %v3660_v27 = vsel %vm3659_vm10, %v4640_v40, %v3656_v34  ;;  %v3550_v49 = vmul.f32 %v4642_v62, %v3549_v56  ;;  %v4873_v40 = vld [vmem:[#allocation6 + $0x40] sm:$0xff] }
0x1700   :  { %v3665_v45 = vsel %vm3662_vm11, %v3664_v18, %v3660_v27  ;;  %4649 = vrcp.f32 %v3566_v35  ;;  %v3578_v53 = vand.u32 2147483648, %v3566_v35  ;;  %vm3572_vm2 = vweird.f32 %v3566_v35 }
0x1701   :  { %v3695_v47 = vmul.f32 %v4644_v51, %v3665_v45  ;;  %v3551_v63 = vadd.f32 %v4642_v62, %v3550_v49  ;;  %v3576_v25 = vand.u32 2147483647, %v3566_v35 }
0x1702   :  { %v3579_v21 = vor.u32 1.1754944e-38, %v3578_v53 }
0x1703   :  { %3697 = vrot.lane.b32.xlu0 %v3695_v47, %s4991_s17  ;;  %v3555_v14 = vsel %vm3554_vm14, %v4642_v62, %v3551_v63  ;;  %vm3577_vm4 = vcmp.eq.f32.partialorder %v3576_v25, 8.507059e+37  ;;  %v4877_v62 = vld [vmem:[#allocation6 + $0x20] sm:$0xff] }
0x1704   :  { %v3560_v32 = vsel %vm3557_vm15, %v3559_v13, %v3555_v14 }
0x1705   :  { %v3583_v4 = vmul.f32 %v4646_v6, %v3560_v32  ;;  %v3582_v29 = vmul.f32 %v3560_v32, %v6482_v60  ;;  %v3694_v60 = vmul.f32 %v3665_v45, %v6488_v9  ;;  %v4868_v9 = vld [vmem:[#allocation6 + $0x78] sm:$0xff] }
0x1706   :  { %v4650_v8 = vpop.eup %4649 }
0x1707   :  { %3585 = vrot.lane.b32.xlu2 %v3583_v4, %s4991_s17  ;;  %v3568_v37 = vmul.f32 %v4650_v8, %v3566_v35  ;;  %vm3573_vm1 = vweird.f32 %v4650_v8 }
0x1708   :  { %vm3574_vm3 = vmor %vm3572_vm2, %vm3573_vm1 }
0x1709   :  { %v3569_v58 = vsub.f32 1.0, %v3568_v37  ;;  %v4291_v37 = vld [vmem:[%s6615_s0 + $0x17] ss:$8 sm:$0x3] }
0x170b   :  { %v3570_v33 = vmul.f32 %v4650_v8, %v3569_v58 }
0x170d   :  { %v3571_v5 = vadd.f32 %v4650_v8, %v3570_v33 }
0x170f   :  { %v3575_v36 = vsel %vm3574_vm3, %v4650_v8, %v3571_v5 }
0x1710   :  { %v3580_v59 = vsel %vm3577_vm4, %v3579_v21, %v3575_v36 }
0x1757   :  { %v3672_v54 = vpop.permute.xlu1 %3671 }
0x1758   :  { %v3673_v12 = vrot.slane %v3672_v54, 1 }
0x175a   :  { %v4284_v7 = vmul.f32 -1.442695, %v3673_v12 }
0x1761   :  { %v3586_v28 = vpop.permute.xlu2 %3585 }
0x1762   :  { %v6536_v55 = vadd.f32 %v3586_v28, %v3582_v29 }
0x1764   :  { %4651 = vtanh.f32 %v6536_v55 }
0x176a   :  { %v4652_v26 = vpop.eup %4651 }
0x176b   :  { %v6539_v2 = vmul.f32 %v4652_v26, %v3580_v59 }
0x176d   :  { %3708 = vrot.lane.b32.xlu2 %v6539_v2, %s4991_s17 }
0x1775   :  { %v3698_v43 = vpop.permute.xlu0 %3697 }
0x1776   :  { %v6544_v11 = vadd.f32 %v3698_v43, %v3694_v60 }
0x1778   :  { %4653 = vtanh.f32 %v6544_v11 }
0x1779   :  { %4655 = vpow2.f32 %v4284_v7 }
0x177e   :  { %v4654_v20 = vpop.eup %4653 }
0x177f   :  { %3703 = vrot.lane.b32.xlu0 %v4654_v20, %s4991_s17  ;;  %v4656_v31 = vpop.eup %4655 }
0x1780   :  { %v3678_v41 = vadd.f32 1.0, %v4656_v31 }
0x1782   :  { %4657 = vrcp.f32 %v3678_v41  ;;  %v3690_v49 = vand.u32 2147483648, %v3678_v41  ;;  %vm3684_vm6 = vweird.f32 %v3678_v41  ;;  %v3688_v44 = vand.u32 2147483647, %v3678_v41 }
0x1784   :  { %v3691_v45 = vor.u32 1.1754944e-38, %v3690_v49  ;;  %vm3689_vm8 = vcmp.eq.f32.partialorder %v3688_v44, 8.507059e+37 }
0x1788   :  { %v4658_v34 = vpop.eup %4657 }
0x1789   :  { %v3680_v56 = vmul.f32 %v4658_v34, %v3678_v41  ;;  %vm3685_vm5 = vweird.f32 %v4658_v34 }
0x178a   :  { %vm3686_vm7 = vmor %vm3684_vm6, %vm3685_vm5 }
0x178b   :  { %v3681_v18 = vsub.f32 1.0, %v3680_v56 }
0x178d   :  { %v3682_v3 = vmul.f32 %v4658_v34, %v3681_v18 }
0x178f   :  { %v3683_v27 = vadd.f32 %v4658_v34, %v3682_v3 }
0x1791   :  { %v3687_v51 = vsel %vm3686_vm7, %v4658_v34, %v3683_v27 }
0x1792   :  { %v3692_v47 = vsel %vm3689_vm8, %v3691_v45, %v3687_v51 }
0x17c7   :  { %v3709_v57 = vpop.permute.xlu2 %3708 }
0x17c8   :  { %4285 = vmatmul.msk.f32.vlgmr.msrb.gmra.mxu2 %vm126_vm9, %v3709_v57  ;;  %4286 = vmatmul.msk.f32.vlgmr.msrb.gmra.mxu3 %vm126_vm9, %v3709_v57 }
0x17c9   :  { %4017 = vmatpush.msrb.mxu2 %v4867_v61  ;;  %4037 = vmatpush.msrb.mxu3 %v4868_v9 }
0x17cb   :  { %4018 = vmatpush.msrb.mxu2 %v4869_v1  ;;  %4038 = vmatpush.msrb.mxu3 %v4870_v22 }
0x17cd   :  { %4019 = vmatpush.msrb.mxu2 %v4871_v16  ;;  %4039 = vmatpush.msrb.mxu3 %v4872_v17 }
0x17cf   :  { %4020 = vmatpush.msrb.mxu2 %v4873_v40  ;;  %4040 = vmatpush.msrb.mxu3 %v4874_v0 }
0x17d1   :  { %4021 = vmatpush.msrb.mxu2 %v4875_v42  ;;  %4041 = vmatpush.msrb.mxu3 %v4876_v46 }
0x17d3   :  { %4022 = vmatpush.msrb.mxu2 %v4877_v62  ;;  %4042 = vmatpush.msrb.mxu3 %v4878_v52 }
0x17d5   :  { %4023 = vmatpush.msrb.mxu2 %v4879_v24  ;;  %4043 = vmatpush.msrb.mxu3 %v4880_v48 }
0x17d7   :  { %4024 = vmatpush.msrb.mxu2 %v4881_v15  ;;  %4044 = vmatpush.msrb.mxu3 %v4882_v38 }
0x17f1   :  { %v3704_v63 = vpop.permute.xlu0 %3703 }
0x17f2   :  { %v3706_v13 = vmul.f32 %v3704_v63, %v3692_v47 }
0x17f4   :  { %4287 = vmatmul.msk.f32.vlgmr.msra.gmra.mxu0 %vm126_vm9, %v3706_v13  ;;  %4288 = vmatmul.msk.f32.vlgmr.msra.gmra.mxu1 %vm126_vm9, %v3706_v13 }
0x17f5   :  { %4292 = vmatmul.msk.f32.vlgmr.msra.gmra.mxu2 %vm126_vm9, %v3706_v13  ;;  %4293 = vmatmul.msk.f32.vlgmr.msra.gmra.mxu3 %vm126_vm9, %v3706_v13 }
0x184b   :  { %v3749_v14 = vpop.f32.mrf.mxu3  ;;  %v3729_v6 = vpop.f32.mrf.mxu2 }
0x1871   :  { %v3772_v32 = vpop.f32.mrf.mxu0  ;;  %v3792_v25 = vpop.f32.mrf.mxu1 }
0x1872   :  { %v3773_v4 = vadd.f32 %v3772_v32, %v3729_v6  ;;  %v3793_v36 = vadd.f32 %v3792_v25, %v3749_v14 }
0x1874   :  { %v3795_v19 = vadd.f32 %v3773_v4, %v6773_v39  ;;  %v3796_v59 = vadd.f32 %v3793_v36, %v6774_v50 }
0x1876   :  { %v4289_v10 = vmul.f32 -1.442695, %v3795_v19  ;;  %v4290_v34 = vmul.f32 -1.442695, %v3796_v59 }
0x1878   :  { %4659 = vpow2.f32 %v4289_v10  ;;  %v3893_v35 = vpop.f32.mrf.mxu3  ;;  %v3873_v58 = vpop.f32.mrf.mxu2 }
0x1879   :  { %v3898_v8 = vrot.slane %v3893_v35, 7 }
0x187b   :  { %v3899_v33 = vsel %vm173_vm0, %v3873_v58, %v3898_v8  ;;  %v4310_v58 = vld [vmem:[%s6620_s5] ss:$0 sm:$0xff] }
0x187c   :  { %v3901_v29 = vadd.f32 %v4291_v37, %v3899_v33 }
0x187e   :  { %v4660_v28 = vpop.eup %4659  ;;  %3925 = vrot.lane.b32.xlu0 %v3901_v29, %s4991_s17  ;;  %v4294_v5 = vmul.f32 -1.442695, %v3901_v29  ;;  %v3922_v9 = vrot.slane %v3901_v29, 1 }
0x187f   :  { %v3800_v53 = vadd.f32 1.0, %v4660_v28 }
0x1880   :  { %4661 = vpow2.f32 %v4294_v5 }
0x1881   :  { %4663 = vrcp.f32 %v3800_v53  ;;  %v3812_v54 = vand.u32 2147483648, %v3800_v53  ;;  %v3810_v7 = vand.u32 2147483647, %v3800_v53  ;;  %vm3806_vm10 = vweird.f32 %v3800_v53 }
0x1883   :  { %v3813_v1 = vor.u32 1.1754944e-38, %v3812_v54  ;;  %vm3811_vm12 = vcmp.eq.f32.partialorder %v3810_v7, 8.507059e+37 }
0x1886   :  { %v4662_v21 = vpop.eup %4661 }
0x1887   :  { %v4664_v26 = vpop.eup %4663  ;;  %v3905_v60 = vadd.f32 1.0, %v4662_v21 }
0x1888   :  { %v3802_v43 = vmul.f32 %v4664_v26, %v3800_v53  ;;  %vm3807_vm0 = vweird.f32 %v4664_v26 }
0x1889   :  { %4665 = vrcp.f32 %v3905_v60  ;;  %vm3808_vm11 = vmor %vm3806_vm10, %vm3807_vm0  ;;  %v3917_v41 = vand.u32 2147483648, %v3905_v60  ;;  %v3915_v46 = vand.u32 2147483647, %v3905_v60  ;;  %vm3911_vm14 = vweird.f32 %v3905_v60 }
0x188a   :  { %v3803_v20 = vsub.f32 1.0, %v3802_v43  ;;  %4667 = vtanh.f32 %v3796_v59 }
0x188b   :  { %4669 = vtanh.f32 %v3922_v9  ;;  %v3918_v52 = vor.u32 1.1754944e-38, %v3917_v41  ;;  %vm3916_vm1 = vcmp.eq.f32.partialorder %v3915_v46, 8.507059e+37 }
0x188c   :  { %v3804_v12 = vmul.f32 %v4664_v26, %v3803_v20  ;;  %4671 = vpow2.f32 %v4290_v34 }
0x188e   :  { %v3805_v57 = vadd.f32 %v4664_v26, %v3804_v12 }
0x188f   :  { %v4666_v61 = vpop.eup %4665 }
0x1890   :  { %v3809_v22 = vsel %vm3808_vm11, %v4664_v26, %v3805_v57  ;;  %v3907_v16 = vmul.f32 %v4666_v61, %v3905_v60  ;;  %v4668_v17 = vpop.eup %4667  ;;  %vm3912_vm13 = vweird.f32 %v4666_v61 }
0x1891   :  { %v3814_v31 = vsel %vm3811_vm12, %v3813_v1, %v3809_v22  ;;  %vm3913_vm15 = vmor %vm3911_vm14, %vm3912_vm13  ;;  %v4670_v48 = vpop.eup %4669  ;;  %v6775_v1 = vld [vmem:[#allocation17_spill] sm:$0xff] }
0x1892   :  { %v3837_v40 = vmul.f32 %v4668_v17, %v3814_v31  ;;  %v3908_v0 = vsub.f32 1.0, %v3907_v16  ;;  %v4672_v56 = vpop.eup %4671  ;;  %v3836_v51 = vmul.f32 %v3814_v31, %v6536_v55 }
0x1893   :  { %v3820_v18 = vadd.f32 1.0, %v4672_v56 }
0x1894   :  { %3839 = vrot.lane.b32.xlu2 %v3837_v40, %s4991_s17  ;;  %v3909_v42 = vmul.f32 %v4666_v61, %v3908_v0 }
0x1895   :  { %4673 = vrcp.f32 %v3820_v18  ;;  %v3832_v13 = vand.u32 2147483648, %v3820_v18  ;;  %vm3826_vm3 = vweird.f32 %v3820_v18  ;;  %v3830_v14 = vand.u32 2147483647, %v3820_v18 }
0x1896   :  { %v3910_v62 = vadd.f32 %v4666_v61, %v3909_v42 }
0x1897   :  { %v3833_v32 = vor.u32 1.1754944e-38, %v3832_v13  ;;  %vm3831_vm5 = vcmp.eq.f32.partialorder %v3830_v14, 8.507059e+37 }
0x1898   :  { %v3914_v24 = vsel %vm3913_vm15, %v4666_v61, %v3910_v62 }
0x1899   :  { %v3919_v15 = vsel %vm3916_vm1, %v3918_v52, %v3914_v24 }
0x189a   :  { %v3949_v38 = vmul.f32 %v4670_v48, %v3919_v15  ;;  %v3948_v55 = vmul.f32 %v3919_v15, %v6544_v11 }
0x189b   :  { %v4674_v3 = vpop.eup %4673 }
0x189c   :  { %3951 = vrot.lane.b32.xlu1 %v3949_v38, %s4991_s17  ;;  %v3822_v27 = vmul.f32 %v4674_v3, %v3820_v18  ;;  %vm3827_vm2 = vweird.f32 %v4674_v3 }
0x189d   :  { %vm3828_vm4 = vmor %vm3826_vm3, %vm3827_vm2  ;;  %vm4111_vm3 = vcmask 0  }
0x189e   :  { %v3823_v49 = vsub.f32 1.0, %v3822_v27 }
0x18a0   :  { %v3824_v44 = vmul.f32 %v4674_v3, %v3823_v49 }
0x18a2   :  { %v3825_v63 = vadd.f32 %v4674_v3, %v3824_v44 }
0x18a4   :  { %v3829_v6 = vsel %vm3828_vm4, %v4674_v3, %v3825_v63 }
0x18a5   :  { %v3834_v19 = vsel %vm3831_vm5, %v3833_v32, %v3829_v6 }
0x18ee   :  { %v3840_v45 = vpop.permute.xlu2 %3839 }
0x18ef   :  { %v6564_v47 = vadd.f32 %v3840_v45, %v3836_v51 }
0x18f0   :  { %v3926_v29 = vpop.permute.xlu0 %3925 }
0x18f1   :  { %4675 = vtanh.f32 %v6564_v47  ;;  %v3927_v28 = vrot.slane %v3926_v29, 1 }
0x18f3   :  { %v4295_v11 = vmul.f32 -1.442695, %v3927_v28 }
0x18f7   :  { %v4676_v4 = vpop.eup %4675 }
0x18f8   :  { %v3844_v10 = vmul.f32 %v4676_v4, %v3834_v19 }
0x18fa   :  { %3962 = vrot.lane.b32.xlu2 %v3844_v10, %s4991_s17 }
0x190e   :  { %v3952_v35 = vpop.permute.xlu1 %3951 }
0x190f   :  { %v3954_v8 = vadd.f32 %v3952_v35, %v3948_v55 }
0x1911   :  { %4677 = vtanh.f32 %v3954_v8 }
0x1912   :  { %4679 = vpow2.f32 %v4295_v11 }
0x1917   :  { %v4678_v37 = vpop.eup %4677 }
0x1918   :  { %3957 = vrot.lane.b32.xlu1 %v4678_v37, %s4991_s17  ;;  %v4680_v5 = vpop.eup %4679 }
0x1919   :  { %v3932_v53 = vadd.f32 1.0, %v4680_v5 }
0x191b   :  { %4681 = vrcp.f32 %v3932_v53  ;;  %v3944_v60 = vand.u32 2147483648, %v3932_v53  ;;  %vm3938_vm7 = vweird.f32 %v3932_v53  ;;  %v3942_v43 = vand.u32 2147483647, %v3932_v53 }
0x191d   :  { %v3945_v54 = vor.u32 1.1754944e-38, %v3944_v60  ;;  %vm3943_vm0 = vcmp.eq.f32.partialorder %v3942_v43, 8.507059e+37 }
0x1920   :  { %2826 = vrot.lane.b32.xlu1 %v4310_v58, %s4991_s17 }
0x1921   :  { %v4682_v25 = vpop.eup %4681 }
0x1922   :  { %v3934_v36 = vmul.f32 %v4682_v25, %v3932_v53  ;;  %vm3939_vm6 = vweird.f32 %v4682_v25 }
0x1923   :  { %vm3940_vm8 = vmor %vm3938_vm7, %vm3939_vm6 }
0x1924   :  { %v3935_v21 = vsub.f32 1.0, %v3934_v36 }
0x1926   :  { %v3936_v26 = vmul.f32 %v4682_v25, %v3935_v21 }
0x1928   :  { %v3937_v59 = vadd.f32 %v4682_v25, %v3936_v26 }
0x192a   :  { %v3941_v20 = vsel %vm3940_vm8, %v4682_v25, %v3937_v59 }
0x192b   :  { %v3946_v12 = vsel %vm3943_vm0, %v3945_v54, %v3941_v20 }
0x1954   :  { %v3963_v33 = vpop.permute.xlu2 %3962 }
0x1955   :  { %4296 = vmatmul.msk.f32.vlgmr.msrb.gmra.mxu0 %vm126_vm9, %v3963_v33  ;;  %4297 = vmatmul.msk.f32.vlgmr.msrb.gmra.mxu1 %vm126_vm9, %v3963_v33 }
0x198a   :  { %v3958_v7 = vpop.permute.xlu1 %3957 }
0x198b   :  { %v3960_v57 = vmul.f32 %v3958_v7, %v3946_v12 }
0x198d   :  { %4298 = vmatmul.msk.f32.vlgmr.msrb.gmra.mxu2 %vm126_vm9, %v3960_v57  ;;  %4299 = vmatmul.msk.f32.vlgmr.msrb.gmra.mxu3 %vm126_vm9, %v3960_v57  ;;  %vm2834_vm9 = vcmask 516096  }
0x1992   :  { %v6578_v61 = vpop.permute.xlu1 %2826 }
0x1993   :  { %v3083_v9 = vmul.f32 %v6402_v23, %v6578_v61  ;;  %v2829_v22 = vmul.f32 %v6578_v61, %v6775_v1  ;;  %v3337_v16 = vmul.f32 %v6486_v30, %v6578_v61  ;;  %v3591_v17 = vmul.f32 %v6539_v2, %v6578_v61 }
0x1994   :  { %v3845_v31 = vmul.f32 %v3844_v10, %v6578_v61 }
0x1995   :  { %3085 = vrot.lane.b32.xlu1 %v3083_v9, %s4991_s17  ;;  %2831 = vrot.lane.b32.xlu2 %v2829_v22, %s4991_s17 }
0x199d   :  { %3339 = vrot.lane.b32.xlu1 %v3337_v16, %s4991_s17 }
0x19a5   :  { %3593 = vrot.lane.b32.xlu1 %v3591_v17, %s4991_s17 }
0x19ad   :  { %3847 = vrot.lane.b32.xlu1 %v3845_v31, %s4991_s17 }
0x19d2   :  { %v3983_v41 = vpop.f32.mrf.mxu0  ;;  %v4003_v38 = vpop.f32.mrf.mxu1 }
0x19ef   :  { %v2832_v32 = vpop.permute.xlu2 %2831 }
0x1a07   :  { %v3086_v23 = vpop.permute.xlu1 %3085 }
0x1a08   :  { %v3088_v40 = vsel %vm2834_vm9, %v3086_v23, 0.0 }
0x1a09   :  { %3089 = vadd.xlane.f32.xlu2 %v3088_v40 }
0x1a0f   :  { %v6595_v0 = vpop.permute.xlu1 %3339 }
0x1a10   :  { %v4026_v30 = vpop.f32.mrf.mxu2  ;;  %v4046_v15 = vpop.f32.mrf.mxu3 }
0x1a11   :  { %v4027_v42 = vadd.f32 %v4026_v30, %v3983_v41  ;;  %v4047_v34 = vadd.f32 %v4046_v15, %v4003_v38 }
0x1a13   :  { %v4049_v46 = vadd.f32 %v4027_v42, %v6773_v39  ;;  %v4050_v18 = vadd.f32 %v4047_v34, %v6774_v50  ;;  %v2835_v50 = vsel %vm2834_vm9, %v2832_v32, 0.0 }
0x1a15   :  { %v4300_v62 = vmul.f32 -1.442695, %v4049_v46  ;;  %v4301_v10 = vmul.f32 -1.442695, %v4050_v18 }
0x1a17   :  { %4683 = vpow2.f32 %v4300_v62  ;;  %v3594_v2 = vpop.permute.xlu1 %3593 }
0x1a18   :  { %v3596_v52 = vsel %vm2834_vm9, %v3594_v2, 0.0 }
0x1a19   :  { %3597 = vadd.xlane.f32.xlu2 %v3596_v52 }
0x1a1d   :  { %v4684_v24 = vpop.eup %4683 }
0x1a1e   :  { %v4054_v48 = vadd.f32 1.0, %v4684_v24 }
0x1a1f   :  { %v3848_v4 = vpop.permute.xlu1 %3847 }
0x1a20   :  { %4685 = vrcp.f32 %v4054_v48  ;;  %v4066_v49 = vand.u32 2147483648, %v4054_v48  ;;  %v4064_v44 = vand.u32 2147483647, %v4054_v48  ;;  %vm4060_vm11 = vweird.f32 %v4054_v48 }
0x1a21   :  { %4687 = vtanh.f32 %v4050_v18  ;;  %v3850_v19 = vsel %vm2834_vm9, %v3848_v4, 0.0 }
0x1a22   :  { %v4067_v45 = vor.u32 1.1754944e-38, %v4066_v49  ;;  %vm4065_vm13 = vcmp.eq.f32.partialorder %v4064_v44, 8.507059e+37  ;;  %4689 = vpow2.f32 %v4301_v10 }
0x1a26   :  { %v4686_v56 = vpop.eup %4685 }
0x1a27   :  { %v4056_v3 = vmul.f32 %v4686_v56, %v4054_v48  ;;  %vm4061_vm10 = vweird.f32 %v4686_v56  ;;  %v4688_v13 = vpop.eup %4687 }
0x1a28   :  { %vm4062_vm12 = vmor %vm4060_vm11, %vm4061_vm10  ;;  %v4690_v55 = vpop.eup %4689 }
0x1a29   :  { %v4057_v27 = vsub.f32 1.0, %v4056_v3  ;;  %v4074_v35 = vadd.f32 1.0, %v4690_v55 }
0x1a2b   :  { %v4058_v39 = vmul.f32 %v4686_v56, %v4057_v27  ;;  %4691 = vrcp.f32 %v4074_v35  ;;  %v4086_v53 = vand.u32 2147483648, %v4074_v35  ;;  %vm4080_vm15 = vweird.f32 %v4074_v35 }
0x1a2c   :  { %v4084_v25 = vand.u32 2147483647, %v4074_v35 }
0x1a2d   :  { %v4059_v51 = vadd.f32 %v4686_v56, %v4058_v39  ;;  %v4087_v21 = vor.u32 1.1754944e-38, %v4086_v53 }
0x1a2e   :  { %vm4085_vm2 = vcmp.eq.f32.partialorder %v4084_v25, 8.507059e+37 }
0x1a2f   :  { %v4063_v63 = vsel %vm4062_vm12, %v4686_v56, %v4059_v51 }
0x1a30   :  { %v4068_v14 = vsel %vm4065_vm13, %v4067_v45, %v4063_v63 }
0x1a31   :  { %v4091_v6 = vmul.f32 %v4688_v13, %v4068_v14  ;;  %v4692_v8 = vpop.eup %4691  ;;  %v4090_v29 = vmul.f32 %v4068_v14, %v6564_v47  ;;  %v3342_v47 = vsel %vm2834_vm9, %v6595_v0, 0.0 }
0x1a32   :  { %v4076_v37 = vmul.f32 %v4692_v8, %v4074_v35  ;;  %vm4081_vm14 = vweird.f32 %v4692_v8 }
0x1a33   :  { %4093 = vrot.lane.b32.xlu0 %v4091_v6, %s4991_s17  ;;  %vm4082_vm1 = vmor %vm4080_vm15, %vm4081_vm14 }
0x1a34   :  { %v4077_v58 = vsub.f32 1.0, %v4076_v37 }
0x1a36   :  { %v4078_v33 = vmul.f32 %v4692_v8, %v4077_v58 }
0x1a38   :  { %v4079_v5 = vadd.f32 %v4692_v8, %v4078_v33 }
0x1a3a   :  { %v4083_v36 = vsel %vm4082_vm1, %v4692_v8, %v4079_v5 }
0x1a3b   :  { %v4088_v59 = vsel %vm4085_vm2, %v4087_v21, %v4083_v36 }
0x1a5d   :  { %2836 = vadd.xlane.f32.xlu0 %v2835_v50 }
0x1a65   :  { %3851 = vadd.xlane.f32.xlu0 %v3850_v19 }
0x1a7c   :  { %v3090_v12 = vpop.xlane.xlu2 %3089 }
0x1a8c   :  { %v3598_v22 = vpop.xlane.xlu2 %3597 }
0x1aa5   :  { %v4094_v28 = vpop.permute.xlu0 %4093 }
0x1aa6   :  { %v4096_v11 = vadd.f32 %v4094_v28, %v4090_v29 }
0x1aa8   :  { %4693 = vtanh.f32 %v4096_v11 }
0x1aae   :  { %v4694_v26 = vpop.eup %4693 }
0x1aaf   :  { %v4098_v60 = vmul.f32 %v4694_v26, %v4088_v59 }
0x1ab1   :  { %v4099_v43 = vmul.f32 %v4098_v60, %v6578_v61  ;;  %v4109_v61 = vstv %s6621_s6 }
0x1ab3   :  { %4101 = vrot.lane.b32.xlu1 %v4099_v43, %s4991_s17  ;;  %s4992_s17 = smov [#allocation9]  }
0x1ab4   :  { %s4118_s25 = sshll.u32 %s4992_s17, 4  ;;  %s4119_s25 = int_to_ptr.vmem [resolvable:$true] %s4118_s25 }
0x1ad0   :  { %v2837_v7 = vpop.xlane.xlu0 %2836 }
0x1ad1   :  { %v3091_v9 = vmax.f32 %v2837_v7, %v3090_v12 }
0x1ad8   :  { %v3852_v17 = vpop.xlane.xlu0 %3851 }
0x1add   :  { %3343 = vadd.xlane.f32.xlu1 %v3342_v47 }
0x1b25   :  { %v4102_v20 = vpop.permute.xlu1 %4101 }
0x1b26   :  { %v4104_v54 = vsel %vm2834_vm9, %v4102_v20, 0.0 }
0x1b27   :  { %4105 = vadd.xlane.f32.xlu2 %v4104_v54 }
0x1b50   :  { %v3344_v57 = vpop.xlane.xlu1 %3343 }
0x1b51   :  { %v3345_v1 = vmax.f32 %v3091_v9, %v3344_v57 }
0x1b53   :  { %v3599_v16 = vmax.f32 %v3345_v1, %v3598_v22 }
0x1b55   :  { %v3853_v31 = vmax.f32 %v3599_v16, %v3852_v17 }
0x1b9a   :  { %v4106_v23 = vpop.xlane.xlu2 %4105 }
0x1b9b   :  { %v4107_v40 = vmax.f32 %v3853_v31, %v4106_v23 }
0x1b9d   :  { %v4110_v0 = vadd.f32 %v4109_v61, %v4107_v40 }
0x1b9f   :  { %4112 = vst.msk [vmem:[#allocation9] sm:$0x1] %vm4111_vm3, %v4110_v0 }
0x1ba0   :  { %4123 = dma.vmem_to_hbm [thread:$0]  %s4119_s25, 16, %s4121_s28, [#allocation5]  }
0x1ba1   :  { %4983 = dma.done.wait [#allocation5], 16  }
0x1ba2   :  { %4984 = vsyncadd [#allocation5], 4294967280 }
0x1ba3   :  { %4128 = vsyncpa [#allocation4], 1 }
0x1ba4   :  { %4129 = vsyncpa [#allocation7], 1 }
0x1ba5   :  { %4130 = vsyncpa [#allocation5], 1 }

</bundles_post_ra>
